<compile_context>
chip_gen: v6e
topology: v6e:2x2x1
jax: 0.10.0
libtpu: 0.0.40
codegen_flags: <defaults>
</compile_context>

<pallas_src>
import jax
import jax.numpy as jnp
from jax.experimental import pallas as pl
from jax.experimental.pallas import tpu as pltpu

EPS = 1e-5           # nn.InstanceNorm2d default eps
# TODO(synk): each Convolution owns a learnable PReLU slope; all are 0.25 at
# default init, so a single inlined constant is exact here.
PRELU_SLOPE = 0.25

H, W = 16, 16
M = H * W            # 256 lanes per sample at full resolution
W_BITS = W.bit_length() - 1
M2 = (H // 2) * (W // 2)   # 64 active positions at the bottleneck


# ---------------- packed-weight slab layout (shared by wrapper & kernel) ------

def _slab_layout():
    # (name, rows, cols); rows are padded to a multiple of 8 inside the slab.
    names = [('in', 8, 72), ('down', 16, 72), ('bot', 16, 144), ('up', 8, 144),
             ('dec', 8, 144), ('out', 3, 72), ('att', 16, 16), ('psi', 1, 8)]
    layout, off = {}, 0
    for name, r, c in names:
        layout[name] = (off, r, c)
        off += (r + 7) // 8 * 8
    return layout, off


_SLAB, _SLAB_ROWS = _slab_layout()
_SLAB_COLS = 144


# ---------------- the fused forward-pass kernel ----------------

def _attention_unet_kernel(x_ref, w_ref, b_ref, o_ref):
    f32 = jnp.float32
    bf16 = jnp.bfloat16

    x = x_ref[0]                       # (8, L)   L = samples_per_block * 256
    L = x.shape[1]
    spb = L // M                       # samples folded into the lane axis

    def w_of(name):                    # static slab slices: zero-cost ref views
        off, r, c = _SLAB[name]
        return w_ref[off:off + r, 0:c]

    def b_of(name):
        off, r, _ = _SLAB[name]
        return b_ref[off:off + r, 0:1]

    # -------- per-pixel coordinates and hoisted masks (computed once) --------
    idx = jax.lax.broadcasted_iota(jnp.int32, (1, L), 1)
    pidx = idx & (M - 1)               # index within the owning sample
    row = pidx >> W_BITS
    col = pidx & (W - 1)

    def tap_masks(step):
        masks = {}
        for di in (-1, 0, 1):
            for dj in (-1, 0, 1):
                if di == 0 and dj == 0:
                    masks[(di, dj)] = None
                else:
                    rr = row + di * step
                    cc = col + dj * step
                    masks[(di, dj)] = (rr >= 0) & (rr < H) & (cc >= 0) & (cc < W)
        return masks

    m1 = tap_masks(1)                  # regular 3x3 / pad 1
    m2 = tap_masks(2)                  # dilation-2 3x3 (embedded 8x8 bottom conv)
    even = (((row & 1) == 0) & ((col & 1) == 0)).astype(f32)   # stride-2 lanes

    # -------- conv: rolled tap views -> one bf16 MXU matmul --------
    def conv3x3(act, name, masks, step):
        taps = []
        for di in (-1, 0, 1):
            for dj in (-1, 0, 1):
                off = (di * W + dj) * step
                t = act if off == 0 else pltpu.roll(act, shift=(-off) % L, axis=1)
                m = masks[(di, dj)]
                if m is not None:
                    t = jnp.where(m, t, 0.0)   # kills image & sample-boundary wrap
                taps.append(t)
        patches = jnp.concatenate(taps, axis=0).astype(bf16)    # (9*Cin, L)
        return jnp.dot(w_of(name), patches, preferred_element_type=f32) + b_of(name)

    # -------- InstanceNorm: per-sample segment stats, one reduce per call ----
    def inorm(y, count, act_mask=None):
        c = y.shape[0]
        if act_mask is not None:
            y = y * act_mask
        inv = 1.0 / count
        segs = []
        for s in range(spb):
            seg = y[:, s * M:(s + 1) * M] if spb > 1 else y
            st = jnp.sum(jnp.concatenate([seg, seg * seg], axis=0),
                         axis=1, keepdims=True)                 # (2C, 1)
            mean = st[0:c] * inv
            var = st[c:2 * c] * inv - mean * mean
            segs.append((seg - mean) * jax.lax.rsqrt(var + EPS))
        yn = segs[0] if spb == 1 else jnp.concatenate(segs, axis=1)
        if act_mask is not None:
            yn = yn * act_mask         # keep inactive (odd) lanes at exactly 0
        return yn

    def in_prelu(y, count, act_mask=None):
        yn = inorm(y, count, act_mask)
        return jnp.where(yn >= 0.0, yn, yn * PRELU_SLOPE)

    # ------------- encoder -------------
    # input block: 4->8, stride 1, conv -> IN -> PReLU
    f0 = in_prelu(conv3x3(x, 'in', m1, 1), M)                          # (8, L)
    # down layer: 8->16, stride 2 == stride-1 conv, stats/values on even pixels
    a1 = in_prelu(conv3x3(f0, 'down', m1, 1), M2, even)                # (16, L) embedded
    # bottom: 16->16 on the 8x8 map == dilation-2 conv on the embedded map
    f1 = in_prelu(conv3x3(a1, 'bot', m2, 2), M2, even)                 # (16, L) embedded

    # ------------- decoder -------------
    # ConvTranspose(16->8, k3, s2, p1, op1) == pad-1 conv of the flipped/
    # transposed weight on the embedded bottleneck map.
    up = in_prelu(conv3x3(f1, 'up', m1, 1), M)                         # (8, L)

    # attention gate: skip * sigmoid(IN(psi(relu(IN(Wg g) + IN(Wx x)))))
    gx = jnp.concatenate([up, f0], axis=0).astype(bf16)                # (16, L)
    za = jnp.dot(w_of('att'), gx, preferred_element_type=f32) + b_of('att')
    zn = inorm(za, M)                                                  # per-channel IN
    r = jnp.maximum(zn[0:8, :] + zn[8:16, :], 0.0)                     # (8, L)
    ps = jnp.dot(w_of('psi'), r.astype(bf16),
                 preferred_element_type=f32) + b_of('psi')             # (1, L)
    sig = 1.0 / (1.0 + jnp.exp(-inorm(ps, M)))
    att = f0 * sig

    # concat(up, attended skip) -> conv -> IN -> PReLU
    cat = jnp.concatenate([up, att], axis=0)                           # (16, L)
    dec = in_prelu(conv3x3(cat, 'dec', m1, 1), M)                      # (8, L)

    # out block: 3x3 conv only (bias, no norm / act)
    o_ref[0, :, :] = conv3x3(dec, 'out', m1, 1)                        # (3, L)


# ---------------- JAX wrapper: weight packing + pallas_call ----------------

def _reorder_conv_weight(wt, cin_pad=None):
    # torch (Cout, Cin, 3, 3) -> (Cout, 9*Cin); K index = (i*3+j)*Cin + c
    cout, cin, kh, kw = wt.shape
    if cin_pad is not None and cin_pad != cin:
        wt = jnp.pad(wt, ((0, 0), (0, cin_pad - cin), (0, 0), (0, 0)))
        cin = cin_pad
    return wt.transpose(0, 2, 3, 1).reshape(cout, kh * kw * cin)


def _pack_params(params):
    att = params['att']
    wg = att['wg'].reshape(8, 8)
    wx = att['wx'].reshape(8, 8)
    z8 = jnp.zeros((8, 8), jnp.float32)
    w_att = jnp.concatenate(                                    # block-diag (16, 16)
        [jnp.concatenate([wg, z8], axis=1),
         jnp.concatenate([z8, wx], axis=1)], axis=0)
    b_att = jnp.concatenate([att['bg'], att['bx']])

    # ConvTranspose2d == dilate + pad + conv with flipped / transposed weight.
    w_up_conv = jnp.flip(params['up_wt'], axis=(2, 3)).transpose(1, 0, 2, 3)

    entries = {
        'in':   (_reorder_conv_weight(params['enc_in_w'], cin_pad=8), params['enc_in_b']),
        'down': (_reorder_conv_weight(params['enc0_w']),              params['enc0_b']),
        'bot':  (_reorder_conv_weight(params['bot_w']),               params['bot_b']),
        'up':   (_reorder_conv_weight(w_up_conv),                     params['up_b']),
        'dec':  (_reorder_conv_weight(params['dec_conv_w']),          params['dec_conv_b']),
        'out':  (_reorder_conv_weight(params['out_w']),               params['out_b']),
        'att':  (w_att,                                               b_att),
        'psi':  (att['wpsi'].reshape(1, 8),                           att['bpsi']),
    }
    w_slab = jnp.zeros((_SLAB_ROWS, _SLAB_COLS), jnp.float32)
    b_slab = jnp.zeros((_SLAB_ROWS, 1), jnp.float32)
    for name, (w2d, b1d) in entries.items():
        off, r, c = _SLAB[name]
        w_slab = w_slab.at[off:off + r, 0:c].set(w2d)
        b_slab = b_slab.at[off:off + r, 0].set(b1d.reshape(-1))
    return w_slab.astype(jnp.bfloat16), b_slab


def _samples_per_block(n):
    # v7x has 2 TensorCores/chip: keep one sample per grid step so the
    # "parallel" grid axis spreads samples across cores.  Single-TC chips
    # (v5e / v6e): fold the whole batch into the lane axis — it halves the
    # serial dependency chain and doubles MXU lane utilization.
    try:
        kind = jax.devices()[0].device_kind.lower().replace(" ", "").replace("-", "")
    except Exception:
        kind = ""
    if ("v7" in kind or "tpu7" in kind) and n > 1:
        return 1
    return n


def attention_unet_forward(params, x):
    n, cin, hh, ww = x.shape
    assert (cin, hh, ww) == (4, H, W)

    spb = _samples_per_block(n)
    nb = n // spb
    L = spb * M

    # channels-first, flattened-spatial (lane-dense) input; pad channels 4 -> 8
    # so every im2col chunk is sublane(8)-aligned; samples folded onto lanes.
    xf = jnp.pad(x.reshape(n, cin, M), ((0, 0), (0, 8 - cin), (0, 0)))
    xf = xf.reshape(nb, spb, 8, M).transpose(0, 2, 1, 3).reshape(nb, 8, L)

    w_slab, b_slab = _pack_params(params)

    out = pl.pallas_call(
        _attention_unet_kernel,
        out_shape=jax.ShapeDtypeStruct((nb, 3, L), jnp.float32),
        grid=(nb,),
        in_specs=[
            pl.BlockSpec((1, 8, L), lambda g: (g, 0, 0)),
            pl.BlockSpec(w_slab.shape, lambda g: (0, 0)),   # constant: fetched once
            pl.BlockSpec(b_slab.shape, lambda g: (0, 0)),
        ],
        out_specs=pl.BlockSpec((1, 3, L), lambda g: (g, 0, 0)),
        compiler_params=pltpu.CompilerParams(
            dimension_semantics=("parallel",)),   # v7x: one sample per TensorCore
    )(xf, w_slab, b_slab)

    out = out.reshape(nb, 3, spb, M).transpose(0, 2, 1, 3)
    return out.reshape(n, 3, H, W)


# ---------------- Parameters (deterministic, in-script) ----------------

def init_params(key):
    ks = iter(jax.random.split(key, 32))

    def uni(shape, fan_in):
        bound = 1.0 / (fan_in ** 0.5)
        return jax.random.uniform(next(ks), shape, jnp.float32, -bound, bound)

    # channels=(8,16), strides=(2,), in=4, out=3; attention f_int = 16//2 = 8
    return {
        'enc_in_w': uni((8, 4, 3, 3), 4 * 9),    'enc_in_b': uni((8,), 4 * 9),
        'enc0_w':   uni((16, 8, 3, 3), 8 * 9),   'enc0_b':   uni((16,), 8 * 9),
        'bot_w':    uni((16, 16, 3, 3), 16 * 9), 'bot_b':    uni((16,), 16 * 9),
        'up_wt':    uni((16, 8, 3, 3), 16 * 9),  'up_b':     uni((8,), 16 * 9),
        'att': {
            'wg':   uni((8, 8, 1, 1), 8),  'bg':   uni((8,), 8),
            'wx':   uni((8, 8, 1, 1), 8),  'bx':   uni((8,), 8),
            'wpsi': uni((1, 8, 1, 1), 8),  'bpsi': uni((1,), 8),
        },
        'dec_conv_w': uni((8, 16, 3, 3), 16 * 9), 'dec_conv_b': uni((8,), 16 * 9),
        'out_w':    uni((3, 8, 3, 3), 8 * 9),    'out_b':    uni((3,), 8 * 9),
    }


if __name__ == "__main__":
    key = jax.random.PRNGKey(0)
    kp, kx = jax.random.split(key)
    params = init_params(kp)
    x = jax.random.normal(kx, (2, 4, 16, 16), jnp.float32)

    fwd = jax.jit(attention_unet_forward)
    out = fwd(params, x)
    jax.block_until_ready(out)
    assert out.shape == (2, 3, 16, 16), out.shape
    assert bool(jnp.all(jnp.isfinite(out)))
    print("KERNEL_OK")
</pallas_src>

<mosaic_0001>
module attributes {stable_mosaic.version = 11 : i64} {
  func.func @_attention_unet_kernel(%arg0: i32, %arg1: memref<1x8x512xf32, #tpu.memory_space<vmem>>, %arg2: memref<88x144xbf16, #tpu.memory_space<vmem>>, %arg3: memref<88x1xf32, #tpu.memory_space<vmem>>, %arg4: memref<1x3x512xf32, #tpu.memory_space<vmem>>) attributes {dimension_semantics = [#tpu.dimension_semantics<parallel>], iteration_bounds = array<i64: 1>, scalar_prefetch = 0 : i64, scratch_operands = 0 : i64, tpu.core_type = #tpu.core_type<tc>, window_params = [{transform_indices = @transform_0, window_bounds = array<i64: 1, 8, 512>}, {pipeline_mode = #tpu.pipeline_mode<synchronous>, transform_indices = @transform_1, window_bounds = array<i64: 88, 144>}, {pipeline_mode = #tpu.pipeline_mode<synchronous>, transform_indices = @transform_2, window_bounds = array<i64: 88, 1>}, {transform_indices = @transform_3, window_bounds = array<i64: 1, 3, 512>}]} {
    %c0 = arith.constant 0 : index
    %c0_0 = arith.constant 0 : index
    %c0_1 = arith.constant 0 : index
    %0 = vector.load %arg1[%c0, %c0_0, %c0_1] : memref<1x8x512xf32, #tpu.memory_space<vmem>>, vector<1x8x512xf32>
    %1 = vector.shape_cast %0 : vector<1x8x512xf32> to vector<8x512xf32>
    %2 = tpu.iota {dimensions = array<i32: 1>} : vector<1x512xi32>
    %c255_i32 = arith.constant 255 : i32
    %3 = vector.broadcast %c255_i32 : i32 to vector<1x512xi32>
    %4 = arith.andi %2, %3 : vector<1x512xi32>
    %c4_i32 = arith.constant 4 : i32
    %5 = vector.broadcast %c4_i32 : i32 to vector<1x512xi32>
    %6 = arith.shrsi %4, %5 : vector<1x512xi32>
    %c15_i32 = arith.constant 15 : i32
    %7 = vector.broadcast %c15_i32 : i32 to vector<1x512xi32>
    %8 = arith.andi %4, %7 : vector<1x512xi32>
    %c-1_i32 = arith.constant -1 : i32
    %9 = vector.broadcast %c-1_i32 : i32 to vector<1x512xi32>
    %10 = arith.addi %6, %9 : vector<1x512xi32>
    %c-1_i32_2 = arith.constant -1 : i32
    %11 = vector.broadcast %c-1_i32_2 : i32 to vector<1x512xi32>
    %12 = arith.addi %8, %11 : vector<1x512xi32>
    %c0_i32 = arith.constant 0 : i32
    %13 = vector.broadcast %c0_i32 : i32 to vector<1x512xi32>
    %14 = arith.cmpi sge, %10, %13 : vector<1x512xi32>
    %c16_i32 = arith.constant 16 : i32
    %15 = vector.broadcast %c16_i32 : i32 to vector<1x512xi32>
    %16 = arith.cmpi slt, %10, %15 : vector<1x512xi32>
    %17 = arith.andi %14, %16 : vector<1x512xi1>
    %c0_i32_3 = arith.constant 0 : i32
    %18 = vector.broadcast %c0_i32_3 : i32 to vector<1x512xi32>
    %19 = arith.cmpi sge, %12, %18 : vector<1x512xi32>
    %20 = arith.andi %17, %19 : vector<1x512xi1>
    %c16_i32_4 = arith.constant 16 : i32
    %21 = vector.broadcast %c16_i32_4 : i32 to vector<1x512xi32>
    %22 = arith.cmpi slt, %12, %21 : vector<1x512xi32>
    %23 = arith.andi %20, %22 : vector<1x512xi1>
    %c-1_i32_5 = arith.constant -1 : i32
    %24 = vector.broadcast %c-1_i32_5 : i32 to vector<1x512xi32>
    %25 = arith.addi %6, %24 : vector<1x512xi32>
    %c0_i32_6 = arith.constant 0 : i32
    %26 = vector.broadcast %c0_i32_6 : i32 to vector<1x512xi32>
    %27 = arith.addi %8, %26 : vector<1x512xi32>
    %c0_i32_7 = arith.constant 0 : i32
    %28 = vector.broadcast %c0_i32_7 : i32 to vector<1x512xi32>
    %29 = arith.cmpi sge, %25, %28 : vector<1x512xi32>
    %c16_i32_8 = arith.constant 16 : i32
    %30 = vector.broadcast %c16_i32_8 : i32 to vector<1x512xi32>
    %31 = arith.cmpi slt, %25, %30 : vector<1x512xi32>
    %32 = arith.andi %29, %31 : vector<1x512xi1>
    %c0_i32_9 = arith.constant 0 : i32
    %33 = vector.broadcast %c0_i32_9 : i32 to vector<1x512xi32>
    %34 = arith.cmpi sge, %27, %33 : vector<1x512xi32>
    %35 = arith.andi %32, %34 : vector<1x512xi1>
    %c16_i32_10 = arith.constant 16 : i32
    %36 = vector.broadcast %c16_i32_10 : i32 to vector<1x512xi32>
    %37 = arith.cmpi slt, %27, %36 : vector<1x512xi32>
    %38 = arith.andi %35, %37 : vector<1x512xi1>
    %c-1_i32_11 = arith.constant -1 : i32
    %39 = vector.broadcast %c-1_i32_11 : i32 to vector<1x512xi32>
    %40 = arith.addi %6, %39 : vector<1x512xi32>
    %c1_i32 = arith.constant 1 : i32
    %41 = vector.broadcast %c1_i32 : i32 to vector<1x512xi32>
    %42 = arith.addi %8, %41 : vector<1x512xi32>
    %c0_i32_12 = arith.constant 0 : i32
    %43 = vector.broadcast %c0_i32_12 : i32 to vector<1x512xi32>
    %44 = arith.cmpi sge, %40, %43 : vector<1x512xi32>
    %c16_i32_13 = arith.constant 16 : i32
    %45 = vector.broadcast %c16_i32_13 : i32 to vector<1x512xi32>
    %46 = arith.cmpi slt, %40, %45 : vector<1x512xi32>
    %47 = arith.andi %44, %46 : vector<1x512xi1>
    %c0_i32_14 = arith.constant 0 : i32
    %48 = vector.broadcast %c0_i32_14 : i32 to vector<1x512xi32>
    %49 = arith.cmpi sge, %42, %48 : vector<1x512xi32>
    %50 = arith.andi %47, %49 : vector<1x512xi1>
    %c16_i32_15 = arith.constant 16 : i32
    %51 = vector.broadcast %c16_i32_15 : i32 to vector<1x512xi32>
    %52 = arith.cmpi slt, %42, %51 : vector<1x512xi32>
    %53 = arith.andi %50, %52 : vector<1x512xi1>
    %c0_i32_16 = arith.constant 0 : i32
    %54 = vector.broadcast %c0_i32_16 : i32 to vector<1x512xi32>
    %55 = arith.addi %6, %54 : vector<1x512xi32>
    %c-1_i32_17 = arith.constant -1 : i32
    %56 = vector.broadcast %c-1_i32_17 : i32 to vector<1x512xi32>
    %57 = arith.addi %8, %56 : vector<1x512xi32>
    %c0_i32_18 = arith.constant 0 : i32
    %58 = vector.broadcast %c0_i32_18 : i32 to vector<1x512xi32>
    %59 = arith.cmpi sge, %55, %58 : vector<1x512xi32>
    %c16_i32_19 = arith.constant 16 : i32
    %60 = vector.broadcast %c16_i32_19 : i32 to vector<1x512xi32>
    %61 = arith.cmpi slt, %55, %60 : vector<1x512xi32>
    %62 = arith.andi %59, %61 : vector<1x512xi1>
    %c0_i32_20 = arith.constant 0 : i32
    %63 = vector.broadcast %c0_i32_20 : i32 to vector<1x512xi32>
    %64 = arith.cmpi sge, %57, %63 : vector<1x512xi32>
    %65 = arith.andi %62, %64 : vector<1x512xi1>
    %c16_i32_21 = arith.constant 16 : i32
    %66 = vector.broadcast %c16_i32_21 : i32 to vector<1x512xi32>
    %67 = arith.cmpi slt, %57, %66 : vector<1x512xi32>
    %68 = arith.andi %65, %67 : vector<1x512xi1>
    %c0_i32_22 = arith.constant 0 : i32
    %69 = vector.broadcast %c0_i32_22 : i32 to vector<1x512xi32>
    %70 = arith.addi %6, %69 : vector<1x512xi32>
    %c1_i32_23 = arith.constant 1 : i32
    %71 = vector.broadcast %c1_i32_23 : i32 to vector<1x512xi32>
    %72 = arith.addi %8, %71 : vector<1x512xi32>
    %c0_i32_24 = arith.constant 0 : i32
    %73 = vector.broadcast %c0_i32_24 : i32 to vector<1x512xi32>
    %74 = arith.cmpi sge, %70, %73 : vector<1x512xi32>
    %c16_i32_25 = arith.constant 16 : i32
    %75 = vector.broadcast %c16_i32_25 : i32 to vector<1x512xi32>
    %76 = arith.cmpi slt, %70, %75 : vector<1x512xi32>
    %77 = arith.andi %74, %76 : vector<1x512xi1>
    %c0_i32_26 = arith.constant 0 : i32
    %78 = vector.broadcast %c0_i32_26 : i32 to vector<1x512xi32>
    %79 = arith.cmpi sge, %72, %78 : vector<1x512xi32>
    %80 = arith.andi %77, %79 : vector<1x512xi1>
    %c16_i32_27 = arith.constant 16 : i32
    %81 = vector.broadcast %c16_i32_27 : i32 to vector<1x512xi32>
    %82 = arith.cmpi slt, %72, %81 : vector<1x512xi32>
    %83 = arith.andi %80, %82 : vector<1x512xi1>
    %c1_i32_28 = arith.constant 1 : i32
    %84 = vector.broadcast %c1_i32_28 : i32 to vector<1x512xi32>
    %85 = arith.addi %6, %84 : vector<1x512xi32>
    %c-1_i32_29 = arith.constant -1 : i32
    %86 = vector.broadcast %c-1_i32_29 : i32 to vector<1x512xi32>
    %87 = arith.addi %8, %86 : vector<1x512xi32>
    %c0_i32_30 = arith.constant 0 : i32
    %88 = vector.broadcast %c0_i32_30 : i32 to vector<1x512xi32>
    %89 = arith.cmpi sge, %85, %88 : vector<1x512xi32>
    %c16_i32_31 = arith.constant 16 : i32
    %90 = vector.broadcast %c16_i32_31 : i32 to vector<1x512xi32>
    %91 = arith.cmpi slt, %85, %90 : vector<1x512xi32>
    %92 = arith.andi %89, %91 : vector<1x512xi1>
    %c0_i32_32 = arith.constant 0 : i32
    %93 = vector.broadcast %c0_i32_32 : i32 to vector<1x512xi32>
    %94 = arith.cmpi sge, %87, %93 : vector<1x512xi32>
    %95 = arith.andi %92, %94 : vector<1x512xi1>
    %c16_i32_33 = arith.constant 16 : i32
    %96 = vector.broadcast %c16_i32_33 : i32 to vector<1x512xi32>
    %97 = arith.cmpi slt, %87, %96 : vector<1x512xi32>
    %98 = arith.andi %95, %97 : vector<1x512xi1>
    %c1_i32_34 = arith.constant 1 : i32
    %99 = vector.broadcast %c1_i32_34 : i32 to vector<1x512xi32>
    %100 = arith.addi %6, %99 : vector<1x512xi32>
    %c0_i32_35 = arith.constant 0 : i32
    %101 = vector.broadcast %c0_i32_35 : i32 to vector<1x512xi32>
    %102 = arith.addi %8, %101 : vector<1x512xi32>
    %c0_i32_36 = arith.constant 0 : i32
    %103 = vector.broadcast %c0_i32_36 : i32 to vector<1x512xi32>
    %104 = arith.cmpi sge, %100, %103 : vector<1x512xi32>
    %c16_i32_37 = arith.constant 16 : i32
    %105 = vector.broadcast %c16_i32_37 : i32 to vector<1x512xi32>
    %106 = arith.cmpi slt, %100, %105 : vector<1x512xi32>
    %107 = arith.andi %104, %106 : vector<1x512xi1>
    %c0_i32_38 = arith.constant 0 : i32
    %108 = vector.broadcast %c0_i32_38 : i32 to vector<1x512xi32>
    %109 = arith.cmpi sge, %102, %108 : vector<1x512xi32>
    %110 = arith.andi %107, %109 : vector<1x512xi1>
    %c16_i32_39 = arith.constant 16 : i32
    %111 = vector.broadcast %c16_i32_39 : i32 to vector<1x512xi32>
    %112 = arith.cmpi slt, %102, %111 : vector<1x512xi32>
    %113 = arith.andi %110, %112 : vector<1x512xi1>
    %c1_i32_40 = arith.constant 1 : i32
    %114 = vector.broadcast %c1_i32_40 : i32 to vector<1x512xi32>
    %115 = arith.addi %6, %114 : vector<1x512xi32>
    %c1_i32_41 = arith.constant 1 : i32
    %116 = vector.broadcast %c1_i32_41 : i32 to vector<1x512xi32>
    %117 = arith.addi %8, %116 : vector<1x512xi32>
    %c0_i32_42 = arith.constant 0 : i32
    %118 = vector.broadcast %c0_i32_42 : i32 to vector<1x512xi32>
    %119 = arith.cmpi sge, %115, %118 : vector<1x512xi32>
    %c16_i32_43 = arith.constant 16 : i32
    %120 = vector.broadcast %c16_i32_43 : i32 to vector<1x512xi32>
    %121 = arith.cmpi slt, %115, %120 : vector<1x512xi32>
    %122 = arith.andi %119, %121 : vector<1x512xi1>
    %c0_i32_44 = arith.constant 0 : i32
    %123 = vector.broadcast %c0_i32_44 : i32 to vector<1x512xi32>
    %124 = arith.cmpi sge, %117, %123 : vector<1x512xi32>
    %125 = arith.andi %122, %124 : vector<1x512xi1>
    %c16_i32_45 = arith.constant 16 : i32
    %126 = vector.broadcast %c16_i32_45 : i32 to vector<1x512xi32>
    %127 = arith.cmpi slt, %117, %126 : vector<1x512xi32>
    %128 = arith.andi %125, %127 : vector<1x512xi1>
    %c-2_i32 = arith.constant -2 : i32
    %129 = vector.broadcast %c-2_i32 : i32 to vector<1x512xi32>
    %130 = arith.addi %6, %129 : vector<1x512xi32>
    %c-2_i32_46 = arith.constant -2 : i32
    %131 = vector.broadcast %c-2_i32_46 : i32 to vector<1x512xi32>
    %132 = arith.addi %8, %131 : vector<1x512xi32>
    %c0_i32_47 = arith.constant 0 : i32
    %133 = vector.broadcast %c0_i32_47 : i32 to vector<1x512xi32>
    %134 = arith.cmpi sge, %130, %133 : vector<1x512xi32>
    %c16_i32_48 = arith.constant 16 : i32
    %135 = vector.broadcast %c16_i32_48 : i32 to vector<1x512xi32>
    %136 = arith.cmpi slt, %130, %135 : vector<1x512xi32>
    %137 = arith.andi %134, %136 : vector<1x512xi1>
    %c0_i32_49 = arith.constant 0 : i32
    %138 = vector.broadcast %c0_i32_49 : i32 to vector<1x512xi32>
    %139 = arith.cmpi sge, %132, %138 : vector<1x512xi32>
    %140 = arith.andi %137, %139 : vector<1x512xi1>
    %c16_i32_50 = arith.constant 16 : i32
    %141 = vector.broadcast %c16_i32_50 : i32 to vector<1x512xi32>
    %142 = arith.cmpi slt, %132, %141 : vector<1x512xi32>
    %143 = arith.andi %140, %142 : vector<1x512xi1>
    %c-2_i32_51 = arith.constant -2 : i32
    %144 = vector.broadcast %c-2_i32_51 : i32 to vector<1x512xi32>
    %145 = arith.addi %6, %144 : vector<1x512xi32>
    %c0_i32_52 = arith.constant 0 : i32
    %146 = vector.broadcast %c0_i32_52 : i32 to vector<1x512xi32>
    %147 = arith.addi %8, %146 : vector<1x512xi32>
    %c0_i32_53 = arith.constant 0 : i32
    %148 = vector.broadcast %c0_i32_53 : i32 to vector<1x512xi32>
    %149 = arith.cmpi sge, %145, %148 : vector<1x512xi32>
    %c16_i32_54 = arith.constant 16 : i32
    %150 = vector.broadcast %c16_i32_54 : i32 to vector<1x512xi32>
    %151 = arith.cmpi slt, %145, %150 : vector<1x512xi32>
    %152 = arith.andi %149, %151 : vector<1x512xi1>
    %c0_i32_55 = arith.constant 0 : i32
    %153 = vector.broadcast %c0_i32_55 : i32 to vector<1x512xi32>
    %154 = arith.cmpi sge, %147, %153 : vector<1x512xi32>
    %155 = arith.andi %152, %154 : vector<1x512xi1>
    %c16_i32_56 = arith.constant 16 : i32
    %156 = vector.broadcast %c16_i32_56 : i32 to vector<1x512xi32>
    %157 = arith.cmpi slt, %147, %156 : vector<1x512xi32>
    %158 = arith.andi %155, %157 : vector<1x512xi1>
    %c-2_i32_57 = arith.constant -2 : i32
    %159 = vector.broadcast %c-2_i32_57 : i32 to vector<1x512xi32>
    %160 = arith.addi %6, %159 : vector<1x512xi32>
    %c2_i32 = arith.constant 2 : i32
    %161 = vector.broadcast %c2_i32 : i32 to vector<1x512xi32>
    %162 = arith.addi %8, %161 : vector<1x512xi32>
    %c0_i32_58 = arith.constant 0 : i32
    %163 = vector.broadcast %c0_i32_58 : i32 to vector<1x512xi32>
    %164 = arith.cmpi sge, %160, %163 : vector<1x512xi32>
    %c16_i32_59 = arith.constant 16 : i32
    %165 = vector.broadcast %c16_i32_59 : i32 to vector<1x512xi32>
    %166 = arith.cmpi slt, %160, %165 : vector<1x512xi32>
    %167 = arith.andi %164, %166 : vector<1x512xi1>
    %c0_i32_60 = arith.constant 0 : i32
    %168 = vector.broadcast %c0_i32_60 : i32 to vector<1x512xi32>
    %169 = arith.cmpi sge, %162, %168 : vector<1x512xi32>
    %170 = arith.andi %167, %169 : vector<1x512xi1>
    %c16_i32_61 = arith.constant 16 : i32
    %171 = vector.broadcast %c16_i32_61 : i32 to vector<1x512xi32>
    %172 = arith.cmpi slt, %162, %171 : vector<1x512xi32>
    %173 = arith.andi %170, %172 : vector<1x512xi1>
    %c0_i32_62 = arith.constant 0 : i32
    %174 = vector.broadcast %c0_i32_62 : i32 to vector<1x512xi32>
    %175 = arith.addi %6, %174 : vector<1x512xi32>
    %c-2_i32_63 = arith.constant -2 : i32
    %176 = vector.broadcast %c-2_i32_63 : i32 to vector<1x512xi32>
    %177 = arith.addi %8, %176 : vector<1x512xi32>
    %c0_i32_64 = arith.constant 0 : i32
    %178 = vector.broadcast %c0_i32_64 : i32 to vector<1x512xi32>
    %179 = arith.cmpi sge, %175, %178 : vector<1x512xi32>
    %c16_i32_65 = arith.constant 16 : i32
    %180 = vector.broadcast %c16_i32_65 : i32 to vector<1x512xi32>
    %181 = arith.cmpi slt, %175, %180 : vector<1x512xi32>
    %182 = arith.andi %179, %181 : vector<1x512xi1>
    %c0_i32_66 = arith.constant 0 : i32
    %183 = vector.broadcast %c0_i32_66 : i32 to vector<1x512xi32>
    %184 = arith.cmpi sge, %177, %183 : vector<1x512xi32>
    %185 = arith.andi %182, %184 : vector<1x512xi1>
    %c16_i32_67 = arith.constant 16 : i32
    %186 = vector.broadcast %c16_i32_67 : i32 to vector<1x512xi32>
    %187 = arith.cmpi slt, %177, %186 : vector<1x512xi32>
    %188 = arith.andi %185, %187 : vector<1x512xi1>
    %c0_i32_68 = arith.constant 0 : i32
    %189 = vector.broadcast %c0_i32_68 : i32 to vector<1x512xi32>
    %190 = arith.addi %6, %189 : vector<1x512xi32>
    %c2_i32_69 = arith.constant 2 : i32
    %191 = vector.broadcast %c2_i32_69 : i32 to vector<1x512xi32>
    %192 = arith.addi %8, %191 : vector<1x512xi32>
    %c0_i32_70 = arith.constant 0 : i32
    %193 = vector.broadcast %c0_i32_70 : i32 to vector<1x512xi32>
    %194 = arith.cmpi sge, %190, %193 : vector<1x512xi32>
    %c16_i32_71 = arith.constant 16 : i32
    %195 = vector.broadcast %c16_i32_71 : i32 to vector<1x512xi32>
    %196 = arith.cmpi slt, %190, %195 : vector<1x512xi32>
    %197 = arith.andi %194, %196 : vector<1x512xi1>
    %c0_i32_72 = arith.constant 0 : i32
    %198 = vector.broadcast %c0_i32_72 : i32 to vector<1x512xi32>
    %199 = arith.cmpi sge, %192, %198 : vector<1x512xi32>
    %200 = arith.andi %197, %199 : vector<1x512xi1>
    %c16_i32_73 = arith.constant 16 : i32
    %201 = vector.broadcast %c16_i32_73 : i32 to vector<1x512xi32>
    %202 = arith.cmpi slt, %192, %201 : vector<1x512xi32>
    %203 = arith.andi %200, %202 : vector<1x512xi1>
    %c2_i32_74 = arith.constant 2 : i32
    %204 = vector.broadcast %c2_i32_74 : i32 to vector<1x512xi32>
    %205 = arith.addi %6, %204 : vector<1x512xi32>
    %c-2_i32_75 = arith.constant -2 : i32
    %206 = vector.broadcast %c-2_i32_75 : i32 to vector<1x512xi32>
    %207 = arith.addi %8, %206 : vector<1x512xi32>
    %c0_i32_76 = arith.constant 0 : i32
    %208 = vector.broadcast %c0_i32_76 : i32 to vector<1x512xi32>
    %209 = arith.cmpi sge, %205, %208 : vector<1x512xi32>
    %c16_i32_77 = arith.constant 16 : i32
    %210 = vector.broadcast %c16_i32_77 : i32 to vector<1x512xi32>
    %211 = arith.cmpi slt, %205, %210 : vector<1x512xi32>
    %212 = arith.andi %209, %211 : vector<1x512xi1>
    %c0_i32_78 = arith.constant 0 : i32
    %213 = vector.broadcast %c0_i32_78 : i32 to vector<1x512xi32>
    %214 = arith.cmpi sge, %207, %213 : vector<1x512xi32>
    %215 = arith.andi %212, %214 : vector<1x512xi1>
    %c16_i32_79 = arith.constant 16 : i32
    %216 = vector.broadcast %c16_i32_79 : i32 to vector<1x512xi32>
    %217 = arith.cmpi slt, %207, %216 : vector<1x512xi32>
    %218 = arith.andi %215, %217 : vector<1x512xi1>
    %c2_i32_80 = arith.constant 2 : i32
    %219 = vector.broadcast %c2_i32_80 : i32 to vector<1x512xi32>
    %220 = arith.addi %6, %219 : vector<1x512xi32>
    %c0_i32_81 = arith.constant 0 : i32
    %221 = vector.broadcast %c0_i32_81 : i32 to vector<1x512xi32>
    %222 = arith.addi %8, %221 : vector<1x512xi32>
    %c0_i32_82 = arith.constant 0 : i32
    %223 = vector.broadcast %c0_i32_82 : i32 to vector<1x512xi32>
    %224 = arith.cmpi sge, %220, %223 : vector<1x512xi32>
    %c16_i32_83 = arith.constant 16 : i32
    %225 = vector.broadcast %c16_i32_83 : i32 to vector<1x512xi32>
    %226 = arith.cmpi slt, %220, %225 : vector<1x512xi32>
    %227 = arith.andi %224, %226 : vector<1x512xi1>
    %c0_i32_84 = arith.constant 0 : i32
    %228 = vector.broadcast %c0_i32_84 : i32 to vector<1x512xi32>
    %229 = arith.cmpi sge, %222, %228 : vector<1x512xi32>
    %230 = arith.andi %227, %229 : vector<1x512xi1>
    %c16_i32_85 = arith.constant 16 : i32
    %231 = vector.broadcast %c16_i32_85 : i32 to vector<1x512xi32>
    %232 = arith.cmpi slt, %222, %231 : vector<1x512xi32>
    %233 = arith.andi %230, %232 : vector<1x512xi1>
    %c2_i32_86 = arith.constant 2 : i32
    %234 = vector.broadcast %c2_i32_86 : i32 to vector<1x512xi32>
    %235 = arith.addi %6, %234 : vector<1x512xi32>
    %c2_i32_87 = arith.constant 2 : i32
    %236 = vector.broadcast %c2_i32_87 : i32 to vector<1x512xi32>
    %237 = arith.addi %8, %236 : vector<1x512xi32>
    %c0_i32_88 = arith.constant 0 : i32
    %238 = vector.broadcast %c0_i32_88 : i32 to vector<1x512xi32>
    %239 = arith.cmpi sge, %235, %238 : vector<1x512xi32>
    %c16_i32_89 = arith.constant 16 : i32
    %240 = vector.broadcast %c16_i32_89 : i32 to vector<1x512xi32>
    %241 = arith.cmpi slt, %235, %240 : vector<1x512xi32>
    %242 = arith.andi %239, %241 : vector<1x512xi1>
    %c0_i32_90 = arith.constant 0 : i32
    %243 = vector.broadcast %c0_i32_90 : i32 to vector<1x512xi32>
    %244 = arith.cmpi sge, %237, %243 : vector<1x512xi32>
    %245 = arith.andi %242, %244 : vector<1x512xi1>
    %c16_i32_91 = arith.constant 16 : i32
    %246 = vector.broadcast %c16_i32_91 : i32 to vector<1x512xi32>
    %247 = arith.cmpi slt, %237, %246 : vector<1x512xi32>
    %248 = arith.andi %245, %247 : vector<1x512xi1>
    %c1_i32_92 = arith.constant 1 : i32
    %249 = vector.broadcast %c1_i32_92 : i32 to vector<1x512xi32>
    %250 = arith.andi %6, %249 : vector<1x512xi32>
    %c0_i32_93 = arith.constant 0 : i32
    %251 = vector.broadcast %c0_i32_93 : i32 to vector<1x512xi32>
    %252 = arith.cmpi eq, %250, %251 : vector<1x512xi32>
    %c1_i32_94 = arith.constant 1 : i32
    %253 = vector.broadcast %c1_i32_94 : i32 to vector<1x512xi32>
    %254 = arith.andi %8, %253 : vector<1x512xi32>
    %c0_i32_95 = arith.constant 0 : i32
    %255 = vector.broadcast %c0_i32_95 : i32 to vector<1x512xi32>
    %256 = arith.cmpi eq, %254, %255 : vector<1x512xi32>
    %257 = arith.andi %252, %256 : vector<1x512xi1>
    %258 = arith.extui %257 : vector<1x512xi1> to vector<1x512xi32>
    %259 = arith.sitofp %258 : vector<1x512xi32> to vector<1x512xf32>
    %c17_i32 = arith.constant 17 : i32
    %260 = tpu.dynamic_rotate %1 by %c17_i32 dim 1 : vector<8x512xf32>, i32 -> vector<8x512xf32>
    %cst = arith.constant 0.000000e+00 : f32
    %261 = vector.shape_cast %23 : vector<1x512xi1> to vector<1x512xi1>
    %262 = vector.broadcast %261 : vector<1x512xi1> to vector<8x512xi1>
    %263 = vector.broadcast %cst : f32 to vector<8x512xf32>
    %264 = arith.select %262, %260, %263 : vector<8x512xi1>, vector<8x512xf32>
    %c16_i32_96 = arith.constant 16 : i32
    %265 = tpu.dynamic_rotate %1 by %c16_i32_96 dim 1 : vector<8x512xf32>, i32 -> vector<8x512xf32>
    %cst_97 = arith.constant 0.000000e+00 : f32
    %266 = vector.shape_cast %38 : vector<1x512xi1> to vector<1x512xi1>
    %267 = vector.broadcast %266 : vector<1x512xi1> to vector<8x512xi1>
    %268 = vector.broadcast %cst_97 : f32 to vector<8x512xf32>
    %269 = arith.select %267, %265, %268 : vector<8x512xi1>, vector<8x512xf32>
    %c15_i32_98 = arith.constant 15 : i32
    %270 = tpu.dynamic_rotate %1 by %c15_i32_98 dim 1 : vector<8x512xf32>, i32 -> vector<8x512xf32>
    %cst_99 = arith.constant 0.000000e+00 : f32
    %271 = vector.shape_cast %53 : vector<1x512xi1> to vector<1x512xi1>
    %272 = vector.broadcast %271 : vector<1x512xi1> to vector<8x512xi1>
    %273 = vector.broadcast %cst_99 : f32 to vector<8x512xf32>
    %274 = arith.select %272, %270, %273 : vector<8x512xi1>, vector<8x512xf32>
    %c1_i32_100 = arith.constant 1 : i32
    %275 = tpu.dynamic_rotate %1 by %c1_i32_100 dim 1 : vector<8x512xf32>, i32 -> vector<8x512xf32>
    %cst_101 = arith.constant 0.000000e+00 : f32
    %276 = vector.shape_cast %68 : vector<1x512xi1> to vector<1x512xi1>
    %277 = vector.broadcast %276 : vector<1x512xi1> to vector<8x512xi1>
    %278 = vector.broadcast %cst_101 : f32 to vector<8x512xf32>
    %279 = arith.select %277, %275, %278 : vector<8x512xi1>, vector<8x512xf32>
    %c511_i32 = arith.constant 511 : i32
    %280 = tpu.dynamic_rotate %1 by %c511_i32 dim 1 : vector<8x512xf32>, i32 -> vector<8x512xf32>
    %cst_102 = arith.constant 0.000000e+00 : f32
    %281 = vector.shape_cast %83 : vector<1x512xi1> to vector<1x512xi1>
    %282 = vector.broadcast %281 : vector<1x512xi1> to vector<8x512xi1>
    %283 = vector.broadcast %cst_102 : f32 to vector<8x512xf32>
    %284 = arith.select %282, %280, %283 : vector<8x512xi1>, vector<8x512xf32>
    %c497_i32 = arith.constant 497 : i32
    %285 = tpu.dynamic_rotate %1 by %c497_i32 dim 1 : vector<8x512xf32>, i32 -> vector<8x512xf32>
    %cst_103 = arith.constant 0.000000e+00 : f32
    %286 = vector.shape_cast %98 : vector<1x512xi1> to vector<1x512xi1>
    %287 = vector.broadcast %286 : vector<1x512xi1> to vector<8x512xi1>
    %288 = vector.broadcast %cst_103 : f32 to vector<8x512xf32>
    %289 = arith.select %287, %285, %288 : vector<8x512xi1>, vector<8x512xf32>
    %c496_i32 = arith.constant 496 : i32
    %290 = tpu.dynamic_rotate %1 by %c496_i32 dim 1 : vector<8x512xf32>, i32 -> vector<8x512xf32>
    %cst_104 = arith.constant 0.000000e+00 : f32
    %291 = vector.shape_cast %113 : vector<1x512xi1> to vector<1x512xi1>
    %292 = vector.broadcast %291 : vector<1x512xi1> to vector<8x512xi1>
    %293 = vector.broadcast %cst_104 : f32 to vector<8x512xf32>
    %294 = arith.select %292, %290, %293 : vector<8x512xi1>, vector<8x512xf32>
    %c495_i32 = arith.constant 495 : i32
    %295 = tpu.dynamic_rotate %1 by %c495_i32 dim 1 : vector<8x512xf32>, i32 -> vector<8x512xf32>
    %cst_105 = arith.constant 0.000000e+00 : f32
    %296 = vector.shape_cast %128 : vector<1x512xi1> to vector<1x512xi1>
    %297 = vector.broadcast %296 : vector<1x512xi1> to vector<8x512xi1>
    %298 = vector.broadcast %cst_105 : f32 to vector<8x512xf32>
    %299 = arith.select %297, %295, %298 : vector<8x512xi1>, vector<8x512xf32>
    %300 = tpu.concatenate %264, %269, %274, %279, %1, %284, %289, %294, %299 in 0 : vector<8x512xf32>, vector<8x512xf32>, vector<8x512xf32>, vector<8x512xf32>, vector<8x512xf32>, vector<8x512xf32>, vector<8x512xf32>, vector<8x512xf32>, vector<8x512xf32> -> vector<72x512xf32>
    %301 = arith.truncf %300 : vector<72x512xf32> to vector<72x512xbf16>
    %c0_106 = arith.constant 0 : index
    %c0_107 = arith.constant 0 : index
    %302 = vector.load %arg2[%c0_106, %c0_107] : memref<88x144xbf16, #tpu.memory_space<vmem>>, vector<8x72xbf16>
    %cst_108 = arith.constant dense<0.000000e+00> : vector<8x512xf32>
    %303 = tpu.matmul %302, %301, %cst_108 {dimension_numbers = #tpu.dot_dimension_numbers<[1], [0], [0], [1], [0, 0, 1, 1], [], []>} : vector<8x72xbf16>, vector<72x512xbf16>, vector<8x512xf32> -> vector<8x512xf32>
    %c0_109 = arith.constant 0 : index
    %c0_110 = arith.constant 0 : index
    %304 = vector.load %arg3[%c0_109, %c0_110] : memref<88x1xf32, #tpu.memory_space<vmem>>, vector<8x1xf32>
    %305 = vector.broadcast %304 : vector<8x1xf32> to vector<8x512xf32>
    %306 = arith.addf %303, %305 : vector<8x512xf32>
    %307 = vector.extract_strided_slice %306 {offsets = [0, 0], sizes = [8, 256], strides = [1, 1]} : vector<8x512xf32> to vector<8x256xf32>
    %308 = arith.mulf %307, %307 : vector<8x256xf32>
    %309 = tpu.concatenate %307, %308 in 0 : vector<8x256xf32>, vector<8x256xf32> -> vector<16x256xf32>
    %cst_111 = arith.constant dense<0.000000e+00> : vector<16xf32>
    %310 = vector.multi_reduction <add>, %309, %cst_111 [1] : vector<16x256xf32> to vector<16xf32>
    %311 = vector.shape_cast %310 : vector<16xf32> to vector<16x1xf32>
    %312 = vector.extract_strided_slice %311 {offsets = [0, 0], sizes = [8, 1], strides = [1, 1]} : vector<16x1xf32> to vector<8x1xf32>
    %cst_112 = arith.constant 3.906250e-03 : f32
    %313 = vector.broadcast %cst_112 : f32 to vector<8x1xf32>
    %314 = arith.mulf %312, %313 : vector<8x1xf32>
    %315 = vector.extract_strided_slice %311 {offsets = [8, 0], sizes = [8, 1], strides = [1, 1]} : vector<16x1xf32> to vector<8x1xf32>
    %cst_113 = arith.constant 3.906250e-03 : f32
    %316 = vector.broadcast %cst_113 : f32 to vector<8x1xf32>
    %317 = arith.mulf %315, %316 : vector<8x1xf32>
    %318 = arith.mulf %314, %314 : vector<8x1xf32>
    %319 = arith.subf %317, %318 : vector<8x1xf32>
    %320 = vector.broadcast %314 : vector<8x1xf32> to vector<8x256xf32>
    %321 = arith.subf %307, %320 : vector<8x256xf32>
    %cst_114 = arith.constant 9.99999974E-6 : f32
    %322 = vector.broadcast %cst_114 : f32 to vector<8x1xf32>
    %323 = arith.addf %319, %322 : vector<8x1xf32>
    %324 = math.rsqrt %323 : vector<8x1xf32>
    %325 = vector.broadcast %324 : vector<8x1xf32> to vector<8x256xf32>
    %326 = arith.mulf %321, %325 : vector<8x256xf32>
    %327 = vector.extract_strided_slice %306 {offsets = [0, 256], sizes = [8, 256], strides = [1, 1]} : vector<8x512xf32> to vector<8x256xf32>
    %328 = arith.mulf %327, %327 : vector<8x256xf32>
    %329 = tpu.concatenate %327, %328 in 0 : vector<8x256xf32>, vector<8x256xf32> -> vector<16x256xf32>
    %cst_115 = arith.constant dense<0.000000e+00> : vector<16xf32>
    %330 = vector.multi_reduction <add>, %329, %cst_115 [1] : vector<16x256xf32> to vector<16xf32>
    %331 = vector.shape_cast %330 : vector<16xf32> to vector<16x1xf32>
    %332 = vector.extract_strided_slice %331 {offsets = [0, 0], sizes = [8, 1], strides = [1, 1]} : vector<16x1xf32> to vector<8x1xf32>
    %cst_116 = arith.constant 3.906250e-03 : f32
    %333 = vector.broadcast %cst_116 : f32 to vector<8x1xf32>
    %334 = arith.mulf %332, %333 : vector<8x1xf32>
    %335 = vector.extract_strided_slice %331 {offsets = [8, 0], sizes = [8, 1], strides = [1, 1]} : vector<16x1xf32> to vector<8x1xf32>
    %cst_117 = arith.constant 3.906250e-03 : f32
    %336 = vector.broadcast %cst_117 : f32 to vector<8x1xf32>
    %337 = arith.mulf %335, %336 : vector<8x1xf32>
    %338 = arith.mulf %334, %334 : vector<8x1xf32>
    %339 = arith.subf %337, %338 : vector<8x1xf32>
    %340 = vector.broadcast %334 : vector<8x1xf32> to vector<8x256xf32>
    %341 = arith.subf %327, %340 : vector<8x256xf32>
    %cst_118 = arith.constant 9.99999974E-6 : f32
    %342 = vector.broadcast %cst_118 : f32 to vector<8x1xf32>
    %343 = arith.addf %339, %342 : vector<8x1xf32>
    %344 = math.rsqrt %343 : vector<8x1xf32>
    %345 = vector.broadcast %344 : vector<8x1xf32> to vector<8x256xf32>
    %346 = arith.mulf %341, %345 : vector<8x256xf32>
    %347 = tpu.concatenate %326, %346 in 1 : vector<8x256xf32>, vector<8x256xf32> -> vector<8x512xf32>
    %cst_119 = arith.constant 0.000000e+00 : f32
    %348 = vector.broadcast %cst_119 : f32 to vector<8x512xf32>
    %349 = arith.cmpf oge, %347, %348 : vector<8x512xf32>
    %cst_120 = arith.constant 2.500000e-01 : f32
    %350 = vector.broadcast %cst_120 : f32 to vector<8x512xf32>
    %351 = arith.mulf %347, %350 : vector<8x512xf32>
    %352 = arith.select %349, %347, %351 : vector<8x512xi1>, vector<8x512xf32>
    %c17_i32_121 = arith.constant 17 : i32
    %353 = tpu.dynamic_rotate %352 by %c17_i32_121 dim 1 : vector<8x512xf32>, i32 -> vector<8x512xf32>
    %cst_122 = arith.constant 0.000000e+00 : f32
    %354 = vector.shape_cast %23 : vector<1x512xi1> to vector<1x512xi1>
    %355 = vector.broadcast %354 : vector<1x512xi1> to vector<8x512xi1>
    %356 = vector.broadcast %cst_122 : f32 to vector<8x512xf32>
    %357 = arith.select %355, %353, %356 : vector<8x512xi1>, vector<8x512xf32>
    %c16_i32_123 = arith.constant 16 : i32
    %358 = tpu.dynamic_rotate %352 by %c16_i32_123 dim 1 : vector<8x512xf32>, i32 -> vector<8x512xf32>
    %cst_124 = arith.constant 0.000000e+00 : f32
    %359 = vector.shape_cast %38 : vector<1x512xi1> to vector<1x512xi1>
    %360 = vector.broadcast %359 : vector<1x512xi1> to vector<8x512xi1>
    %361 = vector.broadcast %cst_124 : f32 to vector<8x512xf32>
    %362 = arith.select %360, %358, %361 : vector<8x512xi1>, vector<8x512xf32>
    %c15_i32_125 = arith.constant 15 : i32
    %363 = tpu.dynamic_rotate %352 by %c15_i32_125 dim 1 : vector<8x512xf32>, i32 -> vector<8x512xf32>
    %cst_126 = arith.constant 0.000000e+00 : f32
    %364 = vector.shape_cast %53 : vector<1x512xi1> to vector<1x512xi1>
    %365 = vector.broadcast %364 : vector<1x512xi1> to vector<8x512xi1>
    %366 = vector.broadcast %cst_126 : f32 to vector<8x512xf32>
    %367 = arith.select %365, %363, %366 : vector<8x512xi1>, vector<8x512xf32>
    %c1_i32_127 = arith.constant 1 : i32
    %368 = tpu.dynamic_rotate %352 by %c1_i32_127 dim 1 : vector<8x512xf32>, i32 -> vector<8x512xf32>
    %cst_128 = arith.constant 0.000000e+00 : f32
    %369 = vector.shape_cast %68 : vector<1x512xi1> to vector<1x512xi1>
    %370 = vector.broadcast %369 : vector<1x512xi1> to vector<8x512xi1>
    %371 = vector.broadcast %cst_128 : f32 to vector<8x512xf32>
    %372 = arith.select %370, %368, %371 : vector<8x512xi1>, vector<8x512xf32>
    %c511_i32_129 = arith.constant 511 : i32
    %373 = tpu.dynamic_rotate %352 by %c511_i32_129 dim 1 : vector<8x512xf32>, i32 -> vector<8x512xf32>
    %cst_130 = arith.constant 0.000000e+00 : f32
    %374 = vector.shape_cast %83 : vector<1x512xi1> to vector<1x512xi1>
    %375 = vector.broadcast %374 : vector<1x512xi1> to vector<8x512xi1>
    %376 = vector.broadcast %cst_130 : f32 to vector<8x512xf32>
    %377 = arith.select %375, %373, %376 : vector<8x512xi1>, vector<8x512xf32>
    %c497_i32_131 = arith.constant 497 : i32
    %378 = tpu.dynamic_rotate %352 by %c497_i32_131 dim 1 : vector<8x512xf32>, i32 -> vector<8x512xf32>
    %cst_132 = arith.constant 0.000000e+00 : f32
    %379 = vector.shape_cast %98 : vector<1x512xi1> to vector<1x512xi1>
    %380 = vector.broadcast %379 : vector<1x512xi1> to vector<8x512xi1>
    %381 = vector.broadcast %cst_132 : f32 to vector<8x512xf32>
    %382 = arith.select %380, %378, %381 : vector<8x512xi1>, vector<8x512xf32>
    %c496_i32_133 = arith.constant 496 : i32
    %383 = tpu.dynamic_rotate %352 by %c496_i32_133 dim 1 : vector<8x512xf32>, i32 -> vector<8x512xf32>
    %cst_134 = arith.constant 0.000000e+00 : f32
    %384 = vector.shape_cast %113 : vector<1x512xi1> to vector<1x512xi1>
    %385 = vector.broadcast %384 : vector<1x512xi1> to vector<8x512xi1>
    %386 = vector.broadcast %cst_134 : f32 to vector<8x512xf32>
    %387 = arith.select %385, %383, %386 : vector<8x512xi1>, vector<8x512xf32>
    %c495_i32_135 = arith.constant 495 : i32
    %388 = tpu.dynamic_rotate %352 by %c495_i32_135 dim 1 : vector<8x512xf32>, i32 -> vector<8x512xf32>
    %cst_136 = arith.constant 0.000000e+00 : f32
    %389 = vector.shape_cast %128 : vector<1x512xi1> to vector<1x512xi1>
    %390 = vector.broadcast %389 : vector<1x512xi1> to vector<8x512xi1>
    %391 = vector.broadcast %cst_136 : f32 to vector<8x512xf32>
    %392 = arith.select %390, %388, %391 : vector<8x512xi1>, vector<8x512xf32>
    %393 = tpu.concatenate %357, %362, %367, %372, %352, %377, %382, %387, %392 in 0 : vector<8x512xf32>, vector<8x512xf32>, vector<8x512xf32>, vector<8x512xf32>, vector<8x512xf32>, vector<8x512xf32>, vector<8x512xf32>, vector<8x512xf32>, vector<8x512xf32> -> vector<72x512xf32>
    %394 = arith.truncf %393 : vector<72x512xf32> to vector<72x512xbf16>
    %c8 = arith.constant 8 : index
    %c0_137 = arith.constant 0 : index
    %395 = vector.load %arg2[%c8, %c0_137] : memref<88x144xbf16, #tpu.memory_space<vmem>>, vector<16x72xbf16>
    %cst_138 = arith.constant dense<0.000000e+00> : vector<16x512xf32>
    %396 = tpu.matmul %395, %394, %cst_138 {dimension_numbers = #tpu.dot_dimension_numbers<[1], [0], [0], [1], [0, 0, 1, 1], [], []>} : vector<16x72xbf16>, vector<72x512xbf16>, vector<16x512xf32> -> vector<16x512xf32>
    %c8_139 = arith.constant 8 : index
    %c0_140 = arith.constant 0 : index
    %397 = vector.load %arg3[%c8_139, %c0_140] : memref<88x1xf32, #tpu.memory_space<vmem>>, vector<16x1xf32>
    %398 = vector.broadcast %397 : vector<16x1xf32> to vector<16x512xf32>
    %399 = arith.addf %396, %398 : vector<16x512xf32>
    %400 = vector.broadcast %259 : vector<1x512xf32> to vector<16x512xf32>
    %401 = arith.mulf %399, %400 : vector<16x512xf32>
    %402 = vector.extract_strided_slice %401 {offsets = [0, 0], sizes = [16, 256], strides = [1, 1]} : vector<16x512xf32> to vector<16x256xf32>
    %403 = arith.mulf %402, %402 : vector<16x256xf32>
    %404 = tpu.concatenate %402, %403 in 0 : vector<16x256xf32>, vector<16x256xf32> -> vector<32x256xf32>
    %cst_141 = arith.constant dense<0.000000e+00> : vector<32xf32>
    %405 = vector.multi_reduction <add>, %404, %cst_141 [1] : vector<32x256xf32> to vector<32xf32>
    %406 = vector.shape_cast %405 : vector<32xf32> to vector<32x1xf32>
    %407 = vector.extract_strided_slice %406 {offsets = [0, 0], sizes = [16, 1], strides = [1, 1]} : vector<32x1xf32> to vector<16x1xf32>
    %cst_142 = arith.constant 1.562500e-02 : f32
    %408 = vector.broadcast %cst_142 : f32 to vector<16x1xf32>
    %409 = arith.mulf %407, %408 : vector<16x1xf32>
    %410 = vector.extract_strided_slice %406 {offsets = [16, 0], sizes = [16, 1], strides = [1, 1]} : vector<32x1xf32> to vector<16x1xf32>
    %cst_143 = arith.constant 1.562500e-02 : f32
    %411 = vector.broadcast %cst_143 : f32 to vector<16x1xf32>
    %412 = arith.mulf %410, %411 : vector<16x1xf32>
    %413 = arith.mulf %409, %409 : vector<16x1xf32>
    %414 = arith.subf %412, %413 : vector<16x1xf32>
    %415 = vector.broadcast %409 : vector<16x1xf32> to vector<16x256xf32>
    %416 = arith.subf %402, %415 : vector<16x256xf32>
    %cst_144 = arith.constant 9.99999974E-6 : f32
    %417 = vector.broadcast %cst_144 : f32 to vector<16x1xf32>
    %418 = arith.addf %414, %417 : vector<16x1xf32>
    %419 = math.rsqrt %418 : vector<16x1xf32>
    %420 = vector.broadcast %419 : vector<16x1xf32> to vector<16x256xf32>
    %421 = arith.mulf %416, %420 : vector<16x256xf32>
    %422 = vector.extract_strided_slice %401 {offsets = [0, 256], sizes = [16, 256], strides = [1, 1]} : vector<16x512xf32> to vector<16x256xf32>
    %423 = arith.mulf %422, %422 : vector<16x256xf32>
    %424 = tpu.concatenate %422, %423 in 0 : vector<16x256xf32>, vector<16x256xf32> -> vector<32x256xf32>
    %cst_145 = arith.constant dense<0.000000e+00> : vector<32xf32>
    %425 = vector.multi_reduction <add>, %424, %cst_145 [1] : vector<32x256xf32> to vector<32xf32>
    %426 = vector.shape_cast %425 : vector<32xf32> to vector<32x1xf32>
    %427 = vector.extract_strided_slice %426 {offsets = [0, 0], sizes = [16, 1], strides = [1, 1]} : vector<32x1xf32> to vector<16x1xf32>
    %cst_146 = arith.constant 1.562500e-02 : f32
    %428 = vector.broadcast %cst_146 : f32 to vector<16x1xf32>
    %429 = arith.mulf %427, %428 : vector<16x1xf32>
    %430 = vector.extract_strided_slice %426 {offsets = [16, 0], sizes = [16, 1], strides = [1, 1]} : vector<32x1xf32> to vector<16x1xf32>
    %cst_147 = arith.constant 1.562500e-02 : f32
    %431 = vector.broadcast %cst_147 : f32 to vector<16x1xf32>
    %432 = arith.mulf %430, %431 : vector<16x1xf32>
    %433 = arith.mulf %429, %429 : vector<16x1xf32>
    %434 = arith.subf %432, %433 : vector<16x1xf32>
    %435 = vector.broadcast %429 : vector<16x1xf32> to vector<16x256xf32>
    %436 = arith.subf %422, %435 : vector<16x256xf32>
    %cst_148 = arith.constant 9.99999974E-6 : f32
    %437 = vector.broadcast %cst_148 : f32 to vector<16x1xf32>
    %438 = arith.addf %434, %437 : vector<16x1xf32>
    %439 = math.rsqrt %438 : vector<16x1xf32>
    %440 = vector.broadcast %439 : vector<16x1xf32> to vector<16x256xf32>
    %441 = arith.mulf %436, %440 : vector<16x256xf32>
    %442 = tpu.concatenate %421, %441 in 1 : vector<16x256xf32>, vector<16x256xf32> -> vector<16x512xf32>
    %443 = vector.broadcast %259 : vector<1x512xf32> to vector<16x512xf32>
    %444 = arith.mulf %442, %443 : vector<16x512xf32>
    %cst_149 = arith.constant 0.000000e+00 : f32
    %445 = vector.broadcast %cst_149 : f32 to vector<16x512xf32>
    %446 = arith.cmpf oge, %444, %445 : vector<16x512xf32>
    %cst_150 = arith.constant 2.500000e-01 : f32
    %447 = vector.broadcast %cst_150 : f32 to vector<16x512xf32>
    %448 = arith.mulf %444, %447 : vector<16x512xf32>
    %449 = arith.select %446, %444, %448 : vector<16x512xi1>, vector<16x512xf32>
    %c34_i32 = arith.constant 34 : i32
    %450 = tpu.dynamic_rotate %449 by %c34_i32 dim 1 : vector<16x512xf32>, i32 -> vector<16x512xf32>
    %cst_151 = arith.constant 0.000000e+00 : f32
    %451 = vector.shape_cast %143 : vector<1x512xi1> to vector<1x512xi1>
    %452 = vector.broadcast %451 : vector<1x512xi1> to vector<16x512xi1>
    %453 = vector.broadcast %cst_151 : f32 to vector<16x512xf32>
    %454 = arith.select %452, %450, %453 : vector<16x512xi1>, vector<16x512xf32>
    %c32_i32 = arith.constant 32 : i32
    %455 = tpu.dynamic_rotate %449 by %c32_i32 dim 1 : vector<16x512xf32>, i32 -> vector<16x512xf32>
    %cst_152 = arith.constant 0.000000e+00 : f32
    %456 = vector.shape_cast %158 : vector<1x512xi1> to vector<1x512xi1>
    %457 = vector.broadcast %456 : vector<1x512xi1> to vector<16x512xi1>
    %458 = vector.broadcast %cst_152 : f32 to vector<16x512xf32>
    %459 = arith.select %457, %455, %458 : vector<16x512xi1>, vector<16x512xf32>
    %c30_i32 = arith.constant 30 : i32
    %460 = tpu.dynamic_rotate %449 by %c30_i32 dim 1 : vector<16x512xf32>, i32 -> vector<16x512xf32>
    %cst_153 = arith.constant 0.000000e+00 : f32
    %461 = vector.shape_cast %173 : vector<1x512xi1> to vector<1x512xi1>
    %462 = vector.broadcast %461 : vector<1x512xi1> to vector<16x512xi1>
    %463 = vector.broadcast %cst_153 : f32 to vector<16x512xf32>
    %464 = arith.select %462, %460, %463 : vector<16x512xi1>, vector<16x512xf32>
    %c2_i32_154 = arith.constant 2 : i32
    %465 = tpu.dynamic_rotate %449 by %c2_i32_154 dim 1 : vector<16x512xf32>, i32 -> vector<16x512xf32>
    %cst_155 = arith.constant 0.000000e+00 : f32
    %466 = vector.shape_cast %188 : vector<1x512xi1> to vector<1x512xi1>
    %467 = vector.broadcast %466 : vector<1x512xi1> to vector<16x512xi1>
    %468 = vector.broadcast %cst_155 : f32 to vector<16x512xf32>
    %469 = arith.select %467, %465, %468 : vector<16x512xi1>, vector<16x512xf32>
    %c510_i32 = arith.constant 510 : i32
    %470 = tpu.dynamic_rotate %449 by %c510_i32 dim 1 : vector<16x512xf32>, i32 -> vector<16x512xf32>
    %cst_156 = arith.constant 0.000000e+00 : f32
    %471 = vector.shape_cast %203 : vector<1x512xi1> to vector<1x512xi1>
    %472 = vector.broadcast %471 : vector<1x512xi1> to vector<16x512xi1>
    %473 = vector.broadcast %cst_156 : f32 to vector<16x512xf32>
    %474 = arith.select %472, %470, %473 : vector<16x512xi1>, vector<16x512xf32>
    %c482_i32 = arith.constant 482 : i32
    %475 = tpu.dynamic_rotate %449 by %c482_i32 dim 1 : vector<16x512xf32>, i32 -> vector<16x512xf32>
    %cst_157 = arith.constant 0.000000e+00 : f32
    %476 = vector.shape_cast %218 : vector<1x512xi1> to vector<1x512xi1>
    %477 = vector.broadcast %476 : vector<1x512xi1> to vector<16x512xi1>
    %478 = vector.broadcast %cst_157 : f32 to vector<16x512xf32>
    %479 = arith.select %477, %475, %478 : vector<16x512xi1>, vector<16x512xf32>
    %c480_i32 = arith.constant 480 : i32
    %480 = tpu.dynamic_rotate %449 by %c480_i32 dim 1 : vector<16x512xf32>, i32 -> vector<16x512xf32>
    %cst_158 = arith.constant 0.000000e+00 : f32
    %481 = vector.shape_cast %233 : vector<1x512xi1> to vector<1x512xi1>
    %482 = vector.broadcast %481 : vector<1x512xi1> to vector<16x512xi1>
    %483 = vector.broadcast %cst_158 : f32 to vector<16x512xf32>
    %484 = arith.select %482, %480, %483 : vector<16x512xi1>, vector<16x512xf32>
    %c478_i32 = arith.constant 478 : i32
    %485 = tpu.dynamic_rotate %449 by %c478_i32 dim 1 : vector<16x512xf32>, i32 -> vector<16x512xf32>
    %cst_159 = arith.constant 0.000000e+00 : f32
    %486 = vector.shape_cast %248 : vector<1x512xi1> to vector<1x512xi1>
    %487 = vector.broadcast %486 : vector<1x512xi1> to vector<16x512xi1>
    %488 = vector.broadcast %cst_159 : f32 to vector<16x512xf32>
    %489 = arith.select %487, %485, %488 : vector<16x512xi1>, vector<16x512xf32>
    %490 = tpu.concatenate %454, %459, %464, %469, %449, %474, %479, %484, %489 in 0 : vector<16x512xf32>, vector<16x512xf32>, vector<16x512xf32>, vector<16x512xf32>, vector<16x512xf32>, vector<16x512xf32>, vector<16x512xf32>, vector<16x512xf32>, vector<16x512xf32> -> vector<144x512xf32>
    %491 = arith.truncf %490 : vector<144x512xf32> to vector<144x512xbf16>
    %c24 = arith.constant 24 : index
    %c0_160 = arith.constant 0 : index
    %492 = vector.load %arg2[%c24, %c0_160] : memref<88x144xbf16, #tpu.memory_space<vmem>>, vector<16x144xbf16>
    %cst_161 = arith.constant dense<0.000000e+00> : vector<16x512xf32>
    %493 = tpu.matmul %492, %491, %cst_161 {dimension_numbers = #tpu.dot_dimension_numbers<[1], [0], [0], [1], [0, 0, 1, 1], [], []>} : vector<16x144xbf16>, vector<144x512xbf16>, vector<16x512xf32> -> vector<16x512xf32>
    %c24_162 = arith.constant 24 : index
    %c0_163 = arith.constant 0 : index
    %494 = vector.load %arg3[%c24_162, %c0_163] : memref<88x1xf32, #tpu.memory_space<vmem>>, vector<16x1xf32>
    %495 = vector.broadcast %494 : vector<16x1xf32> to vector<16x512xf32>
    %496 = arith.addf %493, %495 : vector<16x512xf32>
    %497 = vector.broadcast %259 : vector<1x512xf32> to vector<16x512xf32>
    %498 = arith.mulf %496, %497 : vector<16x512xf32>
    %499 = vector.extract_strided_slice %498 {offsets = [0, 0], sizes = [16, 256], strides = [1, 1]} : vector<16x512xf32> to vector<16x256xf32>
    %500 = arith.mulf %499, %499 : vector<16x256xf32>
    %501 = tpu.concatenate %499, %500 in 0 : vector<16x256xf32>, vector<16x256xf32> -> vector<32x256xf32>
    %cst_164 = arith.constant dense<0.000000e+00> : vector<32xf32>
    %502 = vector.multi_reduction <add>, %501, %cst_164 [1] : vector<32x256xf32> to vector<32xf32>
    %503 = vector.shape_cast %502 : vector<32xf32> to vector<32x1xf32>
    %504 = vector.extract_strided_slice %503 {offsets = [0, 0], sizes = [16, 1], strides = [1, 1]} : vector<32x1xf32> to vector<16x1xf32>
    %cst_165 = arith.constant 1.562500e-02 : f32
    %505 = vector.broadcast %cst_165 : f32 to vector<16x1xf32>
    %506 = arith.mulf %504, %505 : vector<16x1xf32>
    %507 = vector.extract_strided_slice %503 {offsets = [16, 0], sizes = [16, 1], strides = [1, 1]} : vector<32x1xf32> to vector<16x1xf32>
    %cst_166 = arith.constant 1.562500e-02 : f32
    %508 = vector.broadcast %cst_166 : f32 to vector<16x1xf32>
    %509 = arith.mulf %507, %508 : vector<16x1xf32>
    %510 = arith.mulf %506, %506 : vector<16x1xf32>
    %511 = arith.subf %509, %510 : vector<16x1xf32>
    %512 = vector.broadcast %506 : vector<16x1xf32> to vector<16x256xf32>
    %513 = arith.subf %499, %512 : vector<16x256xf32>
    %cst_167 = arith.constant 9.99999974E-6 : f32
    %514 = vector.broadcast %cst_167 : f32 to vector<16x1xf32>
    %515 = arith.addf %511, %514 : vector<16x1xf32>
    %516 = math.rsqrt %515 : vector<16x1xf32>
    %517 = vector.broadcast %516 : vector<16x1xf32> to vector<16x256xf32>
    %518 = arith.mulf %513, %517 : vector<16x256xf32>
    %519 = vector.extract_strided_slice %498 {offsets = [0, 256], sizes = [16, 256], strides = [1, 1]} : vector<16x512xf32> to vector<16x256xf32>
    %520 = arith.mulf %519, %519 : vector<16x256xf32>
    %521 = tpu.concatenate %519, %520 in 0 : vector<16x256xf32>, vector<16x256xf32> -> vector<32x256xf32>
    %cst_168 = arith.constant dense<0.000000e+00> : vector<32xf32>
    %522 = vector.multi_reduction <add>, %521, %cst_168 [1] : vector<32x256xf32> to vector<32xf32>
    %523 = vector.shape_cast %522 : vector<32xf32> to vector<32x1xf32>
    %524 = vector.extract_strided_slice %523 {offsets = [0, 0], sizes = [16, 1], strides = [1, 1]} : vector<32x1xf32> to vector<16x1xf32>
    %cst_169 = arith.constant 1.562500e-02 : f32
    %525 = vector.broadcast %cst_169 : f32 to vector<16x1xf32>
    %526 = arith.mulf %524, %525 : vector<16x1xf32>
    %527 = vector.extract_strided_slice %523 {offsets = [16, 0], sizes = [16, 1], strides = [1, 1]} : vector<32x1xf32> to vector<16x1xf32>
    %cst_170 = arith.constant 1.562500e-02 : f32
    %528 = vector.broadcast %cst_170 : f32 to vector<16x1xf32>
    %529 = arith.mulf %527, %528 : vector<16x1xf32>
    %530 = arith.mulf %526, %526 : vector<16x1xf32>
    %531 = arith.subf %529, %530 : vector<16x1xf32>
    %532 = vector.broadcast %526 : vector<16x1xf32> to vector<16x256xf32>
    %533 = arith.subf %519, %532 : vector<16x256xf32>
    %cst_171 = arith.constant 9.99999974E-6 : f32
    %534 = vector.broadcast %cst_171 : f32 to vector<16x1xf32>
    %535 = arith.addf %531, %534 : vector<16x1xf32>
    %536 = math.rsqrt %535 : vector<16x1xf32>
    %537 = vector.broadcast %536 : vector<16x1xf32> to vector<16x256xf32>
    %538 = arith.mulf %533, %537 : vector<16x256xf32>
    %539 = tpu.concatenate %518, %538 in 1 : vector<16x256xf32>, vector<16x256xf32> -> vector<16x512xf32>
    %540 = vector.broadcast %259 : vector<1x512xf32> to vector<16x512xf32>
    %541 = arith.mulf %539, %540 : vector<16x512xf32>
    %cst_172 = arith.constant 0.000000e+00 : f32
    %542 = vector.broadcast %cst_172 : f32 to vector<16x512xf32>
    %543 = arith.cmpf oge, %541, %542 : vector<16x512xf32>
    %cst_173 = arith.constant 2.500000e-01 : f32
    %544 = vector.broadcast %cst_173 : f32 to vector<16x512xf32>
    %545 = arith.mulf %541, %544 : vector<16x512xf32>
    %546 = arith.select %543, %541, %545 : vector<16x512xi1>, vector<16x512xf32>
    %c17_i32_174 = arith.constant 17 : i32
    %547 = tpu.dynamic_rotate %546 by %c17_i32_174 dim 1 : vector<16x512xf32>, i32 -> vector<16x512xf32>
    %cst_175 = arith.constant 0.000000e+00 : f32
    %548 = vector.shape_cast %23 : vector<1x512xi1> to vector<1x512xi1>
    %549 = vector.broadcast %548 : vector<1x512xi1> to vector<16x512xi1>
    %550 = vector.broadcast %cst_175 : f32 to vector<16x512xf32>
    %551 = arith.select %549, %547, %550 : vector<16x512xi1>, vector<16x512xf32>
    %c16_i32_176 = arith.constant 16 : i32
    %552 = tpu.dynamic_rotate %546 by %c16_i32_176 dim 1 : vector<16x512xf32>, i32 -> vector<16x512xf32>
    %cst_177 = arith.constant 0.000000e+00 : f32
    %553 = vector.shape_cast %38 : vector<1x512xi1> to vector<1x512xi1>
    %554 = vector.broadcast %553 : vector<1x512xi1> to vector<16x512xi1>
    %555 = vector.broadcast %cst_177 : f32 to vector<16x512xf32>
    %556 = arith.select %554, %552, %555 : vector<16x512xi1>, vector<16x512xf32>
    %c15_i32_178 = arith.constant 15 : i32
    %557 = tpu.dynamic_rotate %546 by %c15_i32_178 dim 1 : vector<16x512xf32>, i32 -> vector<16x512xf32>
    %cst_179 = arith.constant 0.000000e+00 : f32
    %558 = vector.shape_cast %53 : vector<1x512xi1> to vector<1x512xi1>
    %559 = vector.broadcast %558 : vector<1x512xi1> to vector<16x512xi1>
    %560 = vector.broadcast %cst_179 : f32 to vector<16x512xf32>
    %561 = arith.select %559, %557, %560 : vector<16x512xi1>, vector<16x512xf32>
    %c1_i32_180 = arith.constant 1 : i32
    %562 = tpu.dynamic_rotate %546 by %c1_i32_180 dim 1 : vector<16x512xf32>, i32 -> vector<16x512xf32>
    %cst_181 = arith.constant 0.000000e+00 : f32
    %563 = vector.shape_cast %68 : vector<1x512xi1> to vector<1x512xi1>
    %564 = vector.broadcast %563 : vector<1x512xi1> to vector<16x512xi1>
    %565 = vector.broadcast %cst_181 : f32 to vector<16x512xf32>
    %566 = arith.select %564, %562, %565 : vector<16x512xi1>, vector<16x512xf32>
    %c511_i32_182 = arith.constant 511 : i32
    %567 = tpu.dynamic_rotate %546 by %c511_i32_182 dim 1 : vector<16x512xf32>, i32 -> vector<16x512xf32>
    %cst_183 = arith.constant 0.000000e+00 : f32
    %568 = vector.shape_cast %83 : vector<1x512xi1> to vector<1x512xi1>
    %569 = vector.broadcast %568 : vector<1x512xi1> to vector<16x512xi1>
    %570 = vector.broadcast %cst_183 : f32 to vector<16x512xf32>
    %571 = arith.select %569, %567, %570 : vector<16x512xi1>, vector<16x512xf32>
    %c497_i32_184 = arith.constant 497 : i32
    %572 = tpu.dynamic_rotate %546 by %c497_i32_184 dim 1 : vector<16x512xf32>, i32 -> vector<16x512xf32>
    %cst_185 = arith.constant 0.000000e+00 : f32
    %573 = vector.shape_cast %98 : vector<1x512xi1> to vector<1x512xi1>
    %574 = vector.broadcast %573 : vector<1x512xi1> to vector<16x512xi1>
    %575 = vector.broadcast %cst_185 : f32 to vector<16x512xf32>
    %576 = arith.select %574, %572, %575 : vector<16x512xi1>, vector<16x512xf32>
    %c496_i32_186 = arith.constant 496 : i32
    %577 = tpu.dynamic_rotate %546 by %c496_i32_186 dim 1 : vector<16x512xf32>, i32 -> vector<16x512xf32>
    %cst_187 = arith.constant 0.000000e+00 : f32
    %578 = vector.shape_cast %113 : vector<1x512xi1> to vector<1x512xi1>
    %579 = vector.broadcast %578 : vector<1x512xi1> to vector<16x512xi1>
    %580 = vector.broadcast %cst_187 : f32 to vector<16x512xf32>
    %581 = arith.select %579, %577, %580 : vector<16x512xi1>, vector<16x512xf32>
    %c495_i32_188 = arith.constant 495 : i32
    %582 = tpu.dynamic_rotate %546 by %c495_i32_188 dim 1 : vector<16x512xf32>, i32 -> vector<16x512xf32>
    %cst_189 = arith.constant 0.000000e+00 : f32
    %583 = vector.shape_cast %128 : vector<1x512xi1> to vector<1x512xi1>
    %584 = vector.broadcast %583 : vector<1x512xi1> to vector<16x512xi1>
    %585 = vector.broadcast %cst_189 : f32 to vector<16x512xf32>
    %586 = arith.select %584, %582, %585 : vector<16x512xi1>, vector<16x512xf32>
    %587 = tpu.concatenate %551, %556, %561, %566, %546, %571, %576, %581, %586 in 0 : vector<16x512xf32>, vector<16x512xf32>, vector<16x512xf32>, vector<16x512xf32>, vector<16x512xf32>, vector<16x512xf32>, vector<16x512xf32>, vector<16x512xf32>, vector<16x512xf32> -> vector<144x512xf32>
    %588 = arith.truncf %587 : vector<144x512xf32> to vector<144x512xbf16>
    %c40 = arith.constant 40 : index
    %c0_190 = arith.constant 0 : index
    %589 = vector.load %arg2[%c40, %c0_190] : memref<88x144xbf16, #tpu.memory_space<vmem>>, vector<8x144xbf16>
    %cst_191 = arith.constant dense<0.000000e+00> : vector<8x512xf32>
    %590 = tpu.matmul %589, %588, %cst_191 {dimension_numbers = #tpu.dot_dimension_numbers<[1], [0], [0], [1], [0, 0, 1, 1], [], []>} : vector<8x144xbf16>, vector<144x512xbf16>, vector<8x512xf32> -> vector<8x512xf32>
    %c40_192 = arith.constant 40 : index
    %c0_193 = arith.constant 0 : index
    %591 = vector.load %arg3[%c40_192, %c0_193] : memref<88x1xf32, #tpu.memory_space<vmem>>, vector<8x1xf32>
    %592 = vector.broadcast %591 : vector<8x1xf32> to vector<8x512xf32>
    %593 = arith.addf %590, %592 : vector<8x512xf32>
    %594 = vector.extract_strided_slice %593 {offsets = [0, 0], sizes = [8, 256], strides = [1, 1]} : vector<8x512xf32> to vector<8x256xf32>
    %595 = arith.mulf %594, %594 : vector<8x256xf32>
    %596 = tpu.concatenate %594, %595 in 0 : vector<8x256xf32>, vector<8x256xf32> -> vector<16x256xf32>
    %cst_194 = arith.constant dense<0.000000e+00> : vector<16xf32>
    %597 = vector.multi_reduction <add>, %596, %cst_194 [1] : vector<16x256xf32> to vector<16xf32>
    %598 = vector.shape_cast %597 : vector<16xf32> to vector<16x1xf32>
    %599 = vector.extract_strided_slice %598 {offsets = [0, 0], sizes = [8, 1], strides = [1, 1]} : vector<16x1xf32> to vector<8x1xf32>
    %cst_195 = arith.constant 3.906250e-03 : f32
    %600 = vector.broadcast %cst_195 : f32 to vector<8x1xf32>
    %601 = arith.mulf %599, %600 : vector<8x1xf32>
    %602 = vector.extract_strided_slice %598 {offsets = [8, 0], sizes = [8, 1], strides = [1, 1]} : vector<16x1xf32> to vector<8x1xf32>
    %cst_196 = arith.constant 3.906250e-03 : f32
    %603 = vector.broadcast %cst_196 : f32 to vector<8x1xf32>
    %604 = arith.mulf %602, %603 : vector<8x1xf32>
    %605 = arith.mulf %601, %601 : vector<8x1xf32>
    %606 = arith.subf %604, %605 : vector<8x1xf32>
    %607 = vector.broadcast %601 : vector<8x1xf32> to vector<8x256xf32>
    %608 = arith.subf %594, %607 : vector<8x256xf32>
    %cst_197 = arith.constant 9.99999974E-6 : f32
    %609 = vector.broadcast %cst_197 : f32 to vector<8x1xf32>
    %610 = arith.addf %606, %609 : vector<8x1xf32>
    %611 = math.rsqrt %610 : vector<8x1xf32>
    %612 = vector.broadcast %611 : vector<8x1xf32> to vector<8x256xf32>
    %613 = arith.mulf %608, %612 : vector<8x256xf32>
    %614 = vector.extract_strided_slice %593 {offsets = [0, 256], sizes = [8, 256], strides = [1, 1]} : vector<8x512xf32> to vector<8x256xf32>
    %615 = arith.mulf %614, %614 : vector<8x256xf32>
    %616 = tpu.concatenate %614, %615 in 0 : vector<8x256xf32>, vector<8x256xf32> -> vector<16x256xf32>
    %cst_198 = arith.constant dense<0.000000e+00> : vector<16xf32>
    %617 = vector.multi_reduction <add>, %616, %cst_198 [1] : vector<16x256xf32> to vector<16xf32>
    %618 = vector.shape_cast %617 : vector<16xf32> to vector<16x1xf32>
    %619 = vector.extract_strided_slice %618 {offsets = [0, 0], sizes = [8, 1], strides = [1, 1]} : vector<16x1xf32> to vector<8x1xf32>
    %cst_199 = arith.constant 3.906250e-03 : f32
    %620 = vector.broadcast %cst_199 : f32 to vector<8x1xf32>
    %621 = arith.mulf %619, %620 : vector<8x1xf32>
    %622 = vector.extract_strided_slice %618 {offsets = [8, 0], sizes = [8, 1], strides = [1, 1]} : vector<16x1xf32> to vector<8x1xf32>
    %cst_200 = arith.constant 3.906250e-03 : f32
    %623 = vector.broadcast %cst_200 : f32 to vector<8x1xf32>
    %624 = arith.mulf %622, %623 : vector<8x1xf32>
    %625 = arith.mulf %621, %621 : vector<8x1xf32>
    %626 = arith.subf %624, %625 : vector<8x1xf32>
    %627 = vector.broadcast %621 : vector<8x1xf32> to vector<8x256xf32>
    %628 = arith.subf %614, %627 : vector<8x256xf32>
    %cst_201 = arith.constant 9.99999974E-6 : f32
    %629 = vector.broadcast %cst_201 : f32 to vector<8x1xf32>
    %630 = arith.addf %626, %629 : vector<8x1xf32>
    %631 = math.rsqrt %630 : vector<8x1xf32>
    %632 = vector.broadcast %631 : vector<8x1xf32> to vector<8x256xf32>
    %633 = arith.mulf %628, %632 : vector<8x256xf32>
    %634 = tpu.concatenate %613, %633 in 1 : vector<8x256xf32>, vector<8x256xf32> -> vector<8x512xf32>
    %cst_202 = arith.constant 0.000000e+00 : f32
    %635 = vector.broadcast %cst_202 : f32 to vector<8x512xf32>
    %636 = arith.cmpf oge, %634, %635 : vector<8x512xf32>
    %cst_203 = arith.constant 2.500000e-01 : f32
    %637 = vector.broadcast %cst_203 : f32 to vector<8x512xf32>
    %638 = arith.mulf %634, %637 : vector<8x512xf32>
    %639 = arith.select %636, %634, %638 : vector<8x512xi1>, vector<8x512xf32>
    %640 = tpu.concatenate %639, %352 in 0 : vector<8x512xf32>, vector<8x512xf32> -> vector<16x512xf32>
    %641 = arith.truncf %640 : vector<16x512xf32> to vector<16x512xbf16>
    %c64 = arith.constant 64 : index
    %c0_204 = arith.constant 0 : index
    %642 = vector.load %arg2[%c64, %c0_204] : memref<88x144xbf16, #tpu.memory_space<vmem>>, vector<16x16xbf16>
    %cst_205 = arith.constant dense<0.000000e+00> : vector<16x512xf32>
    %643 = tpu.matmul %642, %641, %cst_205 {dimension_numbers = #tpu.dot_dimension_numbers<[1], [0], [0], [1], [0, 0, 1, 1], [], []>} : vector<16x16xbf16>, vector<16x512xbf16>, vector<16x512xf32> -> vector<16x512xf32>
    %c64_206 = arith.constant 64 : index
    %c0_207 = arith.constant 0 : index
    %644 = vector.load %arg3[%c64_206, %c0_207] : memref<88x1xf32, #tpu.memory_space<vmem>>, vector<16x1xf32>
    %645 = vector.broadcast %644 : vector<16x1xf32> to vector<16x512xf32>
    %646 = arith.addf %643, %645 : vector<16x512xf32>
    %647 = vector.extract_strided_slice %646 {offsets = [0, 0], sizes = [16, 256], strides = [1, 1]} : vector<16x512xf32> to vector<16x256xf32>
    %648 = arith.mulf %647, %647 : vector<16x256xf32>
    %649 = tpu.concatenate %647, %648 in 0 : vector<16x256xf32>, vector<16x256xf32> -> vector<32x256xf32>
    %cst_208 = arith.constant dense<0.000000e+00> : vector<32xf32>
    %650 = vector.multi_reduction <add>, %649, %cst_208 [1] : vector<32x256xf32> to vector<32xf32>
    %651 = vector.shape_cast %650 : vector<32xf32> to vector<32x1xf32>
    %652 = vector.extract_strided_slice %651 {offsets = [0, 0], sizes = [16, 1], strides = [1, 1]} : vector<32x1xf32> to vector<16x1xf32>
    %cst_209 = arith.constant 3.906250e-03 : f32
    %653 = vector.broadcast %cst_209 : f32 to vector<16x1xf32>
    %654 = arith.mulf %652, %653 : vector<16x1xf32>
    %655 = vector.extract_strided_slice %651 {offsets = [16, 0], sizes = [16, 1], strides = [1, 1]} : vector<32x1xf32> to vector<16x1xf32>
    %cst_210 = arith.constant 3.906250e-03 : f32
    %656 = vector.broadcast %cst_210 : f32 to vector<16x1xf32>
    %657 = arith.mulf %655, %656 : vector<16x1xf32>
    %658 = arith.mulf %654, %654 : vector<16x1xf32>
    %659 = arith.subf %657, %658 : vector<16x1xf32>
    %660 = vector.broadcast %654 : vector<16x1xf32> to vector<16x256xf32>
    %661 = arith.subf %647, %660 : vector<16x256xf32>
    %cst_211 = arith.constant 9.99999974E-6 : f32
    %662 = vector.broadcast %cst_211 : f32 to vector<16x1xf32>
    %663 = arith.addf %659, %662 : vector<16x1xf32>
    %664 = math.rsqrt %663 : vector<16x1xf32>
    %665 = vector.broadcast %664 : vector<16x1xf32> to vector<16x256xf32>
    %666 = arith.mulf %661, %665 : vector<16x256xf32>
    %667 = vector.extract_strided_slice %646 {offsets = [0, 256], sizes = [16, 256], strides = [1, 1]} : vector<16x512xf32> to vector<16x256xf32>
    %668 = arith.mulf %667, %667 : vector<16x256xf32>
    %669 = tpu.concatenate %667, %668 in 0 : vector<16x256xf32>, vector<16x256xf32> -> vector<32x256xf32>
    %cst_212 = arith.constant dense<0.000000e+00> : vector<32xf32>
    %670 = vector.multi_reduction <add>, %669, %cst_212 [1] : vector<32x256xf32> to vector<32xf32>
    %671 = vector.shape_cast %670 : vector<32xf32> to vector<32x1xf32>
    %672 = vector.extract_strided_slice %671 {offsets = [0, 0], sizes = [16, 1], strides = [1, 1]} : vector<32x1xf32> to vector<16x1xf32>
    %cst_213 = arith.constant 3.906250e-03 : f32
    %673 = vector.broadcast %cst_213 : f32 to vector<16x1xf32>
    %674 = arith.mulf %672, %673 : vector<16x1xf32>
    %675 = vector.extract_strided_slice %671 {offsets = [16, 0], sizes = [16, 1], strides = [1, 1]} : vector<32x1xf32> to vector<16x1xf32>
    %cst_214 = arith.constant 3.906250e-03 : f32
    %676 = vector.broadcast %cst_214 : f32 to vector<16x1xf32>
    %677 = arith.mulf %675, %676 : vector<16x1xf32>
    %678 = arith.mulf %674, %674 : vector<16x1xf32>
    %679 = arith.subf %677, %678 : vector<16x1xf32>
    %680 = vector.broadcast %674 : vector<16x1xf32> to vector<16x256xf32>
    %681 = arith.subf %667, %680 : vector<16x256xf32>
    %cst_215 = arith.constant 9.99999974E-6 : f32
    %682 = vector.broadcast %cst_215 : f32 to vector<16x1xf32>
    %683 = arith.addf %679, %682 : vector<16x1xf32>
    %684 = math.rsqrt %683 : vector<16x1xf32>
    %685 = vector.broadcast %684 : vector<16x1xf32> to vector<16x256xf32>
    %686 = arith.mulf %681, %685 : vector<16x256xf32>
    %687 = tpu.concatenate %666, %686 in 1 : vector<16x256xf32>, vector<16x256xf32> -> vector<16x512xf32>
    %688 = vector.extract_strided_slice %687 {offsets = [0, 0], sizes = [8, 512], strides = [1, 1]} : vector<16x512xf32> to vector<8x512xf32>
    %689 = vector.extract_strided_slice %687 {offsets = [8, 0], sizes = [8, 512], strides = [1, 1]} : vector<16x512xf32> to vector<8x512xf32>
    %690 = arith.addf %688, %689 : vector<8x512xf32>
    %cst_216 = arith.constant 0.000000e+00 : f32
    %691 = vector.broadcast %cst_216 : f32 to vector<8x512xf32>
    %692 = arith.maximumf %690, %691 : vector<8x512xf32>
    %c80 = arith.constant 80 : index
    %c0_217 = arith.constant 0 : index
    %693 = vector.load %arg2[%c80, %c0_217] : memref<88x144xbf16, #tpu.memory_space<vmem>>, vector<1x8xbf16>
    %694 = arith.truncf %692 : vector<8x512xf32> to vector<8x512xbf16>
    %cst_218 = arith.constant dense<0.000000e+00> : vector<1x512xf32>
    %695 = tpu.matmul %693, %694, %cst_218 {dimension_numbers = #tpu.dot_dimension_numbers<[1], [0], [0], [1], [0, 0, 1, 1], [], []>} : vector<1x8xbf16>, vector<8x512xbf16>, vector<1x512xf32> -> vector<1x512xf32>
    %c80_219 = arith.constant 80 : index
    %c0_220 = arith.constant 0 : index
    %696 = vector.load %arg3[%c80_219, %c0_220] : memref<88x1xf32, #tpu.memory_space<vmem>>, vector<1x1xf32>
    %697 = vector.broadcast %696 : vector<1x1xf32> to vector<1x512xf32>
    %698 = arith.addf %695, %697 : vector<1x512xf32>
    %699 = vector.extract_strided_slice %698 {offsets = [0, 0], sizes = [1, 256], strides = [1, 1]} : vector<1x512xf32> to vector<1x256xf32>
    %700 = arith.mulf %699, %699 : vector<1x256xf32>
    %701 = tpu.concatenate %699, %700 in 0 : vector<1x256xf32>, vector<1x256xf32> -> vector<2x256xf32>
    %cst_221 = arith.constant dense<0.000000e+00> : vector<2xf32>
    %702 = vector.multi_reduction <add>, %701, %cst_221 [1] : vector<2x256xf32> to vector<2xf32>
    %703 = vector.shape_cast %702 : vector<2xf32> to vector<2x1xf32>
    %704 = vector.extract_strided_slice %703 {offsets = [0, 0], sizes = [1, 1], strides = [1, 1]} : vector<2x1xf32> to vector<1x1xf32>
    %cst_222 = arith.constant 3.906250e-03 : f32
    %705 = vector.broadcast %cst_222 : f32 to vector<1x1xf32>
    %706 = arith.mulf %704, %705 : vector<1x1xf32>
    %707 = vector.extract_strided_slice %703 {offsets = [1, 0], sizes = [1, 1], strides = [1, 1]} : vector<2x1xf32> to vector<1x1xf32>
    %cst_223 = arith.constant 3.906250e-03 : f32
    %708 = vector.broadcast %cst_223 : f32 to vector<1x1xf32>
    %709 = arith.mulf %707, %708 : vector<1x1xf32>
    %710 = arith.mulf %706, %706 : vector<1x1xf32>
    %711 = arith.subf %709, %710 : vector<1x1xf32>
    %712 = vector.broadcast %706 : vector<1x1xf32> to vector<1x256xf32>
    %713 = arith.subf %699, %712 : vector<1x256xf32>
    %cst_224 = arith.constant 9.99999974E-6 : f32
    %714 = vector.broadcast %cst_224 : f32 to vector<1x1xf32>
    %715 = arith.addf %711, %714 : vector<1x1xf32>
    %716 = math.rsqrt %715 : vector<1x1xf32>
    %717 = vector.broadcast %716 : vector<1x1xf32> to vector<1x256xf32>
    %718 = arith.mulf %713, %717 : vector<1x256xf32>
    %719 = vector.extract_strided_slice %698 {offsets = [0, 256], sizes = [1, 256], strides = [1, 1]} : vector<1x512xf32> to vector<1x256xf32>
    %720 = arith.mulf %719, %719 : vector<1x256xf32>
    %721 = tpu.concatenate %719, %720 in 0 : vector<1x256xf32>, vector<1x256xf32> -> vector<2x256xf32>
    %cst_225 = arith.constant dense<0.000000e+00> : vector<2xf32>
    %722 = vector.multi_reduction <add>, %721, %cst_225 [1] : vector<2x256xf32> to vector<2xf32>
    %723 = vector.shape_cast %722 : vector<2xf32> to vector<2x1xf32>
    %724 = vector.extract_strided_slice %723 {offsets = [0, 0], sizes = [1, 1], strides = [1, 1]} : vector<2x1xf32> to vector<1x1xf32>
    %cst_226 = arith.constant 3.906250e-03 : f32
    %725 = vector.broadcast %cst_226 : f32 to vector<1x1xf32>
    %726 = arith.mulf %724, %725 : vector<1x1xf32>
    %727 = vector.extract_strided_slice %723 {offsets = [1, 0], sizes = [1, 1], strides = [1, 1]} : vector<2x1xf32> to vector<1x1xf32>
    %cst_227 = arith.constant 3.906250e-03 : f32
    %728 = vector.broadcast %cst_227 : f32 to vector<1x1xf32>
    %729 = arith.mulf %727, %728 : vector<1x1xf32>
    %730 = arith.mulf %726, %726 : vector<1x1xf32>
    %731 = arith.subf %729, %730 : vector<1x1xf32>
    %732 = vector.broadcast %726 : vector<1x1xf32> to vector<1x256xf32>
    %733 = arith.subf %719, %732 : vector<1x256xf32>
    %cst_228 = arith.constant 9.99999974E-6 : f32
    %734 = vector.broadcast %cst_228 : f32 to vector<1x1xf32>
    %735 = arith.addf %731, %734 : vector<1x1xf32>
    %736 = math.rsqrt %735 : vector<1x1xf32>
    %737 = vector.broadcast %736 : vector<1x1xf32> to vector<1x256xf32>
    %738 = arith.mulf %733, %737 : vector<1x256xf32>
    %739 = tpu.concatenate %718, %738 in 1 : vector<1x256xf32>, vector<1x256xf32> -> vector<1x512xf32>
    %cst_229 = arith.constant 0.000000e+00 : f32
    %740 = vector.broadcast %cst_229 : f32 to vector<1x512xf32>
    %741 = arith.subf %740, %739 : vector<1x512xf32>
    %742 = math.exp %741 : vector<1x512xf32>
    %cst_230 = arith.constant 1.000000e+00 : f32
    %743 = vector.broadcast %cst_230 : f32 to vector<1x512xf32>
    %744 = arith.addf %743, %742 : vector<1x512xf32>
    %cst_231 = arith.constant 1.000000e+00 : f32
    %745 = vector.broadcast %cst_231 : f32 to vector<1x512xf32>
    %746 = arith.divf %745, %744 : vector<1x512xf32>
    %747 = vector.broadcast %746 : vector<1x512xf32> to vector<8x512xf32>
    %748 = arith.mulf %352, %747 : vector<8x512xf32>
    %749 = tpu.concatenate %639, %748 in 0 : vector<8x512xf32>, vector<8x512xf32> -> vector<16x512xf32>
    %c17_i32_232 = arith.constant 17 : i32
    %750 = tpu.dynamic_rotate %749 by %c17_i32_232 dim 1 : vector<16x512xf32>, i32 -> vector<16x512xf32>
    %cst_233 = arith.constant 0.000000e+00 : f32
    %751 = vector.shape_cast %23 : vector<1x512xi1> to vector<1x512xi1>
    %752 = vector.broadcast %751 : vector<1x512xi1> to vector<16x512xi1>
    %753 = vector.broadcast %cst_233 : f32 to vector<16x512xf32>
    %754 = arith.select %752, %750, %753 : vector<16x512xi1>, vector<16x512xf32>
    %c16_i32_234 = arith.constant 16 : i32
    %755 = tpu.dynamic_rotate %749 by %c16_i32_234 dim 1 : vector<16x512xf32>, i32 -> vector<16x512xf32>
    %cst_235 = arith.constant 0.000000e+00 : f32
    %756 = vector.shape_cast %38 : vector<1x512xi1> to vector<1x512xi1>
    %757 = vector.broadcast %756 : vector<1x512xi1> to vector<16x512xi1>
    %758 = vector.broadcast %cst_235 : f32 to vector<16x512xf32>
    %759 = arith.select %757, %755, %758 : vector<16x512xi1>, vector<16x512xf32>
    %c15_i32_236 = arith.constant 15 : i32
    %760 = tpu.dynamic_rotate %749 by %c15_i32_236 dim 1 : vector<16x512xf32>, i32 -> vector<16x512xf32>
    %cst_237 = arith.constant 0.000000e+00 : f32
    %761 = vector.shape_cast %53 : vector<1x512xi1> to vector<1x512xi1>
    %762 = vector.broadcast %761 : vector<1x512xi1> to vector<16x512xi1>
    %763 = vector.broadcast %cst_237 : f32 to vector<16x512xf32>
    %764 = arith.select %762, %760, %763 : vector<16x512xi1>, vector<16x512xf32>
    %c1_i32_238 = arith.constant 1 : i32
    %765 = tpu.dynamic_rotate %749 by %c1_i32_238 dim 1 : vector<16x512xf32>, i32 -> vector<16x512xf32>
    %cst_239 = arith.constant 0.000000e+00 : f32
    %766 = vector.shape_cast %68 : vector<1x512xi1> to vector<1x512xi1>
    %767 = vector.broadcast %766 : vector<1x512xi1> to vector<16x512xi1>
    %768 = vector.broadcast %cst_239 : f32 to vector<16x512xf32>
    %769 = arith.select %767, %765, %768 : vector<16x512xi1>, vector<16x512xf32>
    %c511_i32_240 = arith.constant 511 : i32
    %770 = tpu.dynamic_rotate %749 by %c511_i32_240 dim 1 : vector<16x512xf32>, i32 -> vector<16x512xf32>
    %cst_241 = arith.constant 0.000000e+00 : f32
    %771 = vector.shape_cast %83 : vector<1x512xi1> to vector<1x512xi1>
    %772 = vector.broadcast %771 : vector<1x512xi1> to vector<16x512xi1>
    %773 = vector.broadcast %cst_241 : f32 to vector<16x512xf32>
    %774 = arith.select %772, %770, %773 : vector<16x512xi1>, vector<16x512xf32>
    %c497_i32_242 = arith.constant 497 : i32
    %775 = tpu.dynamic_rotate %749 by %c497_i32_242 dim 1 : vector<16x512xf32>, i32 -> vector<16x512xf32>
    %cst_243 = arith.constant 0.000000e+00 : f32
    %776 = vector.shape_cast %98 : vector<1x512xi1> to vector<1x512xi1>
    %777 = vector.broadcast %776 : vector<1x512xi1> to vector<16x512xi1>
    %778 = vector.broadcast %cst_243 : f32 to vector<16x512xf32>
    %779 = arith.select %777, %775, %778 : vector<16x512xi1>, vector<16x512xf32>
    %c496_i32_244 = arith.constant 496 : i32
    %780 = tpu.dynamic_rotate %749 by %c496_i32_244 dim 1 : vector<16x512xf32>, i32 -> vector<16x512xf32>
    %cst_245 = arith.constant 0.000000e+00 : f32
    %781 = vector.shape_cast %113 : vector<1x512xi1> to vector<1x512xi1>
    %782 = vector.broadcast %781 : vector<1x512xi1> to vector<16x512xi1>
    %783 = vector.broadcast %cst_245 : f32 to vector<16x512xf32>
    %784 = arith.select %782, %780, %783 : vector<16x512xi1>, vector<16x512xf32>
    %c495_i32_246 = arith.constant 495 : i32
    %785 = tpu.dynamic_rotate %749 by %c495_i32_246 dim 1 : vector<16x512xf32>, i32 -> vector<16x512xf32>
    %cst_247 = arith.constant 0.000000e+00 : f32
    %786 = vector.shape_cast %128 : vector<1x512xi1> to vector<1x512xi1>
    %787 = vector.broadcast %786 : vector<1x512xi1> to vector<16x512xi1>
    %788 = vector.broadcast %cst_247 : f32 to vector<16x512xf32>
    %789 = arith.select %787, %785, %788 : vector<16x512xi1>, vector<16x512xf32>
    %790 = tpu.concatenate %754, %759, %764, %769, %749, %774, %779, %784, %789 in 0 : vector<16x512xf32>, vector<16x512xf32>, vector<16x512xf32>, vector<16x512xf32>, vector<16x512xf32>, vector<16x512xf32>, vector<16x512xf32>, vector<16x512xf32>, vector<16x512xf32> -> vector<144x512xf32>
    %791 = arith.truncf %790 : vector<144x512xf32> to vector<144x512xbf16>
    %c48 = arith.constant 48 : index
    %c0_248 = arith.constant 0 : index
    %792 = vector.load %arg2[%c48, %c0_248] : memref<88x144xbf16, #tpu.memory_space<vmem>>, vector<8x144xbf16>
    %cst_249 = arith.constant dense<0.000000e+00> : vector<8x512xf32>
    %793 = tpu.matmul %792, %791, %cst_249 {dimension_numbers = #tpu.dot_dimension_numbers<[1], [0], [0], [1], [0, 0, 1, 1], [], []>} : vector<8x144xbf16>, vector<144x512xbf16>, vector<8x512xf32> -> vector<8x512xf32>
    %c48_250 = arith.constant 48 : index
    %c0_251 = arith.constant 0 : index
    %794 = vector.load %arg3[%c48_250, %c0_251] : memref<88x1xf32, #tpu.memory_space<vmem>>, vector<8x1xf32>
    %795 = vector.broadcast %794 : vector<8x1xf32> to vector<8x512xf32>
    %796 = arith.addf %793, %795 : vector<8x512xf32>
    %797 = vector.extract_strided_slice %796 {offsets = [0, 0], sizes = [8, 256], strides = [1, 1]} : vector<8x512xf32> to vector<8x256xf32>
    %798 = arith.mulf %797, %797 : vector<8x256xf32>
    %799 = tpu.concatenate %797, %798 in 0 : vector<8x256xf32>, vector<8x256xf32> -> vector<16x256xf32>
    %cst_252 = arith.constant dense<0.000000e+00> : vector<16xf32>
    %800 = vector.multi_reduction <add>, %799, %cst_252 [1] : vector<16x256xf32> to vector<16xf32>
    %801 = vector.shape_cast %800 : vector<16xf32> to vector<16x1xf32>
    %802 = vector.extract_strided_slice %801 {offsets = [0, 0], sizes = [8, 1], strides = [1, 1]} : vector<16x1xf32> to vector<8x1xf32>
    %cst_253 = arith.constant 3.906250e-03 : f32
    %803 = vector.broadcast %cst_253 : f32 to vector<8x1xf32>
    %804 = arith.mulf %802, %803 : vector<8x1xf32>
    %805 = vector.extract_strided_slice %801 {offsets = [8, 0], sizes = [8, 1], strides = [1, 1]} : vector<16x1xf32> to vector<8x1xf32>
    %cst_254 = arith.constant 3.906250e-03 : f32
    %806 = vector.broadcast %cst_254 : f32 to vector<8x1xf32>
    %807 = arith.mulf %805, %806 : vector<8x1xf32>
    %808 = arith.mulf %804, %804 : vector<8x1xf32>
    %809 = arith.subf %807, %808 : vector<8x1xf32>
    %810 = vector.broadcast %804 : vector<8x1xf32> to vector<8x256xf32>
    %811 = arith.subf %797, %810 : vector<8x256xf32>
    %cst_255 = arith.constant 9.99999974E-6 : f32
    %812 = vector.broadcast %cst_255 : f32 to vector<8x1xf32>
    %813 = arith.addf %809, %812 : vector<8x1xf32>
    %814 = math.rsqrt %813 : vector<8x1xf32>
    %815 = vector.broadcast %814 : vector<8x1xf32> to vector<8x256xf32>
    %816 = arith.mulf %811, %815 : vector<8x256xf32>
    %817 = vector.extract_strided_slice %796 {offsets = [0, 256], sizes = [8, 256], strides = [1, 1]} : vector<8x512xf32> to vector<8x256xf32>
    %818 = arith.mulf %817, %817 : vector<8x256xf32>
    %819 = tpu.concatenate %817, %818 in 0 : vector<8x256xf32>, vector<8x256xf32> -> vector<16x256xf32>
    %cst_256 = arith.constant dense<0.000000e+00> : vector<16xf32>
    %820 = vector.multi_reduction <add>, %819, %cst_256 [1] : vector<16x256xf32> to vector<16xf32>
    %821 = vector.shape_cast %820 : vector<16xf32> to vector<16x1xf32>
    %822 = vector.extract_strided_slice %821 {offsets = [0, 0], sizes = [8, 1], strides = [1, 1]} : vector<16x1xf32> to vector<8x1xf32>
    %cst_257 = arith.constant 3.906250e-03 : f32
    %823 = vector.broadcast %cst_257 : f32 to vector<8x1xf32>
    %824 = arith.mulf %822, %823 : vector<8x1xf32>
    %825 = vector.extract_strided_slice %821 {offsets = [8, 0], sizes = [8, 1], strides = [1, 1]} : vector<16x1xf32> to vector<8x1xf32>
    %cst_258 = arith.constant 3.906250e-03 : f32
    %826 = vector.broadcast %cst_258 : f32 to vector<8x1xf32>
    %827 = arith.mulf %825, %826 : vector<8x1xf32>
    %828 = arith.mulf %824, %824 : vector<8x1xf32>
    %829 = arith.subf %827, %828 : vector<8x1xf32>
    %830 = vector.broadcast %824 : vector<8x1xf32> to vector<8x256xf32>
    %831 = arith.subf %817, %830 : vector<8x256xf32>
    %cst_259 = arith.constant 9.99999974E-6 : f32
    %832 = vector.broadcast %cst_259 : f32 to vector<8x1xf32>
    %833 = arith.addf %829, %832 : vector<8x1xf32>
    %834 = math.rsqrt %833 : vector<8x1xf32>
    %835 = vector.broadcast %834 : vector<8x1xf32> to vector<8x256xf32>
    %836 = arith.mulf %831, %835 : vector<8x256xf32>
    %837 = tpu.concatenate %816, %836 in 1 : vector<8x256xf32>, vector<8x256xf32> -> vector<8x512xf32>
    %cst_260 = arith.constant 0.000000e+00 : f32
    %838 = vector.broadcast %cst_260 : f32 to vector<8x512xf32>
    %839 = arith.cmpf oge, %837, %838 : vector<8x512xf32>
    %cst_261 = arith.constant 2.500000e-01 : f32
    %840 = vector.broadcast %cst_261 : f32 to vector<8x512xf32>
    %841 = arith.mulf %837, %840 : vector<8x512xf32>
    %842 = arith.select %839, %837, %841 : vector<8x512xi1>, vector<8x512xf32>
    %c17_i32_262 = arith.constant 17 : i32
    %843 = tpu.dynamic_rotate %842 by %c17_i32_262 dim 1 : vector<8x512xf32>, i32 -> vector<8x512xf32>
    %cst_263 = arith.constant 0.000000e+00 : f32
    %844 = vector.shape_cast %23 : vector<1x512xi1> to vector<1x512xi1>
    %845 = vector.broadcast %844 : vector<1x512xi1> to vector<8x512xi1>
    %846 = vector.broadcast %cst_263 : f32 to vector<8x512xf32>
    %847 = arith.select %845, %843, %846 : vector<8x512xi1>, vector<8x512xf32>
    %c16_i32_264 = arith.constant 16 : i32
    %848 = tpu.dynamic_rotate %842 by %c16_i32_264 dim 1 : vector<8x512xf32>, i32 -> vector<8x512xf32>
    %cst_265 = arith.constant 0.000000e+00 : f32
    %849 = vector.shape_cast %38 : vector<1x512xi1> to vector<1x512xi1>
    %850 = vector.broadcast %849 : vector<1x512xi1> to vector<8x512xi1>
    %851 = vector.broadcast %cst_265 : f32 to vector<8x512xf32>
    %852 = arith.select %850, %848, %851 : vector<8x512xi1>, vector<8x512xf32>
    %c15_i32_266 = arith.constant 15 : i32
    %853 = tpu.dynamic_rotate %842 by %c15_i32_266 dim 1 : vector<8x512xf32>, i32 -> vector<8x512xf32>
    %cst_267 = arith.constant 0.000000e+00 : f32
    %854 = vector.shape_cast %53 : vector<1x512xi1> to vector<1x512xi1>
    %855 = vector.broadcast %854 : vector<1x512xi1> to vector<8x512xi1>
    %856 = vector.broadcast %cst_267 : f32 to vector<8x512xf32>
    %857 = arith.select %855, %853, %856 : vector<8x512xi1>, vector<8x512xf32>
    %c1_i32_268 = arith.constant 1 : i32
    %858 = tpu.dynamic_rotate %842 by %c1_i32_268 dim 1 : vector<8x512xf32>, i32 -> vector<8x512xf32>
    %cst_269 = arith.constant 0.000000e+00 : f32
    %859 = vector.shape_cast %68 : vector<1x512xi1> to vector<1x512xi1>
    %860 = vector.broadcast %859 : vector<1x512xi1> to vector<8x512xi1>
    %861 = vector.broadcast %cst_269 : f32 to vector<8x512xf32>
    %862 = arith.select %860, %858, %861 : vector<8x512xi1>, vector<8x512xf32>
    %c511_i32_270 = arith.constant 511 : i32
    %863 = tpu.dynamic_rotate %842 by %c511_i32_270 dim 1 : vector<8x512xf32>, i32 -> vector<8x512xf32>
    %cst_271 = arith.constant 0.000000e+00 : f32
    %864 = vector.shape_cast %83 : vector<1x512xi1> to vector<1x512xi1>
    %865 = vector.broadcast %864 : vector<1x512xi1> to vector<8x512xi1>
    %866 = vector.broadcast %cst_271 : f32 to vector<8x512xf32>
    %867 = arith.select %865, %863, %866 : vector<8x512xi1>, vector<8x512xf32>
    %c497_i32_272 = arith.constant 497 : i32
    %868 = tpu.dynamic_rotate %842 by %c497_i32_272 dim 1 : vector<8x512xf32>, i32 -> vector<8x512xf32>
    %cst_273 = arith.constant 0.000000e+00 : f32
    %869 = vector.shape_cast %98 : vector<1x512xi1> to vector<1x512xi1>
    %870 = vector.broadcast %869 : vector<1x512xi1> to vector<8x512xi1>
    %871 = vector.broadcast %cst_273 : f32 to vector<8x512xf32>
    %872 = arith.select %870, %868, %871 : vector<8x512xi1>, vector<8x512xf32>
    %c496_i32_274 = arith.constant 496 : i32
    %873 = tpu.dynamic_rotate %842 by %c496_i32_274 dim 1 : vector<8x512xf32>, i32 -> vector<8x512xf32>
    %cst_275 = arith.constant 0.000000e+00 : f32
    %874 = vector.shape_cast %113 : vector<1x512xi1> to vector<1x512xi1>
    %875 = vector.broadcast %874 : vector<1x512xi1> to vector<8x512xi1>
    %876 = vector.broadcast %cst_275 : f32 to vector<8x512xf32>
    %877 = arith.select %875, %873, %876 : vector<8x512xi1>, vector<8x512xf32>
    %c495_i32_276 = arith.constant 495 : i32
    %878 = tpu.dynamic_rotate %842 by %c495_i32_276 dim 1 : vector<8x512xf32>, i32 -> vector<8x512xf32>
    %cst_277 = arith.constant 0.000000e+00 : f32
    %879 = vector.shape_cast %128 : vector<1x512xi1> to vector<1x512xi1>
    %880 = vector.broadcast %879 : vector<1x512xi1> to vector<8x512xi1>
    %881 = vector.broadcast %cst_277 : f32 to vector<8x512xf32>
    %882 = arith.select %880, %878, %881 : vector<8x512xi1>, vector<8x512xf32>
    %883 = tpu.concatenate %847, %852, %857, %862, %842, %867, %872, %877, %882 in 0 : vector<8x512xf32>, vector<8x512xf32>, vector<8x512xf32>, vector<8x512xf32>, vector<8x512xf32>, vector<8x512xf32>, vector<8x512xf32>, vector<8x512xf32>, vector<8x512xf32> -> vector<72x512xf32>
    %884 = arith.truncf %883 : vector<72x512xf32> to vector<72x512xbf16>
    %c56 = arith.constant 56 : index
    %c0_278 = arith.constant 0 : index
    %885 = vector.load %arg2[%c56, %c0_278] : memref<88x144xbf16, #tpu.memory_space<vmem>>, vector<3x72xbf16>
    %cst_279 = arith.constant dense<0.000000e+00> : vector<3x512xf32>
    %886 = tpu.matmul %885, %884, %cst_279 {dimension_numbers = #tpu.dot_dimension_numbers<[1], [0], [0], [1], [0, 0, 1, 1], [], []>} : vector<3x72xbf16>, vector<72x512xbf16>, vector<3x512xf32> -> vector<3x512xf32>
    %c56_280 = arith.constant 56 : index
    %c0_281 = arith.constant 0 : index
    %887 = vector.load %arg3[%c56_280, %c0_281] : memref<88x1xf32, #tpu.memory_space<vmem>>, vector<3x1xf32>
    %888 = vector.broadcast %887 : vector<3x1xf32> to vector<3x512xf32>
    %889 = arith.addf %886, %888 : vector<3x512xf32>
    %c0_282 = arith.constant 0 : index
    %c0_283 = arith.constant 0 : index
    %c0_284 = arith.constant 0 : index
    %890 = vector.load %arg4[%c0_282, %c0_283, %c0_284] : memref<1x3x512xf32, #tpu.memory_space<vmem>>, vector<1x3x512xf32>
    %891 = vector.shape_cast %890 : vector<1x3x512xf32> to vector<3x512xf32>
    %892 = vector.shape_cast %889 : vector<3x512xf32> to vector<1x3x512xf32>
    tpu.vector_store %arg4[%c0_282, %c0_283, %c0_284], %892 {strides = array<i32>} : memref<1x3x512xf32, #tpu.memory_space<vmem>>, vector<1x3x512xf32>,
    return
  }
  func.func @transform_0(%arg0: i32) -> (i32, i32, i32) {
    %c0_i32 = arith.constant 0 : i32
    %c0_i32_0 = arith.constant 0 : i32
    %c0_i32_1 = arith.constant 0 : i32
    return %arg0, %c0_i32, %c0_i32_0 : i32, i32, i32
  }
  func.func @transform_1(%arg0: i32) -> (i32, i32) {
    %c0_i32 = arith.constant 0 : i32
    %c0_i32_0 = arith.constant 0 : i32
    %c0_i32_1 = arith.constant 0 : i32
    return %c0_i32, %c0_i32_0 : i32, i32
  }
  func.func @transform_2(%arg0: i32) -> (i32, i32) {
    %c0_i32 = arith.constant 0 : i32
    %c0_i32_0 = arith.constant 0 : i32
    %c0_i32_1 = arith.constant 0 : i32
    return %c0_i32, %c0_i32_0 : i32, i32
  }
  func.func @transform_3(%arg0: i32) -> (i32, i32, i32) {
    %c0_i32 = arith.constant 0 : i32
    %c0_i32_0 = arith.constant 0 : i32
    %c0_i32_1 = arith.constant 0 : i32
    return %arg0, %c0_i32, %c0_i32_0 : i32, i32, i32
  }
}

</mosaic_0001>

<bundles_post_ra>
// kernel: attention_unet_forward.1
= control target key start
LH: loop header
LB: loop body
LE: loop exit
PB: predicated region body
PF: predicated region fallthrough
CT: control target
= control target key end

     0   :  { %s4496_s20 = smov 113   ;;  %s4497_s21 = smov 111   ;;  %v7549_v6 = vmov 0   ;;  %v7548_v8 = vlaneseq  ;;  %v7775_v33 = vmov 0  ;;  %v7778_v34 = vmov 0  ;;  %s7511_s0 = inlined_call_operand.vmem [shape: f32[1,8,512], index: 0, kind: input, shape index: {}]   ;;  %s7512_s1 = inlined_call_operand.vmem [shape: bf16[88,144], index: 1, kind: input, shape index: {}]   ;;  %s7513_s2 = inlined_call_operand.vmem [shape: f32[88,1], index: 2, kind: input, shape index: {}]   ;;  %s7514_s3 = inlined_call_operand.vmem [shape: f32[1,3,512], index: 3, kind: output, shape index: {}]  }
   0x1   :  { %v4538_v0 = vld [vmem:[%s7511_s0] sm:$0xff]  ;;  %v4543_v1 = vld [vmem:[%s7511_s0 + $0x8] sm:$0xff]  ;;  %v4548_v2 = vld [vmem:[%s7511_s0 + $0x10] sm:$0xff]  ;;  %s4498_s22 = smov 112   ;;  %s4500_s23 = smov 15   ;;  %600 = vmatprep.mubr.bf16.mxu0 %v7549_v6  ;;  %641 = vmatprep.mubr.bf16.mxu1 %v7549_v6  ;;  %v7781_v36 = vmov 0 }
   0x2   :  { %v3719_v3 = vpack.i.bf16 %v4543_v1, %v4538_v0  ;;  %v4555_v4 = vld [vmem:[%s7511_s0 + $0x18] sm:$0xff]  ;;  %s4499_s0 = smov 127   ;;  %s4501_s24 = smov 1   ;;  %3789 = vset.pattern.permute.xlu0 %v7549_v6  ;;  %3870 = vset.pattern.permute.xlu1 %v7549_v6  ;;  %v545_v7 = vld [vmem:[%s7513_s2] sm:$0xff]  ;;  %v4583_v9 = vand.u32 127, %v7548_v8  ;;  %v7784_v37 = vmov 0 }
   0x3   :  { %v3724_v5 = vpack.i.bf16 %v4555_v4, %v4548_v2  ;;  %s4503_s25 = smov 17   ;;  %s4504_s26 = smov 16   ;;  %v7786_v39 = vmov 0  ;;  %v7789_v41 = vmov 0  ;;  %v7791_v42 = vmov 0 }
   0x4   :  { %3720 = vrot.lane.b32.xlu1 %v3719_v3, %s4496_s20  ;;  %3710 = vrot.lane.b32.xlu0 %v3719_v3, %s4497_s21  ;;  %v21_v10 = vadd.s32 128, %v4583_v9  ;;  %v23_v11 = vadd.s32 384, %v4583_v9  ;;  %v22_v12 = vadd.s32 256, %v4583_v9  ;;  %v24_v17 = vand.u32 255, %v4583_v9  ;;  %s4507_s10 = smov 96   ;;  %s4508_s11 = smov 98  }
   0x5   :  { %v7793_v44 = vmov 0  ;;  %v7798_v46 = vmov 0  ;;  %v7801_v47 = vmov 0  ;;  %v7804_v48 = vmov 0  ;;  %s4509_s12 = smov 126   ;;  %s4510_s13 = smov 2  }
   0x6   :  { %v25_v13 = vand.u32 255, %v21_v10  ;;  %v27_v14 = vand.u32 255, %v23_v11  ;;  %v26_v15 = vand.u32 255, %v22_v12  ;;  %v4598_v22 = vshra.s32 %v24_v17, 4  ;;  %s4511_s14 = smov 30   ;;  %s4512_s15 = smov 32  }
   0x7   :  { %v4616_v31 = vand.u32 15, %v24_v17  ;;  %v7810_v50 = vmov 0  ;;  %v7815_v51 = vmov 0  ;;  %v7820_v52 = vmov 0  ;;  %s4513_s16 = smov 34   ;;  %s4514_s17 = smov 94  }
   0x8   :  { %3725 = vrot.lane.b32.xlu1 %v3724_v5, %s4496_s20  ;;  %3715 = vrot.lane.b32.xlu0 %v3724_v5, %s4497_s21  ;;  %v4588_v16 = vshra.s32 %v25_v13, 4  ;;  %v4591_v18 = vshra.s32 %v27_v14, 4  ;;  %v4593_v19 = vshra.s32 %v26_v15, 4  ;;  %v4595_v20 = vand.u32 15, %v25_v13 }
   0x9   :  { %v4600_v23 = vand.u32 15, %v27_v14  ;;  %v4603_v25 = vand.u32 15, %v26_v15  ;;  %v136_v28 = vadd.s32 1, %v4598_v22  ;;  %v4648_v38 = vadd.s32 1, %v4616_v31 }
   0xa   :  { %7772 = vst [vmem:[#allocation2_spill] sm:$0xff] %v4593_v19  ;;  %v137_v21 = vadd.s32 1, %v4588_v16  ;;  %v139_v24 = vadd.s32 1, %v4591_v18  ;;  %v138_v26 = vadd.s32 1, %v4593_v19  ;;  %v4607_v27 = vadd.s32 1, %v4595_v20 }
   0xb   :  { %7773 = vst [vmem:[#allocation3_spill] sm:$0xff] %v4600_v23  ;;  %7774 = vst [vmem:[#allocation4_spill] sm:$0xff] %v4603_v25  ;;  %v4611_v29 = vadd.s32 1, %v4600_v23  ;;  %v4614_v30 = vadd.s32 1, %v4603_v25  ;;  %v4619_v32 = vadd.s32 4294967295, %v4595_v20  ;;  %vm140_vm9 = vcmp.ge.s32.totalorder %v136_v28, 0 }
   0xc   :  { %3735 = vrot.lane.b32.xlu1 %v3724_v5, %s4498_s22  ;;  %3730 = vrot.lane.b32.xlu0 %v3719_v3, %s4498_s22  ;;  %vm141_vm0 = vcmp.ge.s32.totalorder %v137_v21, 0  ;;  %vm145_vm1 = vcmp.lt.s32.totalorder %v137_v21, 16  ;;  %vm143_vm2 = vcmp.ge.s32.totalorder %v139_v24, 0  ;;  %vm147_vm3 = vcmp.lt.s32.totalorder %v139_v24, 16 }
   0xd   :  { %vm142_vm4 = vcmp.ge.s32.totalorder %v138_v26, 0  ;;  %vm146_vm5 = vcmp.lt.s32.totalorder %v138_v26, 16  ;;  %vm7516_vm6 = vcmp.ge.s32.totalorder %v4607_v27, 0  ;;  %vm4622_vm7 = vmand %vm141_vm0, %vm145_vm1  ;;  %vm144_vm10 = vcmp.lt.s32.totalorder %v136_v28, 16 }
   0xe   :  { %v7776_v33 = vsel %vm4622_vm7, 4294967295, %v7775_v33  ;;  %vm4626_vm8 = vmand %vm143_vm2, %vm147_vm3  ;;  %v4631_v35 = vadd.s32 4294967295, %v4600_v23  ;;  %vm7515_vm11 = vcmp.ge.s32.totalorder %v4611_v29, 0  ;;  %vm7517_vm12 = vcmp.ge.s32.totalorder %v4614_v30, 0 }
   0xf   :  { %7777 = vst [vmem:[#allocation5_spill] sm:$0xff] %v7776_v33  ;;  %v7779_v34 = vsel %vm4626_vm8, 4294967295, %v7778_v34  ;;  %vm4635_vm13 = vmand %vm142_vm4, %vm146_vm5  ;;  %vm7518_vm15 = vcmp.ge.s32.totalorder %v4619_v32, 0  ;;  %v4656_v40 = vadd.s32 4294967295, %v4603_v25  ;;  %vm109_vm1 = vcmp.ge.s32.totalorder %v4588_v16, 0 }
  0x10   :  { %3745 = vrot.lane.b32.xlu1 %v3724_v5, %s4499_s0  ;;  %3740 = vrot.lane.b32.xlu0 %v3719_v3, %s4499_s0  ;;  %7780 = vst [vmem:[#allocation6_spill] sm:$0xff] %v7779_v34  ;;  %v7782_v36 = vsel %vm4635_vm13, 4294967295, %v7781_v36  ;;  %vm4643_vm14 = vmand %vm4622_vm7, %vm7516_vm6  ;;  %vm113_vm2 = vcmp.lt.s32.totalorder %v4588_v16, 16  ;;  %v4678_v43 = vadd.s32 4294967295, %v4616_v31  ;;  %vm115_vm6 = vcmp.lt.s32.totalorder %v4591_v18, 16 }
  0x11   :  { %7783 = vst [vmem:[#allocation7_spill] sm:$0xff] %v7782_v36  ;;  %v7785_v37 = vsel %vm4643_vm14, 4294967295, %v7784_v37  ;;  %vm4651_vm0 = vmand %vm140_vm9, %vm144_vm10  ;;  %vm7527_vm5 = vcmp.lt.s32.totalorder %v4631_v35, 16  ;;  %v37_v45 = vadd.s32 4294967295, %v4588_v16  ;;  %vm7807_vm14 = vcmp.ge.s32.totalorder %v4607_v27, 0 }
  0x12   :  { %v7787_v39 = vsel %vm4651_vm0, 4294967295, %v7786_v39  ;;  %vm4664_vm3 = vmand %vm4626_vm8, %vm7515_vm11  ;;  %vm111_vm11 = vcmp.ge.s32.totalorder %v4591_v18, 0  ;;  %v7824_v53 = vmov 0  ;;  %v39_v54 = vadd.s32 4294967295, %v4591_v18 }
  0x13   :  { %7788 = vst [vmem:[#allocation8_spill] sm:$0xff] %v7787_v39  ;;  %v7790_v41 = vsel %vm4664_vm3, 4294967295, %v7789_v41  ;;  %vm4672_vm4 = vmand %vm4635_vm13, %vm7517_vm12  ;;  %vm7521_vm12 = vcmp.lt.s32.totalorder %v4648_v38, 16  ;;  %v7828_v55 = vmov 0  ;;  %v7832_v56 = vmov 0 }
  0x14   :  { %3755 = vrot.lane.b32.xlu1 %v3724_v5, %s4500_s23  ;;  %3750 = vrot.lane.b32.xlu0 %v3719_v3, %s4500_s23  ;;  %v7792_v42 = vsel %vm4672_vm4, 4294967295, %v7791_v42  ;;  %vm153_vm10 = vmand %vm4622_vm7, %vm7518_vm15  ;;  %vm7796_vm4 = vcmp.ge.s32.totalorder %v4631_v35, 0  ;;  %vm7797_vm15 = vcmp.lt.s32.totalorder %v4619_v32, 16  ;;  %v7835_v57 = vmov 0 }
  0x15   :  { %vm4688_vm3 = vmand %vm109_vm1, %vm113_vm2  ;;  %vm45_vm1 = vcmp.ge.s32.totalorder %v37_v45, 0  ;;  %v7838_v58 = vmov 0  ;;  %v7841_v59 = vmov 0  ;;  %v7846_v60 = vmov 0 }
  0x16   :  { %v7794_v44 = vsel %vm4688_vm3, 4294967295, %v7793_v44  ;;  %vm155_vm9 = vmand %vm4626_vm8, %vm7796_vm4  ;;  %vm7813_vm8 = vcmp.ge.s32.totalorder %v4656_v40, 0  ;;  %v7851_v61 = vmov 0  ;;  %v36_v10 = vadd.s32 4294967295, %v4598_v22 }
  0x17   :  { %7795 = vst [vmem:[#allocation9_spill] sm:$0xff] %v7794_v44  ;;  %vm4701_vm7 = vmand %vm153_vm10, %vm7797_vm15  ;;  %v7861_v11 = vmov 0  ;;  %v4842_v12 = vadd.s32 4294967295, %v4593_v19  ;;  %v7866_v14 = vmov 0  ;;  %v7869_v15 = vmov 0 }
  0x18   :  { %3765 = vrot.lane.b32.xlu1 %v3724_v5, %s4501_s24  ;;  %3760 = vrot.lane.b32.xlu0 %v3719_v3, %s4501_s24  ;;  %v7799_v46 = vsel %vm4701_vm7, 4294967295, %v7798_v46  ;;  %vm4706_vm2 = vmand %vm111_vm11, %vm115_vm6  ;;  %vm114_vm11 = vcmp.lt.s32.totalorder %v4593_v19, 16  ;;  %vm112_vm6 = vcmp.lt.s32.totalorder %v4598_v22, 16  ;;  %vm7819_vm7 = vcmp.lt.s32.totalorder %v4607_v27, 16 }
  0x19   :  { %7800 = vst [vmem:[#allocation10_spill] sm:$0xff] %v7799_v46  ;;  %v7802_v47 = vsel %vm4706_vm2, 4294967295, %v7801_v47  ;;  %vm4714_vm4 = vmand %vm4651_vm0, %vm7521_vm12  ;;  %v7874_v26 = vmov 0  ;;  %v7894_v6 = vmov 0 }
  0x1a   :  { %7803 = vst [vmem:[#allocation11_spill] sm:$0xff] %v7802_v47  ;;  %v7805_v48 = vsel %vm4714_vm4, 4294967295, %v7804_v48  ;;  %vm4722_vm15 = vmand %vm4688_vm3, %vm7807_vm14  ;;  %vm108_vm3 = vcmp.ge.s32.totalorder %v4598_v22, 0  ;;  %vm7814_vm4 = vcmp.ge.s32.totalorder %v4678_v43, 0 }
  0x1b   :  { %7806 = vst [vmem:[#allocation12_spill] sm:$0xff] %v7805_v48  ;;  %vm4731_vm12 = vmand %vm155_vm9, %vm7527_vm5  ;;  %vm7818_vm9 = vcmp.ge.s32.totalorder %v4611_v29, 0 }
  0x1c   :  { %3775 = vrot.lane.b32.xlu1 %v3724_v5, %s4503_s25  ;;  %3770 = vrot.lane.b32.xlu0 %v3719_v3, %s4503_s25  ;;  %v7811_v50 = vsel %vm4731_vm12, 4294967295, %v7810_v50  ;;  %vm154_vm14 = vmand %vm4635_vm13, %vm7813_vm8  ;;  %vm49_vm12 = vcmp.lt.s32.totalorder %v37_v45, 16  ;;  %vm7827_vm13 = vnez %v7785_v37 }
  0x1d   :  { %7812 = vst [vmem:[#allocation13_spill] sm:$0xff] %v7811_v50  ;;  %vm4746_vm10 = vmand %vm4651_vm0, %vm7814_vm4  ;;  %vm7823_vm4 = vcmp.ge.s32.totalorder %v4593_v19, 0 }
  0x1e   :  { %v7816_v51 = vsel %vm4746_vm10, 4294967295, %v7815_v51  ;;  %vm131_vm5 = vmand %vm4706_vm2, %vm7818_vm9 }
  0x1f   :  { %7817 = vst [vmem:[#allocation14_spill] sm:$0xff] %v7816_v51  ;;  %vm4760_vm0 = vmand %vm4722_vm15, %vm7819_vm7 }
  0x20   :  { %3785 = vrot.lane.b32.xlu1 %v3724_v5, %s4504_s26  ;;  %3780 = vrot.lane.b32.xlu0 %v3719_v3, %s4504_s26  ;;  %v7821_v52 = vsel %vm4760_vm0, 4294967295, %v7820_v52  ;;  %vm4766_vm10 = vmand %vm7823_vm4, %vm114_vm11  ;;  %vm7837_vm4 = vcmp.lt.s32.totalorder %v4611_v29, 16  ;;  %v7856_v3 = vmov 0 }
  0x21   :  { %7822 = vst [vmem:[#allocation15_spill] sm:$0xff] %v7821_v52  ;;  %v7825_v53 = vsel %vm4766_vm10, 4294967295, %v7824_v53  ;;  %vm7826_vm9 = vmmov %vm7819_vm7  ;;  %vm7831_vm7 = vcmp.lt.s32.totalorder %v4656_v40, 16 }
  0x22   :  { %vm4775_vm8 = vmand %vm7827_vm13, %vm7826_vm9 }
  0x23   :  { %v7829_v55 = vsel %vm4775_vm8, 4294967295, %v7828_v55  ;;  %vm4781_vm15 = vmand %vm154_vm14, %vm7831_vm7  ;;  %vm7845_vm14 = vnez %v7790_v41 }
  0x24   :  { %548 = vperm.xlu0 %3789, %v545_v7   ;;  %7830 = vst [vmem:[#allocation16_spill] sm:$0xff] %v7829_v55  ;;  %v7833_v56 = vsel %vm4781_vm15, 4294967295, %v7832_v56  ;;  %vm4785_vm11 = vmand %vm108_vm3, %vm112_vm6  ;;  %vm7849_vm3 = vcmp.lt.s32.totalorder %v4614_v30, 16  ;;  %vm7850_vm6 = vnez %v7792_v42  ;;  %v7878_v42 = vmov 0 }
  0x25   :  { %7834 = vst [vmem:[#allocation17_spill] sm:$0xff] %v7833_v56  ;;  %v7836_v57 = vsel %vm4785_vm11, 4294967295, %v7835_v57  ;;  %vm4791_vm2 = vmand %vm131_vm5, %vm7837_vm4 }
  0x26   :  { %v7839_v58 = vsel %vm4791_vm2, 4294967295, %v7838_v58  ;;  %vm4795_vm13 = vmand %vm45_vm1, %vm49_vm12  ;;  %vm7854_vm12 = vcmp.ge.s32.totalorder %v4614_v30, 0 }
  0x27   :  { %7840 = vst [vmem:[#allocation18_spill] sm:$0xff] %v7839_v58  ;;  %v7842_v59 = vsel %vm4795_vm13, 4294967295, %v7841_v59  ;;  %vm7844_vm9 = vmmov %vm7837_vm4  ;;  %vm7860_vm4 = vcmp.lt.s32.totalorder %v4614_v30, 16 }
  0x28   :  { %7843 = vst [vmem:[#allocation19_spill] sm:$0xff] %v7842_v59  ;;  %vm4803_vm7 = vmand %vm7845_vm14, %vm7844_vm9  ;;  %vm7855_vm9 = vcmp.lt.s32.totalorder %v4648_v38, 16 }
  0x29   :  { %v7847_v60 = vsel %vm4803_vm7, 4294967295, %v7846_v60  ;;  %vm4811_vm5 = vmand %vm7850_vm6, %vm7849_vm3  ;;  %vm47_vm3 = vcmp.ge.s32.totalorder %v39_v54, 0  ;;  %vm51_vm6 = vcmp.lt.s32.totalorder %v39_v54, 16  ;;  %vm7864_vm7 = vnez %v7799_v46 }
  0x2a   :  { %7848 = vst [vmem:[#allocation20_spill] sm:$0xff] %v7847_v60  ;;  %v7852_v61 = vsel %vm4811_vm5, 4294967295, %v7851_v61  ;;  %vm130_vm1 = vmand %vm4766_vm10, %vm7854_vm12  ;;  %vm7859_vm5 = vcmp.ge.s32.totalorder %v4607_v27, 0  ;;  %v7887_v54 = vmov 0 }
  0x2b   :  { %7853 = vst [vmem:[#allocation21_spill] sm:$0xff] %v7852_v61  ;;  %vm4826_vm14 = vmand %vm4785_vm11, %vm7855_vm9  ;;  %vm7873_vm9 = vcmp.lt.s32.totalorder %v4607_v27, 16  ;;  %vm7881_vm11 = vcmp.ge.s32.totalorder %v4619_v32, 0  ;;  %v7917_v27 = vmov 0 }
  0x2c   :  { %v7857_v3 = vsel %vm4826_vm14, 4294967295, %v7856_v3  ;;  %vm97_vm12 = vmand %vm4795_vm13, %vm7859_vm5  ;;  %vm7863_vm14 = vcmp.lt.s32.totalorder %v4583_v9, 111  ;;  %vm7865_vm5 = vnez %v7776_v33 }
  0x2d   :  { %7858 = vst [vmem:[#allocation22_spill] sm:$0xff] %v7857_v3  ;;  %vm4837_vm10 = vmand %vm130_vm1, %vm7860_vm4 }
  0x2e   :  { %v7862_v11 = vsel %vm4837_vm10, 4294967295, %v7861_v11  ;;  %vm4851_vm13 = vmpackc.low %vm7865_vm5, %vm7864_vm7  ;;  %vm7882_vm5 = vnez %v7794_v44 }
  0x2f   :  { %v7867_v14 = vsel %vm4851_vm13, 4294967295, %v7866_v14  ;;  %vm4855_vm1 = vmand %vm47_vm3, %vm51_vm6  ;;  %vm7876_vm3 = vnez %v7811_v50  ;;  %vm7877_vm6 = vnez %v7779_v34  ;;  %v7906_v34 = vmov 0 }
  0x30   :  { %7868 = vst [vmem:[#allocation23_spill] sm:$0xff] %v7867_v14  ;;  %v7870_v15 = vsel %vm4855_vm1, 4294967295, %v7869_v15  ;;  %vm4867_vm7 = vmand %vm97_vm12, %vm7873_vm9  ;;  %vm7898_vm9 = vnez %v7802_v47 }
  0x31   :  { %7871 = vst [vmem:[#allocation24_spill] sm:$0xff] %v7870_v15  ;;  %v7875_v26 = vsel %vm4867_vm7, 4294967295, %v7874_v26  ;;  %vm4876_vm4 = vmpackc.low %vm7877_vm6, %vm7876_vm3  ;;  %vm7886_vm3 = vnez %v7787_v39  ;;  %vm7893_vm7 = vcmp.lt.s32.totalorder %v4583_v9, 111 }
  0x32   :  { %v7879_v42 = vsel %vm4876_vm4, 4294967295, %v7878_v42  ;;  %vm4884_vm12 = vmand %vm7882_vm5, %vm7881_vm11  ;;  %vm7890_vm4 = vcmp.ge.s32.totalorder %v4611_v29, 0  ;;  %vm7905_vm5 = vnez %v7782_v36  ;;  %v7935_v36 = vmov 0 }
  0x33   :  { %7880 = vst [vmem:[#allocation25_spill] sm:$0xff] %v7879_v42  ;;  %vm4902_vm11 = vmand %vm4855_vm1, %vm7890_vm4  ;;  %vm7897_vm4 = vcmp.ge.s32.totalorder %v4631_v35, 0 }
  0x34   :  { %vm4921_vm1 = vmand %vm7898_vm9, %vm7897_vm4 }
  0x76   :  { %v4819_v62 = vpop.permute.xlu1 %3720  ;;  %v3711_v63 = vpop.permute.xlu0 %3710 }
  0x77   :  { %v3713_v5 = vunpack.i.h.bf16 %v3711_v63  ;;  %v3712_v7 = vunpack.i.l.bf16 %v3711_v63  ;;  %v3723_v45 = vunpack.i.h.bf16 %v4819_v62  ;;  %v7927_v63 = vmov 0 }
  0x79   :  { %v510_v13 = vsel %vm7863_vm14, %v3712_v7, %v3713_v5  ;;  %vm7872_vm14 = vnez %v7805_v48 }
  0x7a   :  { %v4859_v17 = vpop.permute.xlu1 %3725  ;;  %v3716_v21 = vpop.permute.xlu0 %3715  ;;  %v520_v24 = vsel %vm7872_vm14, %v510_v13, 0.0  ;;  %vm7885_vm14 = vnez %v7816_v51  ;;  %v3722_v13 = vunpack.i.l.bf16 %v4819_v62 }
  0x7b   :  { %v3718_v37 = vunpack.i.h.bf16 %v3716_v21  ;;  %v3717_v41 = vunpack.i.l.bf16 %v3716_v21  ;;  %v3728_v49 = vunpack.i.h.bf16 %v4859_v17  ;;  %vm4894_vm6 = vmpackc.low %vm7886_vm3, %vm7885_vm14  ;;  %v540_v8 = vpack.c.bf16 %v520_v24, %v520_v24 }
  0x7c   :  { %v7888_v54 = vsel %vm4894_vm6, 4294967295, %v7887_v54  ;;  %vm7557_vm14 = vmmov 1   ;;  %v7901_v62 = vunpack.i.l.bf16 %v4859_v17 }
  0x7d   :  { %7889 = vst [vmem:[#allocation26_spill] sm:$0xff] %v7888_v54  ;;  %v509_v21 = vsel %vm7893_vm7, %v3713_v5, %v3717_v41  ;;  %vm4913_vm3 = vmpackc.low %vm4760_vm0, %vm7557_vm14  ;;  %vm7902_vm7 = vcmp.lt.s32.totalorder %v4583_v9, 113  ;;  %vm7903_vm14 = vcmp.lt.s32.totalorder %v4583_v9, 111 }
  0x7e   :  { %v7895_v6 = vsel %vm4913_vm3, 4294967295, %v7894_v6  ;;  %v459_v5 = vsel %vm7902_vm7, %v3723_v45, %v7901_v62  ;;  %v3736_v24 = vpop.permute.xlu1 %3735  ;;  %v3731_v52 = vpop.permute.xlu0 %3730  ;;  %v521_v50 = vsel %vm4775_vm8, %v509_v21, 0.0  ;;  %v511_v51 = vsel %vm7903_vm14, %v3718_v37, %v3712_v7  ;;  %vm7904_vm4 = vmmov %vm7903_vm14 }
  0x7f   :  { %7896 = vst [vmem:[#allocation27_spill] sm:$0xff] %v7895_v6  ;;  %v508_v46 = vsel %vm7904_vm4, %v3717_v41, %v3718_v37  ;;  %vm4940_vm0 = vmpackc.low %vm7905_vm5, %vm4781_vm15  ;;  %vm7909_vm7 = vcmp.lt.s32.totalorder %v4619_v32, 16  ;;  %v7910_v21 = vmov 0  ;;  %v3738_v7 = vunpack.i.h.bf16 %v3736_v24 }
  0x80   :  { %v7907_v34 = vsel %vm4940_vm0, 4294967295, %v7906_v34  ;;  %vm4948_vm9 = vmand %vm4884_vm12, %vm7909_vm7  ;;  %v3737_v62 = vunpack.i.l.bf16 %v3736_v24  ;;  %v3733_v39 = vunpack.i.h.bf16 %v3731_v52  ;;  %v3732_v37 = vunpack.i.l.bf16 %v3731_v52 }
  0x81   :  { %7908 = vst [vmem:[#allocation28_spill] sm:$0xff] %v7907_v34  ;;  %v7911_v21 = vsel %vm4948_vm9, 4294967295, %v7910_v21  ;;  %vm7912_vm14 = vmmov 1   ;;  %v7913_v41 = vmov 0  ;;  %vm7916_vm15 = vcmp.lt.s32.totalorder %v4611_v29, 16 }
  0x82   :  { %vm4955_vm4 = vmpackc.low %vm4791_vm2, %vm7912_vm14  ;;  %vm7919_vm12 = vcmp.lt.s32.totalorder %v4583_v9, 113  ;;  %v541_v56 = vpack.c.bf16 %v521_v50, %v521_v50  ;;  %vm7920_vm7 = vnez %v7847_v60  ;;  %vm7921_vm2 = vnez %v7852_v61  ;;  %v3746_v33 = vpop.permute.xlu1 %3745  ;;  %v3741_v47 = vpop.permute.xlu0 %3740 }
  0x83   :  { %v7914_v41 = vsel %vm4955_vm4, 4294967295, %v7913_v41  ;;  %vm4963_vm5 = vmand %vm4902_vm11, %vm7916_vm15  ;;  %v461_v24 = vsel %vm7919_vm12, %v3728_v49, %v3722_v13  ;;  %v523_v52 = vsel %vm7920_vm7, %v511_v51, 0.0  ;;  %v522_v58 = vsel %vm7921_vm2, %v508_v46, 0.0 }
  0x84   :  { %7915 = vst [vmem:[#allocation29_spill] sm:$0xff] %v7914_v41  ;;  %v7918_v27 = vsel %vm4963_vm5, 4294967295, %v7917_v27  ;;  %vm7922_vm8 = vnez %v7857_v3  ;;  %v7923_v29 = vmov 0  ;;  %vm7926_vm15 = vcmp.lt.s32.totalorder %v4631_v35, 16 }
  0x85   :  { %vm4976_vm4 = vmpackc.low %vm7922_vm8, %vm7912_vm14  ;;  %vm7929_vm12 = vcmp.lt.s32.totalorder %v4583_v9, 112  ;;  %vm7932_vm8 = vcmask 1043456   ;;  %vm7934_vm0 = vcmp.ge.s32.totalorder %v36_v10, 0  ;;  %v543_v28 = vpack.c.bf16 %v523_v52, %v523_v52 }
  0x86   :  { %v7924_v29 = vsel %vm4976_vm4, 4294967295, %v7923_v29  ;;  %vm4984_vm11 = vmand %vm4921_vm1, %vm7926_vm15  ;;  %v484_v50 = vsel %vm7929_vm12, %v3733_v39, %v3737_v62  ;;  %v557_v3 = vsel %vm7932_vm8, %v540_v8, 0  ;;  %vm7933_vm4 = vcmp.lt.s32.totalorder %v36_v10, 16 }
  0x87   :  { %7925 = vst [vmem:[#allocation30_spill] sm:$0xff] %v7924_v29  ;;  %v7928_v63 = vsel %vm4984_vm11, 4294967295, %v7927_v63  ;;  %vm7930_vm7 = vmmov %vm7929_vm12  ;;  %v542_v44 = vpack.c.bf16 %v522_v58, %v522_v58  ;;  %v3228_v25 = vpack.c.bf16 %v484_v50, %v459_v5  ;;  %v7941_v8 = vmov 0 }
  0x88   :  { %v485_v46 = vsel %vm7930_vm7, %v3732_v37, %v3733_v39  ;;  %vm7931_vm2 = vmmov %vm7930_vm7  ;;  %vm7939_vm7 = vcmp.lt.s32.totalorder %v4842_v12, 16  ;;  %v3748_v39 = vunpack.i.h.bf16 %v3746_v33  ;;  %v3747_v10 = vunpack.i.l.bf16 %v3746_v33 }
  0x89   :  { %v486_v51 = vsel %vm7931_vm2, %v3738_v7, %v3732_v37  ;;  %vm4997_vm3 = vmand %vm7934_vm0, %vm7933_vm4  ;;  %vm7940_vm2 = vcmp.ge.s32.totalorder %v4842_v12, 0  ;;  %v3743_v37 = vunpack.i.h.bf16 %v3741_v47  ;;  %v3742_v23 = vunpack.i.l.bf16 %v3741_v47 }
  0x8a   :  { %v7936_v36 = vsel %vm4997_vm3, 4294967295, %v7935_v36  ;;  %vm7938_vm1 = vmmov %vm7932_vm8  ;;  %v3254_v19 = vpack.c.bf16 %v486_v51, %v461_v24  ;;  %vm7947_vm8 = vcmp.lt.s32.totalorder %v4583_v9, 113  ;;  %v7951_v47 = vmov 0  ;;  %v3751_v24 = vpop.permute.xlu0 %3750 }
  0x8b   :  { %7937 = vst [vmem:[#allocation31_spill] sm:$0xff] %v7936_v36  ;;  %3226 = vmatprep.subr.msk.bf16.mxu0 %vm7938_vm1, %v541_v56  ;;  %vm5006_vm15 = vmand %vm7940_vm2, %vm7939_vm7  ;;  %v7944_v56 = vmov 0  ;;  %v460_v58 = vsel %vm7947_vm8, %v3722_v13, %v3723_v45  ;;  %v563_v33 = vsel %vm7938_vm1, %v542_v44, 0  ;;  %vm7950_vm7 = vcmp.lt.s32.totalorder %v4648_v38, 16 }
  0x8c   :  { %v7942_v8 = vsel %vm5006_vm15, 4294967295, %v7941_v8  ;;  %575 = vmatpush1.bf16.msra.mxu0 %v557_v3  ;;  %vm5013_vm0 = vmpackc.low %vm4837_vm10, %vm7912_vm14  ;;  %v7953_v3 = vunpack.i.l.bf16 %v4859_v17  ;;  %v7958_v38 = vmov 0  ;;  %v7961_v17 = vmov 0 }
  0x8d   :  { %7943 = vst [vmem:[#allocation32_spill] sm:$0xff] %v7942_v8  ;;  %v7945_v56 = vsel %vm5013_vm0, 4294967295, %v7944_v56  ;;  %vm7948_vm4 = vmmov %vm7929_vm12  ;;  %3229 = vmatprep.subr.msk.bf16.mxu0 %vm4851_vm13, %v3228_v25  ;;  %v3231_v25 = vpack.c.bf16 %v485_v46, %v460_v58  ;;  %v7971_v46 = vmov 0  ;;  %v3753_v51 = vunpack.i.h.bf16 %v3751_v24 }
  0x8e   :  { %7946 = vst [vmem:[#allocation33_spill] sm:$0xff] %v7945_v56  ;;  %v483_v12 = vsel %vm7948_vm4, %v3737_v62, %v3738_v7  ;;  %vm7949_vm12 = vmmov %vm7938_vm1  ;;  %v3756_v62 = vpop.permute.xlu1 %3755 }
  0x8f   :  { %3252 = vmatprep.subr.msk.bf16.mxu1 %vm7949_vm12, %v543_v28  ;;  %vm5029_vm14 = vmand %vm4997_vm3, %vm7950_vm7  ;;  %vm7957_vm12 = vnez %v7875_v26  ;;  %v3752_v28 = vunpack.i.l.bf16 %v3751_v24 }
  0x90   :  { %v7952_v47 = vsel %vm5029_vm14, 4294967295, %v7951_v47  ;;  %vm7954_vm2 = vmmov %vm7947_vm8  ;;  %vm7955_vm8 = vcmp.lt.s32.totalorder %v4583_v9, 127  ;;  %616 = vmatpush1.bf16.msra.mxu1 %v563_v33  ;;  %3232 = vmatpush1.bf16.msk.msra.mxu0 %vm4894_vm6, %v3231_v25 }
  0x91   :  { %v458_v45 = vsel %vm7954_vm2, %v7953_v3, %v3728_v49  ;;  %v434_v13 = vsel %vm7955_vm8, %v3743_v37, %v3747_v10  ;;  %vm7956_vm4 = vmmov %vm7955_vm8  ;;  %vm7964_vm2 = vcmp.ge.s32.totalorder %v4614_v30, 0 }
  0x92   :  { %v436_v44 = vsel %vm7956_vm4, %v3748_v39, %v3742_v23  ;;  %vm5045_vm1 = vmpackc.low %vm4948_vm9, %vm7957_vm12  ;;  %v433_v5 = vsel %vm7956_vm4, %v3747_v10, %v3748_v39  ;;  %vm7968_vm9 = vnez %v7879_v42  ;;  %v3234_v52 = vpack.c.bf16 %v434_v13, %v4543_v1  ;;  %v3766_v58 = vpop.permute.xlu1 %3765 }
  0x93   :  { %v7959_v38 = vsel %vm5045_vm1, 4294967295, %v7958_v38  ;;  %vm5053_vm7 = vmpackc.low %vm4984_vm11, %vm4963_vm5  ;;  %3255 = vmatprep.subr.msk.bf16.mxu1 %vm7968_vm9, %v3254_v19  ;;  %v3260_v50 = vpack.c.bf16 %v436_v44, %v4555_v4  ;;  %vm7970_vm5 = vnez %v7836_v57  ;;  %v3758_v4 = vunpack.i.h.bf16 %v3756_v62 }
  0x94   :  { %7960 = vst [vmem:[#allocation34_spill] sm:$0xff] %v7959_v38  ;;  %v7962_v17 = vsel %vm5053_vm7, 4294967295, %v7961_v17  ;;  %vm5061_vm8 = vmand %vm5006_vm15, %vm7964_vm2  ;;  %vm7969_vm2 = vcmp.ge.s32.totalorder %v4678_v43, 0  ;;  %v3757_v19 = vunpack.i.l.bf16 %v3756_v62  ;;  %v7979_v39 = vmov 0 }
  0x95   :  { %7963 = vst [vmem:[#allocation35_spill] sm:$0xff] %v7962_v17  ;;  %vm7967_vm12 = vmmov %vm7956_vm4  ;;  %vm7974_vm4 = vnez %v7825_v53  ;;  %vm7983_vm9 = vcmp.ge.s32.totalorder %v4619_v32, 0  ;;  %v3767_v33 = vunpack.i.l.bf16 %v3766_v58  ;;  %v7992_v13 = vmov 0 }
  0x96   :  { %v435_v7 = vsel %vm7967_vm12, %v3742_v23, %v3743_v37  ;;  %vm5077_vm11 = vmand %vm7970_vm5, %vm7969_vm2  ;;  %v3257_v23 = vpack.c.bf16 %v483_v12, %v458_v45  ;;  %vm7973_vm12 = vcmp.ge.s32.totalorder %v4656_v40, 0  ;;  %vm7977_vm2 = vnez %v7895_v6  ;;  %v3761_v12 = vpop.permute.xlu0 %3760 }
  0x97   :  { %v7972_v46 = vsel %vm5077_vm11, 4294967295, %v7971_v46  ;;  %vm5087_vm10 = vmand %vm7974_vm4, %vm7973_vm12  ;;  %3235 = vmatprep.subr.msk.bf16.mxu0 %vm7977_vm2, %v3234_v52  ;;  %vm7978_vm5 = vcmp.lt.s32.totalorder %v4614_v30, 16  ;;  %vm7982_vm4 = vnez %v7907_v34  ;;  %v3237_v10 = vpack.c.bf16 %v435_v7, %v4538_v0 }
  0x98   :  { %vm5097_vm6 = vmand %vm5061_vm8, %vm7978_vm5  ;;  %3258 = vmatpush1.bf16.msk.msra.mxu1 %vm7982_vm4, %v3257_v23  ;;  %v3263_v37 = vpack.c.bf16 %v433_v5, %v4548_v2  ;;  %vm7984_vm2 = vnez %v7842_v59  ;;  %vm7987_vm5 = vnez %v7914_v41  ;;  %vm7988_vm12 = vcmp.lt.s32.totalorder %v4656_v40, 16  ;;  %v3776_v23 = vpop.permute.xlu1 %3775 }
  0x99   :  { %v7980_v39 = vsel %vm5097_vm6, 4294967295, %v7979_v39  ;;  %vm5110_vm13 = vmand %vm7984_vm2, %vm7983_vm9  ;;  %3261 = vmatprep.subr.msk.bf16.mxu1 %vm7987_vm5, %v3260_v50  ;;  %v7989_v0 = vmov 0  ;;  %v3768_v2 = vunpack.i.h.bf16 %v3766_v58  ;;  %v3763_v3 = vunpack.i.h.bf16 %v3761_v12 }
  0x9a   :  { %7981 = vst [vmem:[#allocation36_spill] sm:$0xff] %v7980_v39  ;;  %vm5121_vm4 = vmand %vm5087_vm10, %vm7988_vm12  ;;  %v3762_v45 = vunpack.i.l.bf16 %v3761_v12  ;;  %vm7991_vm9 = vnez %v7924_v29  ;;  %vm7995_vm10 = vcmp.lt.s32.totalorder %v4583_v9, 15  ;;  %v8000_v7 = vmov 0  ;;  %v3771_v1 = vpop.permute.xlu0 %3770 }
  0x9b   :  { %v7990_v0 = vsel %vm5121_vm4, 4294967295, %v7989_v0  ;;  %3238 = vmatpush1.bf16.msk.msra.mxu0 %vm7991_vm9, %v3237_v10  ;;  %vm5131_vm8 = vmpackc.low %vm5077_vm11, %vm5029_vm14  ;;  %v383_v44 = vsel %vm7995_vm10, %v3757_v19, %v3758_v4  ;;  %vm7999_vm9 = vcmp.lt.s32.totalorder %v4619_v32, 16  ;;  %vm8003_vm11 = vcmp.lt.s32.totalorder %v4583_v9, 1 }
  0x9c   :  { %v7993_v13 = vsel %vm5131_vm8, 4294967295, %v7992_v13  ;;  %vm7996_vm12 = vmmov %vm7995_vm10  ;;  %v408_v62 = vsel %vm8003_vm11, %v3767_v33, %v3768_v2  ;;  %3264 = vmatpush1.bf16.msk.msra.mxu1 %vm5013_vm0, %v3263_v37  ;;  %v8007_v32 = vmov 0  ;;  %v8012_v10 = vmov 0 }
  0x9d   :  { %7994 = vst [vmem:[#allocation37_spill] sm:$0xff] %v7993_v13  ;;  %v384_v25 = vsel %vm7996_vm12, %v3753_v51, %v3757_v19  ;;  %vm7997_vm5 = vmmov %vm7995_vm10  ;;  %v3266_v19 = vpack.c.bf16 %v408_v62, %v383_v44  ;;  %v3778_v37 = vunpack.i.h.bf16 %v3776_v23  ;;  %v3777_v30 = vunpack.i.l.bf16 %v3776_v23 }
  0x9e   :  { %v385_v49 = vsel %vm7997_vm5, %v3752_v28, %v3753_v51  ;;  %vm7998_vm3 = vmmov %vm7997_vm5  ;;  %v3773_v58 = vunpack.i.h.bf16 %v3771_v1  ;;  %v3772_v12 = vunpack.i.l.bf16 %v3771_v1 }
  0x9f   :  { %v386_v5 = vsel %vm7998_vm3, %v3758_v4, %v3752_v28  ;;  %vm5147_vm14 = vmand %vm5110_vm13, %vm7999_vm9  ;;  %vm8010_vm3 = vcmp.ge.s32.totalorder %v4631_v35, 0  ;;  %3267 = vmatprep.subr.msk.bf16.mxu1 %vm5053_vm7, %v3266_v19  ;;  %v8040_v19 = vmov 0 }
  0xa0   :  { %v8001_v7 = vsel %vm5147_vm14, 4294967295, %v8000_v7  ;;  %vm8004_vm10 = vmmov %vm8003_vm11  ;;  %vm8011_vm11 = vnez %v7870_v15 }
  0xa1   :  { %8002 = vst [vmem:[#allocation38_spill] sm:$0xff] %v8001_v7  ;;  %v409_v24 = vsel %vm8004_vm10, %v3763_v3, %v3767_v33  ;;  %vm8005_vm12 = vmmov %vm8004_vm10  ;;  %v3786_v33 = vpop.permute.xlu1 %3785 }
  0xa2   :  { %v410_v52 = vsel %vm8005_vm12, %v3762_v45, %v3763_v3  ;;  %vm8006_vm5 = vmmov %vm8004_vm10  ;;  %v3269_v28 = vpack.c.bf16 %v409_v24, %v384_v25  ;;  %vm8015_vm12 = vcmp.ge.s32.totalorder %v4656_v40, 0  ;;  %v3781_v3 = vpop.permute.xlu0 %3780  ;;  %v3787_v44 = vunpack.i.l.bf16 %v3786_v33 }
  0xa3   :  { %v411_v50 = vsel %vm8006_vm5, %v3768_v2, %v3762_v45  ;;  %vm5165_vm13 = vmpackc.low %vm5121_vm4, %vm5097_vm6  ;;  %v3240_v4 = vpack.c.bf16 %v410_v52, %v385_v49  ;;  %v8017_v2 = vmov 0  ;;  %v8022_v45 = vmov 0 }
  0xa4   :  { %v8008_v32 = vsel %vm5165_vm13, 4294967295, %v8007_v32  ;;  %v3243_v51 = vpack.c.bf16 %v411_v50, %v386_v5  ;;  %vm63_vm9 = vmand %vm8011_vm11, %vm8010_vm3  ;;  %3270 = vmatpush1.bf16.msk.msra.mxu1 %vm5165_vm13, %v3269_v28  ;;  %vm8021_vm3 = vnez %v7936_v36  ;;  %v3783_v25 = vunpack.i.h.bf16 %v3781_v3 }
  0xa5   :  { %8009 = vst [vmem:[#allocation39_spill] sm:$0xff] %v8008_v32  ;;  %vm5177_vm10 = vmpackc.low %vm7984_vm2, %vm5147_vm14  ;;  %3241 = vmatprep.subr.msk.bf16.mxu0 %vm5045_vm1, %v3240_v4  ;;  %vm8016_vm14 = vcmp.lt.s32.totalorder %v4631_v35, 16  ;;  %v3788_v35 = vunpack.i.h.bf16 %v3786_v33  ;;  %v3782_v49 = vunpack.i.l.bf16 %v3781_v3  ;;  %v8026_v5 = vmov 0 }
  0xa6   :  { %v8013_v10 = vsel %vm5177_vm10, 4294967295, %v8012_v10  ;;  %vm62_vm5 = vmand %vm5006_vm15, %vm8015_vm12  ;;  %3244 = vmatpush1.bf16.msk.msra.mxu0 %vm5131_vm8, %v3243_v51  ;;  %vm8020_vm12 = vcmp.ge.s32.totalorder %v4678_v43, 0  ;;  %vm8029_vm6 = vcmp.lt.s32.totalorder %v4583_v9, 17  ;;  %v8046_v33 = vmov 0   ;;  %v549_v3 = vpop.permute.xlu0 %548 }
  0xa7   :  { %8014 = vst [vmem:[#allocation40_spill] sm:$0xff] %v8013_v10  ;;  %vm5194_vm2 = vmand %vm63_vm9, %vm8016_vm14  ;;  %vm8025_vm14 = vcmp.lt.s32.totalorder %v4656_v40, 16  ;;  %v333_v62 = vsel %vm8029_vm6, %v3777_v30, %v3778_v37  ;;  %v8033_v40 = vmov 0 }
  0xa8   :  { %v8018_v2 = vsel %vm5194_vm2, 4294967295, %v8017_v2  ;;  %vm5205_vm4 = vmand %vm8021_vm3, %vm8020_vm12 }
  0xa9   :  { %8019 = vst [vmem:[#allocation41_spill] sm:$0xff] %v8018_v2  ;;  %v8023_v45 = vsel %vm5205_vm4, 4294967295, %v8022_v45  ;;  %vm5211_vm9 = vmand %vm62_vm5, %vm8025_vm14  ;;  %vm8036_vm14 = vcmp.lt.s32.totalorder %v4583_v9, 16 }
  0xaa   :  { %8024 = vst [vmem:[#allocation42_spill] sm:$0xff] %v8023_v45  ;;  %v8027_v5 = vsel %vm5211_vm9, 4294967295, %v8026_v5  ;;  %vm8030_vm13 = vmmov %vm8029_vm6  ;;  %v358_v50 = vsel %vm8036_vm14, %v3787_v44, %v3788_v35 }
  0xab   :  { %8028 = vst [vmem:[#allocation43_spill] sm:$0xff] %v8027_v5  ;;  %v334_v43 = vsel %vm8030_vm13, %v3773_v58, %v3777_v30  ;;  %vm8031_vm12 = vmmov %vm8029_vm6  ;;  %v3272_v28 = vpack.c.bf16 %v358_v50, %v333_v62  ;;  %v8043_v30 = vmov 0 }
  0xac   :  { %v335_v24 = vsel %vm8031_vm12, %v3772_v12, %v3773_v58  ;;  %vm8032_vm7 = vmmov %vm8029_vm6 }
  0xad   :  { %v336_v52 = vsel %vm8032_vm7, %v3778_v37, %v3772_v12  ;;  %vm5227_vm5 = vmpackc.low %vm8011_vm11, %vm5194_vm2  ;;  %v544_v12 = vld [vmem:[%s7512_s1] sm:$0xf]  ;;  %vm8055_vm2 = vnez %v7852_v61 }
  0xae   :  { %v8034_v40 = vsel %vm5227_vm5, 4294967295, %v8033_v40  ;;  %vm8037_vm6 = vmmov %vm8036_vm14  ;;  %3273 = vmatprep.subr.msk.bf16.mxu1 %vm5227_vm5, %v3272_v28 }
  0xaf   :  { %8035 = vst [vmem:[#allocation44_spill] sm:$0xff] %v8034_v40  ;;  %v359_v23 = vsel %vm8037_vm6, %v3783_v25, %v3787_v44  ;;  %vm8038_vm13 = vmmov %vm8037_vm6 }
  0xb0   :  { %v360_v1 = vsel %vm8038_vm13, %v3782_v49, %v3783_v25  ;;  %vm8039_vm12 = vmmov %vm8037_vm6  ;;  %v3275_v58 = vpack.c.bf16 %v359_v23, %v334_v43  ;;  %vm7643_vm6 = vcmask 588800  }
  0xb1   :  { %v361_v4 = vsel %vm8039_vm12, %v3788_v35, %v3782_v49  ;;  %vm5243_vm7 = vmpackc.low %vm8021_vm3, %vm5205_vm4  ;;  %v3246_v51 = vpack.c.bf16 %v360_v1, %v335_v24  ;;  %vm8056_vm4 = vnez %v7829_v55 }
  0xb2   :  { %v8041_v19 = vsel %vm5243_vm7, 4294967295, %v8040_v19  ;;  %v3249_v37 = vpack.c.bf16 %v361_v4, %v336_v52  ;;  %vm5251_vm14 = vmpackc.low %vm5006_vm15, %vm5211_vm9 }
  0xb3   :  { %8042 = vst [vmem:[#allocation45_spill] sm:$0xff] %v8041_v19  ;;  %v8044_v30 = vsel %vm5251_vm14, 4294967295, %v8043_v30  ;;  %3247 = vmatprep.subr.msk.bf16.mxu0 %vm5177_vm10, %v3246_v51  ;;  %3276 = vmatpush1.bf16.msk.msra.mxu1 %vm5251_vm14, %v3275_v58 }
  0xb4   :  { %8045 = vst [vmem:[#allocation46_spill] sm:$0xff] %v8044_v30  ;;  %3250 = vmatpush1.bf16.msk.msra.mxu0 %vm5243_vm7, %v3249_v37 }
  0xb6   :  { %3277 = vmatmul.mubr.msk.bf16.vlgmr.msra.gmra.mxu1 %vm7643_vm6, %v544_v12 }
  0xb7   :  { %3251 = vmatmul.mubr.msk.bf16.vlgmr.msra.gmra.mxu0 %vm7643_vm6, %v544_v12  ;;  %955 = vmatprep.mubr.bf16.mxu1 %v8046_v33 }
  0xb8   :  { %912 = vmatprep.mubr.bf16.mxu0 %v8046_v33 }
 0x176   :  { %v643_v44 = vpop.f32.mrf.mxu1 }
 0x177   :  { %v602_v35 = vpop.f32.mrf.mxu0  ;;  %v644_v25 = vadd.f32 %v643_v44, %v549_v3 }
 0x178   :  { %v645_v62 = vpop.f32.mrf.mxu1  ;;  %v603_v43 = vadd.f32 %v602_v35, %v549_v3 }
 0x179   :  { %v604_v49 = vpop.f32.mrf.mxu0  ;;  %v646_v52 = vadd.f32 %v645_v62, %v549_v3  ;;  %v668_v1 = vmul.f32 %v644_v25, %v644_v25 }
 0x17a   :  { %v605_v24 = vadd.f32 %v604_v49, %v549_v3  ;;  %v647_v23 = vpop.f32.mrf.mxu1  ;;  %v650_v33 = vmul.f32 %v603_v43, %v603_v43 }
 0x17b   :  { %v606_v50 = vpop.f32.mrf.mxu0  ;;  %v670_v4 = vadd.f32 %v646_v52, %v644_v25  ;;  %v669_v28 = vmul.f32 %v646_v52, %v646_v52 }
 0x17c   :  { %v652_v51 = vadd.f32 %v605_v24, %v603_v43  ;;  %v651_v37 = vmul.f32 %v605_v24, %v605_v24  ;;  %v648_v12 = vpop.f32.mrf.mxu1 }
 0x17d   :  { %v607_v58 = vpop.f32.mrf.mxu0  ;;  %671 = vadd.xlane.f32.xlu0 %v670_v4  ;;  %v673_v5 = vadd.f32 %v669_v28, %v668_v1 }
 0x17e   :  { %653 = vadd.xlane.f32.xlu1 %v652_v51  ;;  %v655_v2 = vadd.f32 %v651_v37, %v650_v33 }
 0x181   :  { %674 = vadd.xlane.f32.xlu0 %v673_v5 }
 0x182   :  { %656 = vadd.xlane.f32.xlu1 %v655_v2 }
 0x206   :  { %v672_v44 = vpop.xlane.xlu0 %671 }
 0x207   :  { %v654_v35 = vpop.xlane.xlu1 %653  ;;  %v676_v49 = vmul.f32 0.00390625, %v672_v44 }
 0x208   :  { %v658_v3 = vmul.f32 0.00390625, %v654_v35 }
 0x209   :  { %v678_v23 = vmul.f32 %v676_v49, %v676_v49  ;;  %v680_v1 = vsub.f32 %v644_v25, %v676_v49  ;;  %v681_v33 = vsub.f32 %v646_v52, %v676_v49  ;;  %v849_v49 = vld [vmem:[%s7513_s2 + $0x10] sm:$0xff] }
 0x20a   :  { %v675_v62 = vpop.xlane.xlu0 %674  ;;  %v660_v7 = vmul.f32 %v658_v3, %v658_v3  ;;  %v662_v2 = vsub.f32 %v603_v43, %v658_v3  ;;  %v663_v51 = vsub.f32 %v605_v24, %v658_v3 }
 0x20b   :  { %v657_v50 = vpop.xlane.xlu1 %656  ;;  %v677_v45 = vmul.f32 0.00390625, %v675_v62 }
 0x20c   :  { %v659_v8 = vmul.f32 0.00390625, %v657_v50 }
 0x20d   :  { %v679_v15 = vsub.f32 %v677_v45, %v678_v23 }
 0x20e   :  { %v661_v58 = vsub.f32 %v659_v8, %v660_v7 }
 0x20f   :  { %v682_v12 = vadd.f32 1e-05, %v679_v15 }
 0x210   :  { %v664_v4 = vadd.f32 1e-05, %v661_v58 }
 0x211   :  { %4440 = vrsqrt.f32 %v682_v12 }
 0x212   :  { %4442 = vrsqrt.f32 %v664_v4 }
 0x21e   :  { %v4441_v5 = vpop.eup %4440 }
 0x21f   :  { %v4443_v28 = vpop.eup %4442  ;;  %v684_v37 = vmul.f32 %v4441_v5, %v680_v1  ;;  %v685_v44 = vmul.f32 %v4441_v5, %v681_v33 }
 0x220   :  { %v666_v35 = vmul.f32 %v4443_v28, %v662_v2  ;;  %v667_v36 = vmul.f32 %v4443_v28, %v663_v51 }
 0x221   :  { %vm688_vm13 = vcmp.ge.f32.partialorder %v684_v37, 0.0  ;;  %vm689_vm12 = vcmp.ge.f32.partialorder %v685_v44, 0.0  ;;  %v692_v62 = vmul.f32 0.25, %v684_v37  ;;  %v693_v50 = vmul.f32 0.25, %v685_v44 }
 0x222   :  { %vm686_vm6 = vcmp.ge.f32.partialorder %v666_v35, 0.0  ;;  %vm687_vm9 = vcmp.ge.f32.partialorder %v667_v36, 0.0  ;;  %v690_v15 = vmul.f32 0.25, %v666_v35  ;;  %v691_v8 = vmul.f32 0.25, %v667_v36 }
 0x223   :  { %v5270_v7 = vsel %vm688_vm13, %v684_v37, %v692_v62  ;;  %v5272_v45 = vsel %vm689_vm12, %v685_v44, %v693_v50 }
 0x224   :  { %8047 = vst [vmem:[#allocation47_spill] sm:$0xff] %v5270_v7  ;;  %8048 = vst [vmem:[#allocation48_spill] sm:$0xff] %v5272_v45  ;;  %v5274_v25 = vsel %vm686_vm6, %v666_v35, %v690_v15  ;;  %v5276_v43 = vsel %vm687_vm9, %v667_v36, %v691_v8  ;;  %v3795_v24 = vpack.i.bf16 %v5272_v45, %v5270_v7  ;;  %v848_v36 = vld [vmem:[%s7513_s2 + $0x8] sm:$0xff]  ;;  %vm8051_vm9 = vcmp.lt.s32.totalorder %v4583_v9, 111 }
 0x225   :  { %8049 = vst [vmem:[#allocation49_spill] sm:$0xff] %v5274_v25  ;;  %8050 = vst [vmem:[#allocation50_spill] sm:$0xff] %v5276_v43  ;;  %v3790_v52 = vpack.i.bf16 %v5276_v43, %v5274_v25 }
 0x226   :  { %3796 = vrot.lane.b32.xlu0 %v3795_v24, %s4497_s21  ;;  %vm8052_vm6 = vmmov %vm8051_vm9 }
 0x227   :  { %3791 = vrot.lane.b32.xlu1 %v3790_v52, %s4497_s21  ;;  %vm8053_vm13 = vmmov %vm8052_vm6 }
 0x228   :  { %vm8054_vm12 = vmmov %vm8052_vm6 }
 0x22a   :  { %3811 = vrot.lane.b32.xlu0 %v3790_v52, %s4498_s22 }
 0x22b   :  { %3801 = vrot.lane.b32.xlu1 %v3790_v52, %s4496_s20 }
 0x22e   :  { %3821 = vrot.lane.b32.xlu0 %v3790_v52, %s4499_s0 }
 0x22f   :  { %3806 = vrot.lane.b32.xlu1 %v3795_v24, %s4496_s20 }
 0x232   :  { %3831 = vrot.lane.b32.xlu0 %v3790_v52, %s4500_s23 }
 0x233   :  { %3816 = vrot.lane.b32.xlu1 %v3795_v24, %s4498_s22 }
 0x236   :  { %3841 = vrot.lane.b32.xlu0 %v3790_v52, %s4501_s24 }
 0x237   :  { %3826 = vrot.lane.b32.xlu1 %v3795_v24, %s4499_s0 }
 0x23a   :  { %3851 = vrot.lane.b32.xlu0 %v3790_v52, %s4503_s25 }
 0x23b   :  { %3836 = vrot.lane.b32.xlu1 %v3795_v24, %s4500_s23 }
 0x23e   :  { %3861 = vrot.lane.b32.xlu0 %v3790_v52, %s4504_s26 }
 0x23f   :  { %3846 = vrot.lane.b32.xlu1 %v3795_v24, %s4501_s24 }
 0x242   :  { %852 = vperm.xlu0 %3789, %v848_v36  }
 0x243   :  { %3856 = vrot.lane.b32.xlu1 %v3795_v24, %s4503_s25 }
 0x247   :  { %3866 = vrot.lane.b32.xlu1 %v3795_v24, %s4504_s26 }
 0x24b   :  { %857 = vperm.xlu1 %3870, %v849_v49  }
 0x298   :  { %v3797_v3 = vpop.permute.xlu0 %3796 }
 0x299   :  { %v3799_v23 = vunpack.i.h.bf16 %v3797_v3  ;;  %v3798_v58 = vunpack.i.l.bf16 %v3797_v3  ;;  %v3792_v12 = vpop.permute.xlu1 %3791 }
 0x29a   :  { %v3794_v4 = vunpack.i.h.bf16 %v3792_v12  ;;  %v3793_v1 = vunpack.i.l.bf16 %v3792_v12 }
 0x29b   :  { %v818_v33 = vsel %vm8051_vm9, %v3798_v58, %v3799_v23  ;;  %vm8057_vm9 = vnez %v7847_v60 }
 0x29c   :  { %v819_v5 = vsel %vm8052_vm6, %v3794_v4, %v3798_v58  ;;  %v821_v2 = vsel %vm8053_vm13, %v3799_v23, %v3793_v1  ;;  %v3812_v51 = vpop.permute.xlu0 %3811  ;;  %v820_v28 = vsel %vm8054_vm12, %v3793_v1, %v3794_v4  ;;  %v824_v37 = vsel %vm8055_vm2, %v818_v33, 0.0 }
 0x29d   :  { %v3814_v44 = vunpack.i.h.bf16 %v3812_v51  ;;  %v3813_v35 = vunpack.i.l.bf16 %v3812_v51  ;;  %v3802_v62 = vpop.permute.xlu1 %3801  ;;  %v823_v50 = vsel %vm8056_vm4, %v819_v5, 0.0  ;;  %v825_v15 = vsel %vm8057_vm9, %v821_v2, 0.0 }
 0x29e   :  { %v3804_v8 = vunpack.i.h.bf16 %v3802_v62  ;;  %v3803_v24 = vunpack.i.l.bf16 %v3802_v62  ;;  %v843_v52 = vpack.c.bf16 %v823_v50, %v823_v50  ;;  %v845_v36 = vpack.c.bf16 %v825_v15, %v825_v15 }
 0x29f   :  { %vm8058_vm6 = vnez %v7805_v48  ;;  %v844_v3 = vpack.c.bf16 %v824_v37, %v824_v37  ;;  %vm8059_vm13 = vcmask 1043456   ;;  %vm8062_vm4 = vcmp.lt.s32.totalorder %v4583_v9, 112 }
 0x2a0   :  { %v822_v49 = vsel %vm8058_vm6, %v820_v28, 0.0  ;;  %3279 = vmatprep.subr.msk.bf16.mxu0 %vm8059_vm13, %v843_v52  ;;  %vm8060_vm12 = vmmov %vm8059_vm13  ;;  %v3822_v23 = vpop.permute.xlu0 %3821  ;;  %v804_v1 = vsel %vm8062_vm4, %v3813_v35, %v3814_v44  ;;  %vm8063_vm9 = vcmp.lt.s32.totalorder %v4583_v9, 113  ;;  %vm8069_vm13 = vcmp.lt.s32.totalorder %v4583_v9, 112 }
 0x2a1   :  { %3305 = vmatprep.subr.msk.bf16.mxu1 %vm8060_vm12, %v845_v36  ;;  %v842_v58 = vpack.c.bf16 %v822_v49, %v822_v49  ;;  %v3807_v12 = vpop.permute.xlu1 %3806  ;;  %vm8061_vm2 = vmmov %vm8060_vm12  ;;  %v788_v33 = vsel %vm8063_vm9, %v3803_v24, %v3804_v8  ;;  %v3824_v2 = vunpack.i.h.bf16 %v3822_v23  ;;  %v3823_v51 = vunpack.i.l.bf16 %v3822_v23 }
 0x2a2   :  { %v875_v4 = vsel %vm8061_vm2, %v844_v3, 0  ;;  %vm8064_vm15 = vmmov %vm8061_vm2  ;;  %v3809_v28 = vunpack.i.h.bf16 %v3807_v12  ;;  %v3808_v37 = vunpack.i.l.bf16 %v3807_v12  ;;  %v3284_v15 = vpack.c.bf16 %v804_v1, %v788_v33 }
 0x2a3   :  { %v869_v5 = vsel %vm8064_vm15, %v842_v58, 0  ;;  %930 = vmatpush1.bf16.msra.mxu1 %v875_v4  ;;  %vm8065_vm2 = vcmp.lt.s32.totalorder %v4583_v9, 127  ;;  %vm8066_vm4 = vmmov %vm8063_vm9 }
 0x2a4   :  { %887 = vmatpush1.bf16.msra.mxu0 %v869_v5  ;;  %v3832_v62 = vpop.permute.xlu0 %3831  ;;  %v772_v49 = vsel %vm8065_vm2, %v3823_v51, %v3824_v2  ;;  %v786_v3 = vsel %vm8066_vm4, %v3808_v37, %v3809_v28  ;;  %vm8067_vm9 = vmmov %vm8066_vm4  ;;  %vm8072_vm2 = vcmp.lt.s32.totalorder %v4583_v9, 1 }
 0x2a5   :  { %v3817_v50 = vpop.permute.xlu1 %3816  ;;  %v787_v58 = vsel %vm8067_vm9, %v3804_v8, %v3808_v37  ;;  %vm8068_vm15 = vmmov %vm8066_vm4  ;;  %v3834_v4 = vunpack.i.h.bf16 %v3832_v62  ;;  %v3833_v8 = vunpack.i.l.bf16 %v3832_v62  ;;  %vm8073_vm4 = vnez %v7867_v14 }
 0x2a6   :  { %v3819_v52 = vunpack.i.h.bf16 %v3817_v50  ;;  %v3818_v36 = vunpack.i.l.bf16 %v3817_v50  ;;  %v789_v23 = vsel %vm8068_vm15, %v3809_v28, %v3803_v24  ;;  %vm8070_vm12 = vmmov %vm8069_vm13  ;;  %vm8074_vm9 = vcmp.lt.s32.totalorder %v4583_v9, 127 }
 0x2a7   :  { %vm8071_vm6 = vmmov %vm8070_vm12  ;;  %v3290_v62 = vpack.c.bf16 %v772_v49, %v5274_v25 }
 0x2a8   :  { %v805_v12 = vsel %vm8069_vm13, %v3819_v52, %v3813_v35  ;;  %v802_v1 = vsel %vm8070_vm12, %v3818_v36, %v3819_v52  ;;  %v803_v33 = vsel %vm8071_vm6, %v3814_v44, %v3818_v36  ;;  %v3842_v5 = vpop.permute.xlu0 %3841  ;;  %vm8075_vm6 = vmmov %vm8074_vm9  ;;  %vm8077_vm13 = vnez %v7879_v42 }
 0x2a9   :  { %v3310_v50 = vpack.c.bf16 %v802_v1, %v786_v3  ;;  %v3844_v61 = vunpack.i.h.bf16 %v3842_v5  ;;  %v3843_v60 = vunpack.i.l.bf16 %v3842_v5  ;;  %v3827_v48 = vpop.permute.xlu1 %3826  ;;  %v3281_v55 = vpack.c.bf16 %v803_v33, %v787_v58  ;;  %vm8076_vm15 = vmmov %vm8075_vm6 }
 0x2aa   :  { %v3829_v37 = vunpack.i.h.bf16 %v3827_v48  ;;  %v3828_v59 = vunpack.i.l.bf16 %v3827_v48  ;;  %v3307_v24 = vpack.c.bf16 %v805_v12, %v789_v23  ;;  %vm8078_vm12 = vnez %v7888_v54 }
 0x2ab   :  { %v756_v28 = vsel %vm8072_vm2, %v3843_v60, %v3844_v61  ;;  %3282 = vmatprep.subr.msk.bf16.mxu0 %vm8073_vm4, %v3281_v55  ;;  %vm8079_vm2 = vnez %v7907_v34 }
 0x2ac   :  { %v773_v35 = vsel %vm8074_vm9, %v3829_v37, %v3823_v51  ;;  %v770_v44 = vsel %vm8075_vm6, %v3828_v59, %v3829_v37  ;;  %v771_v52 = vsel %vm8076_vm15, %v3824_v2, %v3828_v59  ;;  %3308 = vmatprep.subr.msk.bf16.mxu1 %vm8077_vm13, %v3307_v24  ;;  %3285 = vmatpush1.bf16.msk.msra.mxu0 %vm8078_vm12, %v3284_v15  ;;  %v3852_v48 = vpop.permute.xlu0 %3851  ;;  %vm8080_vm9 = vcmp.lt.s32.totalorder %v4583_v9, 15 }
 0x2ad   :  { %v3316_v55 = vpack.c.bf16 %v770_v44, %v5270_v7  ;;  %3311 = vmatpush1.bf16.msk.msra.mxu1 %vm8079_vm2, %v3310_v50  ;;  %v3837_v51 = vpop.permute.xlu1 %3836  ;;  %v3287_v36 = vpack.c.bf16 %v771_v52, %v5276_v43  ;;  %v740_v59 = vsel %vm8080_vm9, %v3833_v8, %v3834_v4  ;;  %v3854_v2 = vunpack.i.h.bf16 %v3852_v48 }
 0x2ae   :  { %v3853_v3 = vunpack.i.l.bf16 %v3852_v48  ;;  %v3313_v58 = vpack.c.bf16 %v773_v35, %v5272_v45  ;;  %v3839_v23 = vunpack.i.h.bf16 %v3837_v51  ;;  %v3838_v15 = vunpack.i.l.bf16 %v3837_v51 }
 0x2af   :  { %vm8081_vm6 = vnez %v7895_v6  ;;  %v3293_v49 = vpack.c.bf16 %v756_v28, %v740_v59  ;;  %vm8082_vm15 = vnez %v7914_v41  ;;  %vm8083_vm2 = vnez %v7924_v29 }
 0x2b0   :  { %3288 = vmatprep.subr.msk.bf16.mxu0 %vm8081_vm6, %v3287_v36  ;;  %3314 = vmatprep.subr.msk.bf16.mxu1 %vm8082_vm15, %v3313_v58  ;;  %v3862_v12 = vpop.permute.xlu0 %3861  ;;  %vm8084_vm9 = vcmp.lt.s32.totalorder %v4583_v9, 17  ;;  %vm8085_vm15 = vcmp.lt.s32.totalorder %v4583_v9, 15  ;;  %vm8089_vm12 = vcmp.lt.s32.totalorder %v4583_v9, 1 }
 0x2b1   :  { %3291 = vmatpush1.bf16.msk.msra.mxu0 %vm8083_vm2, %v3290_v62  ;;  %3317 = vmatpush1.bf16.msk.msra.mxu1 %vm5013_vm0, %v3316_v55  ;;  %v3864_v1 = vunpack.i.h.bf16 %v3862_v12  ;;  %v3863_v33 = vunpack.i.l.bf16 %v3862_v12  ;;  %v3847_v5 = vpop.permute.xlu1 %3846  ;;  %v708_v50 = vsel %vm8084_vm9, %v3853_v3, %v3854_v2  ;;  %v741_v28 = vsel %vm8085_vm15, %v3839_v23, %v3833_v8  ;;  %vm8086_vm2 = vmmov %vm8085_vm15 }
 0x2b2   :  { %3294 = vmatprep.subr.msk.bf16.mxu0 %vm5045_vm1, %v3293_v49  ;;  %v3849_v37 = vunpack.i.h.bf16 %v3847_v5  ;;  %v3848_v24 = vunpack.i.l.bf16 %v3847_v5  ;;  %v738_v35 = vsel %vm8086_vm2, %v3838_v15, %v3839_v23  ;;  %vm8087_vm6 = vmmov %vm8086_vm2  ;;  %vm8088_vm0 = vcmp.lt.s32.totalorder %v4583_v9, 16 }
 0x2b3   :  { %v739_v44 = vsel %vm8087_vm6, %v3834_v4, %v3838_v15  ;;  %v724_v52 = vsel %vm8088_vm0, %v3863_v33, %v3864_v1  ;;  %vm8090_vm1 = vmmov %vm8089_vm12  ;;  %vm8092_vm0 = vnez %v7962_v17  ;;  %vm8097_vm15 = vcmp.lt.s32.totalorder %v4583_v9, 16 }
 0x2b4   :  { %v757_v48 = vsel %vm8089_vm12, %v3849_v37, %v3843_v60  ;;  %v754_v62 = vsel %vm8090_vm1, %v3848_v24, %v3849_v37  ;;  %vm8091_vm9 = vmmov %vm8090_vm1  ;;  %v3299_v51 = vpack.c.bf16 %v724_v52, %v708_v50  ;;  %vm8093_vm1 = vnez %v8008_v32 }
 0x2b5   :  { %v755_v55 = vsel %vm8091_vm9, %v3844_v61, %v3848_v24  ;;  %v3296_v8 = vpack.c.bf16 %v757_v48, %v741_v28  ;;  %v3857_v59 = vpop.permute.xlu1 %3856  ;;  %v3319_v58 = vpack.c.bf16 %v754_v62, %v738_v35  ;;  %vm8094_vm12 = vcmp.lt.s32.totalorder %v4583_v9, 17  ;;  %vm8098_vm9 = vmmov %vm8097_vm15  ;;  %v8102_v62 = vld [vmem:[#allocation3_spill] sm:$0xff] }
 0x2b6   :  { %v3322_v36 = vpack.c.bf16 %v755_v55, %v739_v44  ;;  %v3859_v23 = vunpack.i.h.bf16 %v3857_v59  ;;  %v3858_v49 = vunpack.i.l.bf16 %v3857_v59  ;;  %vm8095_vm2 = vmmov %vm8094_vm12  ;;  %v305_v52 = vand.u32 1, %v4595_v20 }
 0x2b7   :  { %3297 = vmatpush1.bf16.msk.msra.mxu0 %vm5131_vm8, %v3296_v8  ;;  %3320 = vmatprep.subr.msk.bf16.mxu1 %vm8092_vm0, %v3319_v58  ;;  %vm8096_vm6 = vmmov %vm8095_vm2  ;;  %v299_v48 = vand.u32 1, %v4591_v18  ;;  %v307_v55 = vand.u32 1, %v8102_v62 }
 0x2b8   :  { %3300 = vmatprep.subr.msk.bf16.mxu0 %vm5177_vm10, %v3299_v51  ;;  %3323 = vmatpush1.bf16.msk.msra.mxu1 %vm8093_vm1, %v3322_v36  ;;  %v709_v15 = vsel %vm8094_vm12, %v3859_v23, %v3853_v3  ;;  %v706_v12 = vsel %vm8095_vm2, %v3858_v49, %v3859_v23  ;;  %v707_v5 = vsel %vm8096_vm6, %v3854_v2, %v3858_v49  ;;  %vm8099_vm10 = vmmov %vm8098_vm9  ;;  %v4431_v3 = vld [vmem:[%s7512_s1 + $0x8] ss:$8 sps:$4 sm:$0xff]   ;;  %vm8100_vm12 = vcmask 588800   ;;  %v8103_v51 = vld [vmem:[#allocation2_spill] sm:$0xff] }
 0x2b9   :  { %v3867_v60 = vpop.permute.xlu1 %3866  ;;  %vm8101_vm2 = vmmov %vm8100_vm12  ;;  %v296_v2 = vand.u32 1, %v4598_v22  ;;  %v298_v8 = vand.u32 1, %v8103_v51  ;;  %v8104_v36 = vld [vmem:[#allocation4_spill] sm:$0xff] }
 0x2ba   :  { %v3869_v61 = vunpack.i.h.bf16 %v3867_v60  ;;  %v3868_v4 = vunpack.i.l.bf16 %v3867_v60  ;;  %v306_v59 = vand.u32 1, %v8104_v36  ;;  %v5678_v41 = vadd.s32 2, %v8104_v36 }
 0x2bc   :  { %v725_v50 = vsel %vm8097_vm15, %v3869_v61, %v3863_v33  ;;  %v722_v37 = vsel %vm8098_vm9, %v3868_v4, %v3869_v61  ;;  %v723_v24 = vsel %vm8099_vm10, %v3864_v1, %v3868_v4  ;;  %v304_v1 = vand.u32 1, %v4616_v31 }
 0x2bd   :  { %v3302_v28 = vpack.c.bf16 %v725_v50, %v709_v15  ;;  %v3328_v35 = vpack.c.bf16 %v723_v24, %v707_v5  ;;  %v3325_v44 = vpack.c.bf16 %v722_v37, %v706_v12  ;;  %v297_v33 = vand.u32 1, %v4588_v16  ;;  %v853_v60 = vpop.permute.xlu0 %852 }
 0x2be   :  { %vm300_vm10 = vcmp.eq.s32.totalorder %v296_v2, 0  ;;  %vm308_vm6 = vcmp.eq.s32.totalorder %v304_v1, 0  ;;  %vm309_vm9 = vcmp.eq.s32.totalorder %v305_v52, 0  ;;  %v4506_v61 = vmov 0.0  }
 0x2bf   :  { %3303 = vmatpush1.bf16.msk.msra.mxu0 %vm5243_vm7, %v3302_v28  ;;  %3326 = vmatprep.subr.msk.bf16.mxu1 %vm5227_vm5, %v3325_v44  ;;  %vm5429_vm15 = vcmp.eq.s32.totalorder %v297_v33, 0  ;;  %vm5445_vm5 = vcmp.eq.s32.totalorder %v298_v8, 0 }
 0x2c0   :  { %3329 = vmatpush1.bf16.msk.msra.mxu1 %vm5251_vm14, %v3328_v35  ;;  %vm5437_vm14 = vcmp.eq.s32.totalorder %v307_v55, 0  ;;  %vm313_vm7 = vmand %vm5429_vm15, %vm309_vm9 }
 0x2c1   :  { %v5457_v24 = vsel %vm313_vm7, 1.0, %v4506_v61 }
 0x2c2   :  { %3304 = vmatmul.mubr.msk.bf16.vlgmr.msra.gmra.mxu0 %vm8100_vm12, %v4431_v3  ;;  %vm312_vm12 = vmand %vm300_vm10, %vm308_vm6  ;;  %vm5449_vm10 = vcmp.eq.s32.totalorder %v306_v59, 0 }
 0x2c3   :  { %3330 = vmatmul.mubr.msk.bf16.vlgmr.msra.gmra.mxu1 %vm8101_vm2, %v4431_v3  ;;  %vm5433_vm2 = vcmp.eq.s32.totalorder %v299_v48, 0  ;;  %v5443_v4 = vsel %vm312_vm12, 1.0, %v4506_v61  ;;  %vm314_vm15 = vmand %vm5445_vm5, %vm5449_vm10 }
 0x2c4   :  { %vm315_vm6 = vmand %vm5433_vm2, %vm5437_vm14  ;;  %v5471_v59 = vsel %vm314_vm15, 1.0, %v4506_v61  ;;  %vm7678_vm15 = vcmask 130048  }
 0x2c5   :  { %v5466_v1 = vsel %vm315_vm6, 1.0, %v4506_v61 }
 0x2c6   :  { %v858_v2 = vpop.permute.xlu1 %857 }
 0x382   :  { %v914_v15 = vpop.f32.mrf.mxu0 }
 0x383   :  { %v915_v50 = vadd.f32 %v914_v15, %v853_v60  ;;  %v957_v37 = vpop.f32.mrf.mxu1 }
 0x384   :  { %v916_v28 = vpop.f32.mrf.mxu0  ;;  %v958_v48 = vadd.f32 %v957_v37, %v853_v60 }
 0x385   :  { %v5460_v35 = vmul.f32 %v5443_v4, %v915_v50  ;;  %v917_v44 = vadd.f32 %v916_v28, %v853_v60  ;;  %v959_v3 = vpop.f32.mrf.mxu1 }
 0x386   :  { %v960_v33 = vadd.f32 %v959_v3, %v853_v60  ;;  %v918_v52 = vpop.f32.mrf.mxu0  ;;  %v5483_v61 = vmul.f32 %v5471_v59, %v958_v48 }
 0x387   :  { %v5469_v55 = vmul.f32 %v5457_v24, %v917_v44  ;;  %v961_v8 = vpop.f32.mrf.mxu1  ;;  %v919_v58 = vadd.f32 %v918_v52, %v858_v2  ;;  %v974_v49 = vmul.f32 %v5460_v35, %v5460_v35 }
 0x388   :  { %v920_v23 = vpop.f32.mrf.mxu0  ;;  %v5476_v15 = vmul.f32 %v5466_v1, %v960_v33  ;;  %v962_v28 = vadd.f32 %v961_v8, %v858_v2 }
 0x389   :  { %v921_v12 = vadd.f32 %v920_v23, %v858_v2  ;;  %v963_v5 = vpop.f32.mrf.mxu1  ;;  %v978_v50 = vadd.f32 %v5469_v55, %v5460_v35  ;;  %v975_v60 = vmul.f32 %v5469_v55, %v5469_v55  ;;  %v5489_v33 = vmul.f32 %v5443_v4, %v919_v58 }
 0x38a   :  { %v964_v37 = vadd.f32 %v963_v5, %v858_v2  ;;  %v1014_v23 = vadd.f32 %v5476_v15, %v5483_v61  ;;  %v5497_v5 = vmul.f32 %v5471_v59, %v962_v28  ;;  %v1011_v48 = vmul.f32 %v5476_v15, %v5476_v15 }
 0x38b   :  { %v5486_v44 = vmul.f32 %v5457_v24, %v921_v12  ;;  %979 = vadd.xlane.f32.xlu0 %v978_v50  ;;  %v984_v3 = vadd.f32 %v975_v60, %v974_v49  ;;  %v1010_v58 = vmul.f32 %v5483_v61, %v5483_v61  ;;  %v976_v50 = vmul.f32 %v5489_v33, %v5489_v33 }
 0x38c   :  { %v5492_v52 = vmul.f32 %v5466_v1, %v964_v37  ;;  %v1012_v28 = vmul.f32 %v5497_v5, %v5497_v5 }
 0x38d   :  { %985 = vadd.xlane.f32.xlu1 %v984_v3  ;;  %v981_v2 = vadd.f32 %v5486_v44, %v5489_v33  ;;  %v977_v49 = vmul.f32 %v5486_v44, %v5486_v44  ;;  %v1020_v12 = vadd.f32 %v1011_v48, %v1010_v58 }
 0x38e   :  { %v1017_v8 = vadd.f32 %v5492_v52, %v5497_v5  ;;  %v1013_v37 = vmul.f32 %v5492_v52, %v5492_v52 }
 0x38f   :  { %1015 = vadd.xlane.f32.xlu0 %v1014_v23  ;;  %v987_v60 = vadd.f32 %v977_v49, %v976_v50 }
 0x390   :  { %v1023_v3 = vadd.f32 %v1013_v37, %v1012_v28 }
 0x391   :  { %982 = vadd.xlane.f32.xlu1 %v981_v2 }
 0x393   :  { %1018 = vadd.xlane.f32.xlu0 %v1017_v8 }
 0x395   :  { %1021 = vadd.xlane.f32.xlu1 %v1020_v12 }
 0x397   :  { %988 = vadd.xlane.f32.xlu0 %v987_v60 }
 0x39b   :  { %1024 = vadd.xlane.f32.xlu0 %v1023_v3 }
 0x414   :  { %v980_v23 = vpop.xlane.xlu0 %979 }
 0x415   :  { %v990_v2 = vmul.f32 0.015625, %v980_v23 }
 0x416   :  { %v986_v30 = vpop.xlane.xlu1 %985 }
 0x417   :  { %v994_v19 = vmul.f32 %v990_v2, %v990_v2  ;;  %v992_v8 = vmul.f32 0.015625, %v986_v30 }
 0x418   :  { %v1016_v48 = vpop.xlane.xlu0 %1015 }
 0x419   :  { %v996_v58 = vsub.f32 %v992_v8, %v994_v19  ;;  %v1026_v12 = vmul.f32 0.015625, %v1016_v48 }
 0x41a   :  { %v983_v40 = vpop.xlane.xlu1 %982 }
 0x41b   :  { %v1002_v10 = vadd.f32 1e-05, %v996_v58  ;;  %v991_v50 = vmul.f32 0.015625, %v983_v40  ;;  %v1030_v60 = vmul.f32 %v1026_v12, %v1026_v12 }
 0x41c   :  { %v1019_v49 = vpop.xlane.xlu0 %1018 }
 0x41d   :  { %4444 = vrsqrt.f32 %v1002_v10  ;;  %v1027_v38 = vmul.f32 0.015625, %v1019_v49  ;;  %v995_v3 = vmul.f32 %v991_v50, %v991_v50  ;;  %v998_v10 = vsub.f32 %v5460_v35, %v990_v2 }
 0x41e   :  { %v1022_v32 = vpop.xlane.xlu1 %1021  ;;  %v1035_v35 = vsub.f32 %v5476_v15, %v1026_v12 }
 0x41f   :  { %v1028_v13 = vmul.f32 0.015625, %v1022_v32  ;;  %v1031_v19 = vmul.f32 %v1027_v38, %v1027_v38  ;;  %v999_v32 = vsub.f32 %v5469_v55, %v990_v2  ;;  %v1036_v55 = vsub.f32 %v5497_v5, %v1027_v38 }
 0x420   :  { %v989_v17 = vpop.xlane.xlu0 %988 }
 0x421   :  { %v1032_v37 = vsub.f32 %v1028_v13, %v1030_v60  ;;  %v993_v28 = vmul.f32 0.015625, %v989_v17  ;;  %v1034_v17 = vsub.f32 %v5483_v61, %v1026_v12  ;;  %v1037_v61 = vsub.f32 %v5492_v52, %v1027_v38 }
 0x423   :  { %v1038_v23 = vadd.f32 1e-05, %v1032_v37  ;;  %v997_v56 = vsub.f32 %v993_v28, %v995_v3 }
 0x424   :  { %v1025_v29 = vpop.xlane.xlu0 %1024 }
 0x425   :  { %4446 = vrsqrt.f32 %v1038_v23  ;;  %v1003_v30 = vadd.f32 1e-05, %v997_v56  ;;  %v1029_v8 = vmul.f32 0.015625, %v1025_v29  ;;  %v1000_v56 = vsub.f32 %v5489_v33, %v991_v50 }
 0x426   :  { %v1001_v29 = vsub.f32 %v5486_v44, %v991_v50 }
 0x427   :  { %4448 = vrsqrt.f32 %v1003_v30  ;;  %v1033_v48 = vsub.f32 %v1029_v8, %v1031_v19 }
 0x429   :  { %v1039_v58 = vadd.f32 1e-05, %v1033_v48 }
 0x42a   :  { %v4445_v40 = vpop.eup %4444 }
 0x42b   :  { %4450 = vrsqrt.f32 %v1039_v58  ;;  %v1006_v49 = vmul.f32 %v4445_v40, %v998_v10  ;;  %v1007_v13 = vmul.f32 %v4445_v40, %v999_v32 }
 0x42d   :  { %v1046_v37 = vmul.f32 %v5443_v4, %v1006_v49  ;;  %v1047_v23 = vmul.f32 %v5457_v24, %v1007_v13 }
 0x42f   :  { %vm1054_vm5 = vcmp.ge.f32.partialorder %v1046_v37, 0.0  ;;  %vm1055_vm7 = vcmp.ge.f32.partialorder %v1047_v23, 0.0  ;;  %v1063_v33 = vmul.f32 0.25, %v1047_v23  ;;  %v1062_v48 = vmul.f32 0.25, %v1046_v37 }
 0x431   :  { %v5531_v32 = vsel %vm1055_vm7, %v1047_v23, %v1063_v33 }
 0x432   :  { %v4447_v60 = vpop.eup %4446 }
 0x433   :  { %v1042_v28 = vmul.f32 %v4447_v60, %v1034_v17  ;;  %v1043_v58 = vmul.f32 %v4447_v60, %v1035_v35 }
 0x434   :  { %v4449_v3 = vpop.eup %4448 }
 0x435   :  { %v1008_v30 = vmul.f32 %v4449_v3, %v1000_v56  ;;  %v1009_v19 = vmul.f32 %v4449_v3, %v1001_v29  ;;  %v1048_v2 = vmul.f32 %v5471_v59, %v1042_v28  ;;  %v1049_v17 = vmul.f32 %v5466_v1, %v1043_v58  ;;  %v1445_v58 = vld [vmem:[%s7513_s2 + $0x20] sm:$0xff] }
 0x436   :  { %v5539_v56 = vsel %vm1054_vm5, %v1046_v37, %v1062_v48  ;;  %v1444_v48 = vld [vmem:[%s7513_s2 + $0x18] sm:$0xff] }
 0x437   :  { %v1050_v44 = vmul.f32 %v5443_v4, %v1008_v30  ;;  %v1051_v50 = vmul.f32 %v5457_v24, %v1009_v19  ;;  %v1064_v5 = vmul.f32 0.25, %v1048_v2  ;;  %vm1056_vm12 = vcmp.ge.f32.partialorder %v1048_v2, 0.0 }
 0x438   :  { %v4451_v8 = vpop.eup %4450  ;;  %v1065_v37 = vmul.f32 0.25, %v1049_v17  ;;  %vm1057_vm6 = vcmp.ge.f32.partialorder %v1049_v17, 0.0 }
 0x439   :  { %v1044_v40 = vmul.f32 %v4451_v8, %v1036_v55  ;;  %v1045_v10 = vmul.f32 %v4451_v8, %v1037_v61  ;;  %vm1058_vm14 = vcmp.ge.f32.partialorder %v1050_v44, 0.0  ;;  %vm1059_vm9 = vcmp.ge.f32.partialorder %v1051_v50, 0.0 }
 0x43a   :  { %v1066_v15 = vmul.f32 0.25, %v1050_v44  ;;  %v1067_v12 = vmul.f32 0.25, %v1051_v50  ;;  %v5545_v23 = vsel %vm1056_vm12, %v1048_v2, %v1064_v5  ;;  %v5553_v55 = vsel %vm1057_vm6, %v1049_v17, %v1065_v37 }
 0x43b   :  { %v1052_v38 = vmul.f32 %v5471_v59, %v1044_v40  ;;  %v1053_v52 = vmul.f32 %v5466_v1, %v1045_v10  ;;  %v257_v40 = vadd.s32 2, %v4588_v16  ;;  %v256_v10 = vadd.s32 2, %v4598_v22 }
 0x43c   :  { %v5533_v49 = vsel %vm1059_vm9, %v1051_v50, %v1067_v12  ;;  %v5535_v13 = vsel %vm1058_vm14, %v1050_v44, %v1066_v15  ;;  %v4432_v50 = vld [vmem:[%s7512_s1 + $0x1c] ss:$8 sps:$4 sm:$0xff]   ;;  %v259_v15 = vadd.s32 2, %v4591_v18  ;;  %v258_v12 = vadd.s32 2, %v8103_v51 }
 0x43d   :  { %vm1060_vm2 = vcmp.ge.f32.partialorder %v1052_v38, 0.0  ;;  %v1068_v60 = vmul.f32 0.25, %v1052_v38  ;;  %v3876_v29 = vpack.i.bf16 %v5533_v49, %v5531_v32  ;;  %v3871_v28 = vpack.i.bf16 %v5535_v13, %v5539_v56  ;;  %3381 = vmatprep.mubr.msk.bf16.mxu0 %vm7678_vm15, %v4432_v50  ;;  %3430 = vmatprep.mubr.msk.bf16.mxu1 %vm7678_vm15, %v4432_v50 }
 0x43e   :  { %v1069_v3 = vmul.f32 0.25, %v1053_v52  ;;  %vm1061_vm10 = vcmp.ge.f32.partialorder %v1053_v52, 0.0  ;;  %vm261_vm5 = vcmp.ge.s32.totalorder %v257_v40, 0  ;;  %vm265_vm7 = vcmp.lt.s32.totalorder %v257_v40, 16 }
 0x43f   :  { %v5547_v30 = vsel %vm1060_vm2, %v1052_v38, %v1068_v60  ;;  %3877 = vrot.lane.b32.xlu0 %v3876_v29, %s4507_s10  ;;  %3872 = vrot.lane.b32.xlu1 %v3871_v28, %s4507_s10  ;;  %v5581_v5 = vadd.s32 4294967294, %v4595_v20  ;;  %vm260_vm14 = vcmp.ge.s32.totalorder %v256_v10, 0  ;;  %vm264_vm9 = vcmp.lt.s32.totalorder %v256_v10, 16  ;;  %vm5583_vm12 = vmand %vm261_vm5, %vm265_vm7 }
 0x440   :  { %v3881_v19 = vpack.i.bf16 %v5547_v30, %v5545_v23  ;;  %v5551_v35 = vsel %vm1061_vm10, %v1053_v52, %v1069_v3  ;;  %v8115_v38 = vmov 0  ;;  %vm263_vm2 = vcmp.ge.s32.totalorder %v259_v15, 0  ;;  %vm5593_vm1 = vmand %vm260_vm14, %vm264_vm9 }
 0x441   :  { %v3886_v61 = vpack.i.bf16 %v5551_v35, %v5553_v55  ;;  %v8116_v38 = vsel %vm5583_vm12, 4294967295, %v8115_v38  ;;  %vm267_vm10 = vcmp.lt.s32.totalorder %v259_v15, 16  ;;  %v5588_v52 = vadd.s32 4294967294, %v8102_v62 }
 0x442   :  { %vm262_vm6 = vcmp.ge.s32.totalorder %v258_v12, 0  ;;  %vm266_vm15 = vcmp.lt.s32.totalorder %v258_v12, 16  ;;  %v5591_v17 = vadd.s32 4294967294, %v4616_v31  ;;  %v8117_v60 = vmov 0  ;;  %vm5601_vm7 = vmand %vm263_vm2, %vm267_vm10 }
 0x443   :  { %3892 = vrot.lane.b32.xlu0 %v3871_v28, %s4508_s11  ;;  %3882 = vrot.lane.b32.xlu1 %v3881_v19, %s4507_s10  ;;  %v8118_v60 = vsel %vm5593_vm1, 4294967295, %v8117_v60  ;;  %vm7680_vm8 = vcmp.ge.s32.totalorder %v5581_v5, 0  ;;  %vm5605_vm0 = vmand %vm262_vm6, %vm266_vm15  ;;  %vm7681_vm14 = vcmp.ge.s32.totalorder %v5588_v52, 0  ;;  %v5611_v37 = vadd.s32 4294967294, %v8104_v36 }
 0x444   :  { %vm7682_vm9 = vcmp.lt.s32.totalorder %v5581_v5, 16  ;;  %vm5618_vm2 = vmand %vm5583_vm12, %vm7680_vm8  ;;  %v5624_v50 = vadd.s32 2, %v4595_v20  ;;  %v8125_v12 = vmov 0  ;;  %v8128_v44 = vmov 0 }
 0x445   :  { %vm275_vm15 = vmand %vm5601_vm7, %vm7681_vm14  ;;  %vm8127_vm14 = vcmp.ge.s32.totalorder %v5591_v17, 0  ;;  %vm8132_vm8 = vcmp.lt.s32.totalorder %v5588_v52, 16  ;;  %v5675_v2 = vadd.s32 2, %v8102_v62 }
 0x446   :  { %vm5647_vm6 = vmand %vm5618_vm2, %vm7682_vm9  ;;  %vm8130_vm2 = vcmp.lt.s32.totalorder %v4583_v9, 96  ;;  %vm8137_vm4 = vcmp.ge.s32.totalorder %v5624_v50, 0 }
 0x447   :  { %3902 = vrot.lane.b32.xlu0 %v3881_v19, %s4508_s11  ;;  %3887 = vrot.lane.b32.xlu1 %v3886_v61, %s4507_s10  ;;  %v8126_v12 = vsel %vm5647_vm6, 4294967295, %v8125_v12  ;;  %vm5656_vm5 = vmand %vm5593_vm1, %vm8127_vm14  ;;  %vm7703_vm6 = vcmp.ge.s32.totalorder %v5675_v2, 0 }
 0x448   :  { %v8129_v44 = vsel %vm5656_vm5, 4294967295, %v8128_v44  ;;  %vm8131_vm9 = vmmov %vm8130_vm2 }
 0x449   :  { %vm5670_vm13 = vmand %vm275_vm15, %vm8132_vm8  ;;  %vm7696_vm8 = vcmp.lt.s32.totalorder %v5611_v37, 16  ;;  %vm8136_vm15 = vcmp.ge.s32.totalorder %v5611_v37, 0 }
 0x44a   :  { %vm8135_vm14 = vmmov %vm8130_vm2 }
 0x44b   :  { %3912 = vrot.lane.b32.xlu0 %v3871_v28, %s4509_s12  ;;  %3897 = vrot.lane.b32.xlu1 %v3876_v29, %s4508_s11  ;;  %vm274_vm10 = vmand %vm5605_vm0, %vm8136_vm15  ;;  %vm8163_vm15 = vcmp.ge.s32.totalorder %v5678_v41, 0 }
 0x44c   :  { %vm5715_vm3 = vmand %vm274_vm10, %vm7696_vm8 }
 0x44d   :  { %vm8145_vm5 = vmmov %vm8131_vm9 }
 0x44e   :  { %vm8148_vm10 = vmmov %vm8145_vm5 }
 0x44f   :  { %3922 = vrot.lane.b32.xlu0 %v3881_v19, %s4509_s12  ;;  %3907 = vrot.lane.b32.xlu1 %v3886_v61, %s4508_s11  ;;  %vm8149_vm8 = vmpackc.low %vm5593_vm1, %vm5593_vm1 }
 0x453   :  { %3932 = vrot.lane.b32.xlu0 %v3871_v28, %s4510_s13  ;;  %3917 = vrot.lane.b32.xlu1 %v3876_v29, %s4509_s12 }
 0x457   :  { %3942 = vrot.lane.b32.xlu0 %v3881_v19, %s4510_s13  ;;  %3927 = vrot.lane.b32.xlu1 %v3886_v61, %s4509_s12 }
 0x45b   :  { %3952 = vrot.lane.b32.xlu0 %v3871_v28, %s4511_s14  ;;  %3937 = vrot.lane.b32.xlu1 %v3876_v29, %s4510_s13 }
 0x45f   :  { %3962 = vrot.lane.b32.xlu0 %v3881_v19, %s4511_s14  ;;  %3947 = vrot.lane.b32.xlu1 %v3886_v61, %s4510_s13 }
 0x463   :  { %3972 = vrot.lane.b32.xlu0 %v3871_v28, %s4512_s15  ;;  %3957 = vrot.lane.b32.xlu1 %v3876_v29, %s4511_s14 }
 0x467   :  { %3982 = vrot.lane.b32.xlu0 %v3881_v19, %s4512_s15  ;;  %3967 = vrot.lane.b32.xlu1 %v3886_v61, %s4511_s14 }
 0x46b   :  { %3992 = vrot.lane.b32.xlu0 %v3871_v28, %s4513_s16  ;;  %3977 = vrot.lane.b32.xlu1 %v3876_v29, %s4512_s15 }
 0x46f   :  { %4002 = vrot.lane.b32.xlu0 %v3881_v19, %s4513_s16  ;;  %3987 = vrot.lane.b32.xlu1 %v3886_v61, %s4512_s15 }
 0x473   :  { %4012 = vrot.lane.b32.xlu0 %v3871_v28, %s4514_s17  ;;  %3997 = vrot.lane.b32.xlu1 %v3876_v29, %s4513_s16 }
 0x477   :  { %4022 = vrot.lane.b32.xlu0 %v3881_v19, %s4514_s17  ;;  %4007 = vrot.lane.b32.xlu1 %v3886_v61, %s4513_s16  ;;  %v8121_v19 = vmov 0 }
 0x478   :  { %v8122_v19 = vsel %vm5605_vm0, 4294967295, %v8121_v19 }
 0x47b   :  { %1448 = vperm.xlu0 %3789, %v1444_v48   ;;  %4017 = vrot.lane.b32.xlu1 %v3876_v29, %s4514_s17  ;;  %v8119_v29 = vmov 0 }
 0x47c   :  { %v8120_v29 = vsel %vm5601_vm7, 4294967295, %v8119_v29 }
 0x47f   :  { %4027 = vrot.lane.b32.xlu1 %v3886_v61, %s4514_s17  ;;  %v5662_v61 = vadd.s32 2, %v4616_v31 }
 0x483   :  { %1453 = vperm.xlu1 %3870, %v1445_v58  }
 0x4b1   :  { %v3878_v28 = vpop.permute.xlu0 %3877  ;;  %v3873_v3 = vpop.permute.xlu1 %3872 }
 0x4b2   :  { %v3880_v48 = vunpack.i.h.bf16 %v3878_v28  ;;  %v3879_v58 = vunpack.i.l.bf16 %v3878_v28  ;;  %v3875_v40 = vunpack.i.h.bf16 %v3873_v3  ;;  %v3874_v10 = vunpack.i.l.bf16 %v3873_v3 }
 0x4b4   :  { %v1346_v33 = vsel %vm8130_vm2, %v3875_v40, %v3880_v48  ;;  %v1345_v8 = vsel %vm8131_vm9, %v3874_v10, %v3879_v58  ;;  %vm8164_vm9 = vnez %v7825_v53 }
 0x4b5   :  { %v5638_v20 = vpop.permute.xlu0 %3892  ;;  %v3883_v15 = vpop.permute.xlu1 %3882  ;;  %v3337_v54 = vpack.c.bf16 %v1346_v33, %v1345_v8 }
 0x4b6   :  { %v3885_v28 = vunpack.i.h.bf16 %v3883_v15  ;;  %v3884_v3 = vunpack.i.l.bf16 %v3883_v15 }
 0x4b8   :  { %v1344_v31 = vsel %vm8135_vm14, %v3880_v48, %v3885_v28  ;;  %v1343_v6 = vsel %vm8130_vm2, %v3879_v58, %v3884_v3  ;;  %v8138_v48 = vld [vmem:[#allocation9_spill] sm:$0xff]  ;;  %vm8142_vm14 = vmpackc.low %vm5583_vm12, %vm5583_vm12 }
 0x4b9   :  { %v5692_v62 = vpop.permute.xlu0 %3902  ;;  %v3888_v36 = vpop.permute.xlu1 %3887  ;;  %v3334_v34 = vpack.c.bf16 %v1344_v31, %v1343_v6  ;;  %vm8139_vm2 = vnez %v8138_v48  ;;  %vm8146_vm12 = vmmov %vm8145_vm5 }
 0x4ba   :  { %vm5699_vm11 = vmand %vm8139_vm2, %vm8137_vm4  ;;  %v3890_v42 = vunpack.i.h.bf16 %v3888_v36  ;;  %v3889_v14 = vunpack.i.l.bf16 %v3888_v36  ;;  %vm7707_vm4 = vcmp.lt.s32.totalorder %v4583_v9, 98  ;;  %v8155_v36 = vmov 0 }
 0x4bb   :  { %3335 = vmatprep.subr.msk.bf16.mxu0 %vm8142_vm14, %v3334_v34  ;;  %vm8147_vm14 = vmmov %vm8145_vm5  ;;  %v3905_v58 = vunpack.i.h.bf16 %v5692_v62  ;;  %v3904_v25 = vunpack.i.l.bf16 %v5692_v62  ;;  %v177_v62 = vadd.s32 4294967294, %v4588_v16 }
 0x4bc   :  { %v1341_v8 = vsel %vm8145_vm5, %v3884_v3, %v3889_v14  ;;  %v1342_v34 = vsel %vm8146_vm12, %v3885_v28, %v3890_v42  ;;  %v1347_v33 = vsel %vm8147_vm14, %v3889_v14, %v3874_v10  ;;  %v1348_v31 = vsel %vm8148_vm10, %v3890_v42, %v3875_v40  ;;  %3338 = vmatpush1.bf16.msk.msra.mxu0 %vm8149_vm8, %v3337_v54 }
 0x4bd   :  { %vm8150_vm5 = vcmp.lt.s32.totalorder %v5624_v50, 16  ;;  %v8151_v28 = vmov 0  ;;  %v3895_v14 = vunpack.i.h.bf16 %v5638_v20  ;;  %v3894_v42 = vunpack.i.l.bf16 %v5638_v20  ;;  %v5748_v10 = vpop.permute.xlu0 %3912  ;;  %v3898_v54 = vpop.permute.xlu1 %3897  ;;  %v8157_v20 = vld [vmem:[#allocation11_spill] sm:$0xff] }
 0x4be   :  { %vm5742_vm12 = vmand %vm5699_vm11, %vm8150_vm5  ;;  %v3386_v40 = vpack.c.bf16 %v1342_v34, %v1341_v8  ;;  %v3383_v3 = vpack.c.bf16 %v1348_v31, %v1347_v33  ;;  %vm8153_vm8 = vcmp.lt.s32.totalorder %v5662_v61, 16  ;;  %vm8154_vm14 = vnez %v7836_v57 }
 0x4bf   :  { %v8152_v28 = vsel %vm5742_vm12, 4294967295, %v8151_v28  ;;  %vm5754_vm10 = vmand %vm8154_vm14, %vm8153_vm8  ;;  %v3900_v43 = vunpack.i.h.bf16 %v3898_v54  ;;  %v3899_v7 = vunpack.i.l.bf16 %v3898_v54  ;;  %vm8158_vm11 = vnez %v8157_v20 }
 0x4c0   :  { %v8156_v36 = vsel %vm5754_vm10, 4294967295, %v8155_v36  ;;  %vm5764_vm5 = vmand %vm8158_vm11, %vm7703_vm6  ;;  %vm185_vm12 = vcmp.ge.s32.totalorder %v177_v62, 0 }
 0x4c1   :  { %vm8161_vm8 = vmpackc.low %vm5601_vm7, %vm5601_vm7  ;;  %v1303_v34 = vsel %vm7707_vm4, %v3900_v43, %v3905_v58  ;;  %v1305_v33 = vsel %vm7707_vm4, %v3895_v14, %v3900_v43  ;;  %v1302_v31 = vsel %vm7707_vm4, %v3899_v7, %v3904_v25  ;;  %v1304_v54 = vsel %vm7707_vm4, %v3894_v42, %v3899_v7  ;;  %v3923_v43 = vpop.permute.xlu0 %3922 }
 0x4c2   :  { %3384 = vmatprep.subr.msk.bf16.mxu1 %vm8161_vm8, %v3383_v3  ;;  %vm8162_vm8 = vmpackc.low %vm5605_vm0, %vm5605_vm0  ;;  %v3343_v16 = vpack.c.bf16 %v1305_v33, %v1304_v54  ;;  %v3908_v3 = vpop.permute.xlu1 %3907  ;;  %v3340_v45 = vpack.c.bf16 %v1303_v34, %v1302_v31  ;;  %vm8165_vm0 = vcmp.lt.s32.totalorder %v5675_v2, 16  ;;  %vm8171_vm4 = vnez %v8126_v12 }
 0x4c3   :  { %3387 = vmatpush1.bf16.msk.msra.mxu1 %vm8162_vm8, %v3386_v40  ;;  %vm250_vm7 = vmand %vm8164_vm9, %vm8163_vm15  ;;  %v3910_v40 = vunpack.i.h.bf16 %v3908_v3  ;;  %v3909_v39 = vunpack.i.l.bf16 %v3908_v3  ;;  %vm8168_vm15 = vcmp.ge.s32.totalorder %v5581_v5, 0  ;;  %vm189_vm9 = vcmp.lt.s32.totalorder %v177_v62, 16 }
 0x4c4   :  { %vm5805_vm8 = vmand %vm5764_vm5, %vm8165_vm0  ;;  %vm1258_vm0 = vcmp.lt.s32.totalorder %v4583_v9, 126  ;;  %vm8173_vm5 = vcmp.lt.s32.totalorder %v5678_v41, 16 }
 0x4c5   :  { %vm5813_vm6 = vmand %vm8139_vm2, %vm8168_vm15  ;;  %vm8176_vm2 = vcmp.lt.s32.totalorder %v4583_v9, 98  ;;  %v5847_v54 = vpop.permute.xlu0 %3932 }
 0x4c6   :  { %vm8172_vm1 = vmpackc.low %vm8171_vm4, %vm8171_vm4  ;;  %v1301_v48 = vsel %vm8176_vm2, %v3905_v58, %v3910_v40  ;;  %vm8180_vm4 = vnez %v8129_v44  ;;  %v3915_v58 = vunpack.i.h.bf16 %v5748_v10  ;;  %v3925_v44 = vunpack.i.h.bf16 %v3923_v43 }
 0x4c7   :  { %3341 = vmatprep.subr.msk.bf16.mxu0 %vm8172_vm1, %v3340_v45  ;;  %vm5825_vm10 = vmand %vm250_vm7, %vm8173_vm5 }
 0x4c8   :  { %vm8177_vm15 = vmmov %vm8176_vm2 }
 0x4c9   :  { %v1307_v33 = vsel %vm8177_vm15, %v3910_v40, %v3895_v14  ;;  %vm8178_vm11 = vmmov %vm8176_vm2  ;;  %v3914_v14 = vunpack.i.l.bf16 %v5748_v10 }
 0x4ca   :  { %v1300_v12 = vsel %vm8178_vm11, %v3904_v25, %v3909_v39  ;;  %vm8179_vm1 = vmmov %vm8176_vm2  ;;  %v3918_v25 = vpop.permute.xlu1 %3917  ;;  %vm8182_vm11 = vcmp.lt.s32.totalorder %v5581_v5, 16 }
 0x4cb   :  { %v1306_v45 = vsel %vm8179_vm1, %v3909_v39, %v3894_v42  ;;  %vm8181_vm7 = vmpackc.low %vm8180_vm4, %vm8180_vm4  ;;  %v3392_v31 = vpack.c.bf16 %v1301_v48, %v1300_v12  ;;  %v3924_v42 = vunpack.i.l.bf16 %v3923_v43  ;;  %v3919_v40 = vunpack.i.l.bf16 %v3918_v25  ;;  %v4434_v43 = vld [vmem:[%s7512_s1 + $0x18] ss:$8 sps:$4 sm:$0xff]  }
 0x4cc   :  { %3344 = vmatpush1.bf16.msk.msra.mxu0 %vm8181_vm7, %v3343_v16  ;;  %vm3394_vm5 = vmpackc.low %vm5805_vm8, %vm5805_vm8  ;;  %v3389_v3 = vpack.c.bf16 %v1307_v33, %v1306_v45  ;;  %v3920_v16 = vunpack.i.h.bf16 %v3918_v25  ;;  %vm8185_vm1 = vcmp.ge.s32.totalorder %v5591_v17, 0  ;;  %v3943_v33 = vpop.permute.xlu0 %3942 }
 0x4cd   :  { %vm5853_vm2 = vmand %vm5813_vm6, %vm8182_vm11  ;;  %v1261_v48 = vsel %vm1258_vm0, %v3919_v40, %v3924_v42  ;;  %v1263_v15 = vsel %vm1258_vm0, %v3914_v14, %v3919_v40  ;;  %v3945_v7 = vunpack.i.h.bf16 %v3943_v33 }
 0x4ce   :  { %vm5864_vm4 = vmand %vm8154_vm14, %vm8185_vm1  ;;  %v1262_v34 = vsel %vm1258_vm0, %v3920_v16, %v3925_v44  ;;  %v1264_v57 = vsel %vm1258_vm0, %v3915_v58, %v3920_v16  ;;  %vm8193_vm14 = vnez %v8157_v20  ;;  %v3928_v12 = vpop.permute.xlu1 %3927  ;;  %vm8194_vm1 = vcmp.ge.s32.totalorder %v5611_v37, 0 }
 0x4cf   :  { %vm8188_vm6 = vmpackc.low %vm5670_vm13, %vm5670_vm13  ;;  %v3349_v62 = vpack.c.bf16 %v1264_v57, %v1263_v15  ;;  %v3346_v45 = vpack.c.bf16 %v1262_v34, %v1261_v48  ;;  %v3930_v25 = vunpack.i.h.bf16 %v3928_v12  ;;  %v178_v16 = vadd.s32 4294967294, %v8103_v51 }
 0x4d0   :  { %3390 = vmatprep.subr.msk.bf16.mxu1 %vm8188_vm6, %v3389_v3  ;;  %vm5875_vm7 = vmand %vm185_vm12, %vm189_vm9  ;;  %vm8192_vm12 = vcmp.ge.s32.totalorder %v5588_v52, 0  ;;  %vm8195_vm6 = vnez %v7825_v53  ;;  %v3929_v3 = vunpack.i.l.bf16 %v3928_v12  ;;  %v176_v53 = vadd.s32 4294967294, %v4598_v22 }
 0x4d1   :  { %vm8191_vm13 = vmpackc.low %vm5715_vm3, %vm5715_vm3  ;;  %vm8198_vm3 = vcmp.ge.s32.totalorder %v5624_v50, 0  ;;  %v1260_v40 = vsel %vm1258_vm0, %v3925_v44, %v3930_v25  ;;  %v3935_v48 = vunpack.i.h.bf16 %v5847_v54  ;;  %v3934_v15 = vunpack.i.l.bf16 %v5847_v54 }
 0x4d2   :  { %3393 = vmatpush1.bf16.msk.msra.mxu1 %vm8191_vm13, %v3392_v31  ;;  %vm243_vm11 = vmand %vm8193_vm14, %vm8192_vm12  ;;  %v179_v31 = vadd.s32 4294967294, %v4591_v18  ;;  %vm8201_vm12 = vnez %v8152_v28  ;;  %v1266_v28 = vsel %vm1258_vm0, %v3930_v25, %v3915_v58  ;;  %v1259_v34 = vsel %vm1258_vm0, %v3924_v42, %v3929_v3  ;;  %v5954_v58 = vpop.permute.xlu0 %3952 }
 0x4d3   :  { %vm5903_vm15 = vmand %vm8195_vm6, %vm8194_vm1  ;;  %vm7716_vm1 = vcmp.lt.s32.totalorder %v4583_v9, 2  ;;  %vm8203_vm6 = vcmp.lt.s32.totalorder %v5588_v52, 16  ;;  %v1265_v57 = vsel %vm1258_vm0, %v3929_v3, %v3914_v14  ;;  %v3398_v51 = vpack.c.bf16 %v1260_v40, %v1259_v34  ;;  %v3938_v14 = vpop.permute.xlu1 %3937 }
 0x4d4   :  { %vm5912_vm13 = vmand %vm5875_vm7, %vm8198_vm3  ;;  %v3395_v44 = vpack.c.bf16 %v1266_v28, %v1265_v57  ;;  %vm8212_vm0 = vcmp.lt.s32.totalorder %v5624_v50, 16  ;;  %v3939_v12 = vunpack.i.l.bf16 %v3938_v14  ;;  %v8215_v54 = vpack.c.bf16 %v5535_v13, %v5539_v56 }
 0x4d5   :  { %vm8202_vm14 = vmpackc.low %vm8201_vm12, %vm8201_vm12  ;;  %vm190_vm12 = vcmp.lt.s32.totalorder %v178_v16, 16  ;;  %v8234_v57 = vpack.c.bf16 %v5547_v30, %v5545_v23 }
 0x4d6   :  { %3347 = vmatprep.subr.msk.bf16.mxu0 %vm8202_vm14, %v3346_v45  ;;  %vm5924_vm9 = vmand %vm243_vm11, %vm8203_vm6  ;;  %vm8206_vm11 = vnez %v8156_v36  ;;  %vm8208_vm14 = vcmp.lt.s32.totalorder %v5611_v37, 16  ;;  %v8211_v36 = vpack.c.bf16 %v5533_v49, %v5531_v32  ;;  %3396 = vmatprep.subr.msk.bf16.mxu1 %vm3394_vm5, %v3395_v44  ;;  %v1222_v49 = vsel %vm7716_vm1, %v3934_v15, %v3939_v12  ;;  %v3963_v6 = vpop.permute.xlu0 %3962 }
 0x4d7   :  { %vm8207_vm3 = vmpackc.low %vm8206_vm11, %vm8206_vm11  ;;  %vm184_vm5 = vcmp.ge.s32.totalorder %v176_v53, 0  ;;  %v3944_v45 = vunpack.i.l.bf16 %v3943_v33  ;;  %v3948_v25 = vpop.permute.xlu1 %3947  ;;  %v8219_v33 = vpack.c.bf16 %v5551_v35, %v5553_v55  ;;  %v3955_v44 = vunpack.i.h.bf16 %v5954_v58 }
 0x4d8   :  { %3350 = vmatpush1.bf16.msk.msra.mxu0 %vm8207_vm3, %v3349_v62  ;;  %vm5950_vm6 = vmand %vm5903_vm15, %vm8208_vm14  ;;  %vm187_vm15 = vcmp.ge.s32.totalorder %v179_v31, 0  ;;  %vm191_vm3 = vcmp.lt.s32.totalorder %v179_v31, 16  ;;  %v3940_v62 = vunpack.i.h.bf16 %v3938_v14  ;;  %vm188_vm14 = vcmp.lt.s32.totalorder %v176_v53, 16 }
 0x4d9   :  { %1475 = vmatprep.subr.bf16.mxu0 %v8211_v36  ;;  %vm5963_vm11 = vmand %vm5912_vm13, %vm8212_vm0  ;;  %vm186_vm0 = vcmp.ge.s32.totalorder %v178_v16, 0  ;;  %v3950_v56 = vunpack.i.h.bf16 %v3948_v25  ;;  %v3949_v20 = vunpack.i.l.bf16 %v3948_v25 }
 0x4da   :  { %v1223_v32 = vsel %vm7716_vm1, %v3935_v48, %v3940_v62  ;;  %vm8216_vm13 = vmpackc.low %vm5825_vm10, %vm5825_vm10  ;;  %vm8222_vm10 = vcmp.lt.s32.totalorder %v4583_v9, 2 }
 0x4db   :  { %3399 = vmatpush1.bf16.msk.msra.mxu1 %vm8216_vm13, %v3398_v51  ;;  %v3352_v3 = vpack.c.bf16 %v1223_v32, %v1222_v49  ;;  %vm5997_vm1 = vmand %vm187_vm15, %vm191_vm3  ;;  %v1221_v40 = vsel %vm8222_vm10, %v3940_v62, %v3945_v7  ;;  %v6044_v51 = vpop.permute.xlu0 %3972  ;;  %v3958_v14 = vpop.permute.xlu1 %3957  ;;  %v3965_v32 = vunpack.i.h.bf16 %v3963_v6  ;;  %v3964_v49 = vunpack.i.l.bf16 %v3963_v6 }
 0x4dc   :  { %1476 = vmatpush1.bf16.msra.mxu0 %v8215_v54  ;;  %1518 = vmatprep.subr.bf16.mxu1 %v8219_v33  ;;  %vm6006_vm8 = vmand %vm186_vm0, %vm190_vm12  ;;  %v3959_v62 = vunpack.i.l.bf16 %v3958_v14  ;;  %v3975_v42 = vunpack.i.h.bf16 %v6044_v51 }
 0x4dd   :  { %vm8223_vm15 = vmmov %vm8222_vm10 }
 0x4de   :  { %v1220_v31 = vsel %vm8223_vm15, %v3939_v12, %v3944_v45  ;;  %vm8224_vm3 = vmpackc.low %vm5853_vm2, %vm5853_vm2  ;;  %vm8231_vm2 = vcmp.ge.s32.totalorder %v5675_v2, 0 }
 0x4df   :  { %3353 = vmatprep.subr.msk.bf16.mxu0 %vm8224_vm3, %v3352_v3  ;;  %vm6021_vm13 = vmand %vm184_vm5, %vm188_vm14  ;;  %1519 = vmatpush1.bf16.msra.mxu1 %v8234_v57  ;;  %vm1176_vm5 = vcmp.lt.s32.totalorder %v4583_v9, 30  ;;  %vm8235_vm3 = vcmp.ge.s32.totalorder %v5678_v41, 0  ;;  %v3404_v30 = vpack.c.bf16 %v1221_v40, %v1220_v31  ;;  %v3983_v54 = vpop.permute.xlu0 %3982 }
 0x4e0   :  { %vm8227_vm12 = vmmov %vm8222_vm10  ;;  %v1179_v22 = vsel %vm1176_vm5, %v3959_v62, %v3964_v49 }
 0x4e1   :  { %v1219_v55 = vsel %vm8227_vm12, %v3945_v7, %v3950_v56  ;;  %vm8228_vm0 = vmmov %vm8222_vm10  ;;  %v3968_v7 = vpop.permute.xlu1 %3967 }
 0x4e2   :  { %v1225_v16 = vsel %vm8228_vm0, %v3950_v56, %v3935_v48  ;;  %vm8229_vm10 = vmmov %vm8228_vm0  ;;  %v3954_v48 = vunpack.i.l.bf16 %v5954_v58  ;;  %v3970_v25 = vunpack.i.h.bf16 %v3968_v7  ;;  %v3969_v3 = vunpack.i.l.bf16 %v3968_v7 }
 0x4e3   :  { %v1218_v28 = vsel %vm8229_vm10, %v3944_v45, %v3949_v20  ;;  %vm8230_vm15 = vmmov %vm8228_vm0  ;;  %vm8236_vm0 = vcmp.lt.s32.totalorder %v5662_v61, 16 }
 0x4e4   :  { %v1224_v39 = vsel %vm8230_vm15, %v3949_v20, %v3934_v15  ;;  %vm6037_vm14 = vmand %vm5997_vm1, %vm8231_vm2  ;;  %v3401_v36 = vpack.c.bf16 %v1219_v55, %v1218_v28  ;;  %v3960_v15 = vunpack.i.h.bf16 %v3958_v14  ;;  %v1181_v10 = vsel %vm1176_vm5, %v3954_v48, %v3959_v62  ;;  %v6124_v55 = vpop.permute.xlu0 %3992 }
 0x4e5   :  { %v3355_v34 = vpack.c.bf16 %v1225_v16, %v1224_v39  ;;  %vm230_vm12 = vmand %vm6006_vm8, %vm8235_vm3  ;;  %vm8241_vm3 = vcmp.lt.s32.totalorder %v5675_v2, 16  ;;  %v1178_v56 = vsel %vm1176_vm5, %v3965_v32, %v3970_v25  ;;  %v1184_v20 = vsel %vm1176_vm5, %v3970_v25, %v3955_v44  ;;  %v3978_v16 = vpop.permute.xlu1 %3977 }
 0x4e6   :  { %vm6057_vm10 = vmand %vm6021_vm13, %vm8236_vm0  ;;  %v1182_v12 = vsel %vm1176_vm5, %v3955_v44, %v3960_v15  ;;  %v1180_v6 = vsel %vm1176_vm5, %v3960_v15, %v3965_v32  ;;  %v1177_v33 = vsel %vm1176_vm5, %v3964_v49, %v3969_v3  ;;  %v1183_v40 = vsel %vm1176_vm5, %v3969_v3, %v3954_v48 }
 0x4e7   :  { %vm8239_vm15 = vmpackc.low %vm5864_vm4, %vm5864_vm4  ;;  %vm8244_vm4 = vcmp.lt.s32.totalorder %v5678_v41, 16  ;;  %v3358_v45 = vpack.c.bf16 %v1182_v12, %v1181_v10  ;;  %v3361_v31 = vpack.c.bf16 %v1184_v20, %v1183_v40  ;;  %v3407_v28 = vpack.c.bf16 %v1178_v56, %v1177_v33 }
 0x4e8   :  { %3356 = vmatpush1.bf16.msk.msra.mxu0 %vm8239_vm15, %v3355_v34  ;;  %vm8240_vm2 = vmpackc.low %vm5924_vm9, %vm5924_vm9  ;;  %v3974_v39 = vunpack.i.l.bf16 %v6044_v51  ;;  %v3410_v53 = vpack.c.bf16 %v1180_v6, %v1179_v22  ;;  %v3980_v34 = vunpack.i.h.bf16 %v3978_v16  ;;  %v3979_v57 = vunpack.i.l.bf16 %v3978_v16  ;;  %v4003_v15 = vpop.permute.xlu0 %4002 }
 0x4e9   :  { %3402 = vmatprep.subr.msk.bf16.mxu1 %vm8240_vm2, %v3401_v36  ;;  %vm6075_vm0 = vmand %vm6037_vm14, %vm8241_vm3  ;;  %vm1135_vm3 = vcmp.lt.s32.totalorder %v4583_v9, 32  ;;  %v3985_v44 = vunpack.i.h.bf16 %v3983_v54  ;;  %v3984_v48 = vunpack.i.l.bf16 %v3983_v54  ;;  %v3988_v62 = vpop.permute.xlu1 %3987  ;;  %v3995_v54 = vunpack.i.h.bf16 %v6124_v55 }
 0x4ea   :  { %vm6085_vm15 = vmand %vm230_vm12, %vm8244_vm4  ;;  %vm8249_vm4 = vcmp.ge.s32.totalorder %v5581_v5, 0  ;;  %v1141_v51 = vsel %vm1135_vm3, %v3975_v42, %v3980_v34  ;;  %v1140_v14 = vsel %vm1135_vm3, %v3974_v39, %v3979_v57  ;;  %v3990_v58 = vunpack.i.h.bf16 %v3988_v62 }
 0x4eb   :  { %vm8247_vm9 = vmpackc.low %vm5950_vm6, %vm5950_vm6  ;;  %v3364_v23 = vpack.c.bf16 %v1141_v51, %v1140_v14  ;;  %v3989_v12 = vunpack.i.l.bf16 %v3988_v62  ;;  %v1138_v10 = vsel %vm1135_vm3, %v3979_v57, %v3984_v48  ;;  %v3994_v6 = vunpack.i.l.bf16 %v6124_v55 }
 0x4ec   :  { %3405 = vmatpush1.bf16.msk.msra.mxu1 %vm8247_vm9, %v3404_v30  ;;  %vm3360_vm14 = vmpackc.low %vm6057_vm10, %vm6057_vm10  ;;  %vm8250_vm10 = vcmp.lt.s32.totalorder %v5581_v5, 16  ;;  %v1139_v5 = vsel %vm1135_vm3, %v3980_v34, %v3985_v44  ;;  %v1143_v18 = vsel %vm1135_vm3, %v3990_v58, %v3975_v42  ;;  %v4004_v40 = vunpack.i.l.bf16 %v4003_v15 }
 0x4ed   :  { %vm3406_vm12 = vmpackc.low %vm6075_vm0, %vm6075_vm0  ;;  %v1136_v32 = vsel %vm1135_vm3, %v3984_v48, %v3989_v12  ;;  %v1142_v49 = vsel %vm1135_vm3, %v3989_v12, %v3974_v39  ;;  %v3998_v25 = vpop.permute.xlu1 %3997  ;;  %v3416_v22 = vpack.c.bf16 %v1139_v5, %v1138_v10 }
 0x4ee   :  { %vm8248_vm6 = vmpackc.low %vm5963_vm11, %vm5963_vm11  ;;  %3408 = vmatprep.subr.msk.bf16.mxu1 %vm3406_vm12, %v3407_v28  ;;  %v3367_v7 = vpack.c.bf16 %v1143_v18, %v1142_v49  ;;  %v4000_v56 = vunpack.i.h.bf16 %v3998_v25  ;;  %v3999_v20 = vunpack.i.l.bf16 %v3998_v25 }
 0x4ef   :  { %3359 = vmatprep.subr.msk.bf16.mxu0 %vm8248_vm6, %v3358_v45  ;;  %vm3409_vm2 = vmpackc.low %vm6085_vm15, %vm6085_vm15  ;;  %v6206_v45 = vpop.permute.xlu0 %4012 }
 0x4f0   :  { %vm3363_vm11 = vmpackc.low %vm5875_vm7, %vm5875_vm7  ;;  %3362 = vmatpush1.bf16.msk.msra.mxu0 %vm3360_vm14, %v3361_v31  ;;  %3411 = vmatpush1.bf16.msk.msra.mxu1 %vm3409_vm2, %v3410_v53  ;;  %vm8253_vm14 = vcmp.ge.s32.totalorder %v5591_v17, 0  ;;  %v1137_v17 = vsel %vm1135_vm3, %v3985_v44, %v3990_v58  ;;  %vm8259_vm3 = vcmp.ge.s32.totalorder %v5611_v37, 0  ;;  %v4015_v39 = vunpack.i.h.bf16 %v6206_v45 }
 0x4f1   :  { %vm201_vm9 = vmand %vm5875_vm7, %vm8249_vm4  ;;  %3365 = vmatprep.subr.msk.bf16.mxu0 %vm3363_vm11, %v3364_v23  ;;  %vm8256_vm11 = vcmp.ge.s32.totalorder %v5588_v52, 0  ;;  %v3413_v3 = vpack.c.bf16 %v1137_v17, %v1136_v32  ;;  %v4008_v13 = vpop.permute.xlu1 %4007  ;;  %v4014_v14 = vunpack.i.l.bf16 %v6206_v45 }
 0x4f2   :  { %vm3366_vm5 = vmpackc.low %vm6021_vm13, %vm6021_vm13  ;;  %v4010_v28 = vunpack.i.h.bf16 %v4008_v13 }
 0x4f3   :  { %vm3412_vm6 = vmpackc.low %vm5997_vm1, %vm5997_vm1  ;;  %v4023_v53 = vpop.permute.xlu0 %4022 }
 0x4f4   :  { %vm6159_vm0 = vmand %vm201_vm9, %vm8250_vm10  ;;  %vm1094_vm9 = vcmp.lt.s32.totalorder %v4583_v9, 34  ;;  %3368 = vmatpush1.bf16.msk.msra.mxu0 %vm3366_vm5, %v3367_v7  ;;  %3414 = vmatprep.subr.msk.bf16.mxu1 %vm3412_vm6, %v3413_v3  ;;  %vm8268_vm5 = vcmp.lt.s32.totalorder %v5624_v50, 16  ;;  %v4025_v23 = vunpack.i.h.bf16 %v4023_v53  ;;  %v4024_v58 = vunpack.i.l.bf16 %v4023_v53 }
 0x4f5   :  { %vm6167_vm12 = vmand %vm6021_vm13, %vm8253_vm14  ;;  %vm8260_vm14 = vcmp.ge.s32.totalorder %v5624_v50, 0  ;;  %v1100_v35 = vsel %vm1094_vm9, %v3995_v54, %v4000_v56  ;;  %v1099_v42 = vsel %vm1094_vm9, %v3994_v6, %v3999_v20  ;;  %v1097_v8 = vsel %vm1094_vm9, %v3999_v20, %v4004_v40  ;;  %v4018_v48 = vpop.permute.xlu1 %4017 }
 0x4f6   :  { %vm3415_vm15 = vmpackc.low %vm6006_vm8, %vm6006_vm8  ;;  %v3370_v31 = vpack.c.bf16 %v1100_v35, %v1099_v42  ;;  %v1102_v34 = vsel %vm1094_vm9, %v4010_v28, %v3995_v54  ;;  %v4020_v12 = vunpack.i.h.bf16 %v4018_v48  ;;  %v4019_v5 = vunpack.i.l.bf16 %v4018_v48 }
 0x4f7   :  { %vm6201_vm4 = vmand %vm5997_vm1, %vm8256_vm11  ;;  %vm8261_vm11 = vnez %v8116_v38  ;;  %v4005_v38 = vunpack.i.h.bf16 %v4003_v15  ;;  %3417 = vmatpush1.bf16.msk.msra.mxu1 %vm3415_vm15, %v3416_v22  ;;  %vm8265_vm1 = vcmp.lt.s32.totalorder %v5611_v37, 16  ;;  %v4009_v37 = vunpack.i.l.bf16 %v4008_v13  ;;  %v1449_v3 = vpop.permute.xlu0 %1448 }
 0x4f8   :  { %vm202_vm10 = vmand %vm6006_vm8, %vm8259_vm3  ;;  %vm8262_vm3 = vcmp.lt.s32.totalorder %v5588_v52, 16 }
 0x4f9   :  { %vm289_vm7 = vmand %vm8261_vm11, %vm8260_vm14  ;;  %v1098_v16 = vsel %vm1094_vm9, %v4000_v56, %v4005_v38  ;;  %v1096_v50 = vsel %vm1094_vm9, %v4005_v38, %v4010_v28  ;;  %v1095_v57 = vsel %vm1094_vm9, %v4004_v40, %v4009_v37  ;;  %v1101_v51 = vsel %vm1094_vm9, %v4009_v37, %v3994_v6  ;;  %v4028_v10 = vpop.permute.xlu1 %4027 }
 0x4fa   :  { %vm6232_vm2 = vmand %vm6201_vm4, %vm8262_vm3  ;;  %v3422_v36 = vpack.c.bf16 %v1098_v16, %v1097_v8  ;;  %v3373_v44 = vpack.c.bf16 %v1102_v34, %v1101_v51  ;;  %v3419_v15 = vpack.c.bf16 %v1096_v50, %v1095_v57  ;;  %vm8273_vm14 = vnez %v8118_v60 }
 0x4fb   :  { %vm6247_vm13 = vmand %vm202_vm10, %vm8265_vm1  ;;  %vm8272_vm10 = vcmp.lt.s32.totalorder %v5662_v61, 16  ;;  %vm8276_vm9 = vcmp.ge.s32.totalorder %v5675_v2, 0  ;;  %vm8277_vm3 = vnez %v8120_v29  ;;  %v4030_v32 = vunpack.i.h.bf16 %v4028_v10 }
 0x4fc   :  { %vm6253_vm6 = vmand %vm289_vm7, %vm8268_vm5  ;;  %vm1381_vm7 = vcmp.lt.s32.totalorder %v4583_v9, 94  ;;  %v4029_v49 = vunpack.i.l.bf16 %v4028_v10 }
 0x4fd   :  { %vm3418_vm8 = vmpackc.low %vm6232_vm2, %vm6232_vm2  ;;  %v1385_v60 = vsel %vm1381_vm7, %v4020_v12, %v4025_v23  ;;  %v1387_v29 = vsel %vm1381_vm7, %v4015_v39, %v4020_v12  ;;  %v1384_v61 = vsel %vm1381_vm7, %v4019_v5, %v4024_v58  ;;  %v1386_v30 = vsel %vm1381_vm7, %v4014_v14, %v4019_v5 }
 0x4fe   :  { %vm8271_vm15 = vmpackc.low %vm6159_vm0, %vm6159_vm0  ;;  %3420 = vmatprep.subr.msk.bf16.mxu1 %vm3418_vm8, %v3419_v15  ;;  %v3376_v17 = vpack.c.bf16 %v1385_v60, %v1384_v61  ;;  %vm8281_vm2 = vcmp.lt.s32.totalorder %v5675_v2, 16  ;;  %v1383_v2 = vsel %vm1381_vm7, %v4025_v23, %v4030_v32  ;;  %v1389_v54 = vsel %vm1381_vm7, %v4030_v32, %v4015_v39  ;;  %v1454_v35 = vpop.permute.xlu1 %1453 }
 0x4ff   :  { %3371 = vmatprep.subr.msk.bf16.mxu0 %vm8271_vm15, %v3370_v31  ;;  %vm3421_vm4 = vmpackc.low %vm6247_vm13, %vm6247_vm13  ;;  %vm8279_vm15 = vcmp.ge.s32.totalorder %v5678_v41, 0  ;;  %v1388_v7 = vsel %vm1381_vm7, %v4029_v49, %v4014_v14 }
 0x500   :  { %vm3375_vm0 = vmpackc.low %vm6253_vm6, %vm6253_vm6  ;;  %3423 = vmatpush1.bf16.msk.msra.mxu1 %vm3421_vm4, %v3422_v36  ;;  %v3425_v25 = vpack.c.bf16 %v1389_v54, %v1388_v7 }
 0x501   :  { %vm6290_vm11 = vmand %vm8273_vm14, %vm8272_vm10  ;;  %vm8280_vm10 = vnez %v8122_v19  ;;  %v3379_v19 = vpack.c.bf16 %v1387_v29, %v1386_v30 }
 0x502   :  { %vm291_vm1 = vmand %vm8277_vm3, %vm8276_vm9  ;;  %vm8284_vm9 = vcmp.lt.s32.totalorder %v5678_v41, 16  ;;  %v1382_v41 = vsel %vm1381_vm7, %v4024_v58, %v4029_v49 }
 0x503   :  { %vm8278_vm5 = vmpackc.low %vm6167_vm12, %vm6167_vm12  ;;  %v3428_v45 = vpack.c.bf16 %v1383_v2, %v1382_v41 }
 0x504   :  { %3374 = vmatpush1.bf16.msk.msra.mxu0 %vm8278_vm5, %v3373_v44  ;;  %vm290_vm14 = vmand %vm8280_vm10, %vm8279_vm15 }
 0x505   :  { %vm3378_vm12 = vmpackc.low %vm6290_vm11, %vm6290_vm11  ;;  %3377 = vmatprep.subr.msk.bf16.mxu0 %vm3375_vm0, %v3376_v17 }
 0x506   :  { %vm6330_vm8 = vmand %vm291_vm1, %vm8281_vm2  ;;  %vm8287_vm2 = vcmp.lt.s32.totalorder %v4583_v9, 112 }
 0x507   :  { %vm294_vm3 = vmand %vm290_vm14, %vm8284_vm9  ;;  %vm8285_vm14 = vcmask 130048  }
 0x508   :  { %3380 = vmatpush2.bf16.msk.msra.mxu0 %vm3378_vm12, %v3379_v19  ;;  %vm3424_vm13 = vmpackc.low %vm6330_vm8, %vm6330_vm8 }
 0x509   :  { %vm3427_vm6 = vmpackc.low %vm294_vm3, %vm294_vm3  ;;  %3426 = vmatprep.subr.msk.bf16.mxu1 %vm3424_vm13, %v3425_v25 }
 0x50a   :  { %3429 = vmatpush2.bf16.msk.msra.mxu1 %vm3427_vm6, %v3428_v45  ;;  %vm8286_vm12 = vmmov %vm8285_vm14 }
 0x50b   :  { %1502 = vmatmul.mubr.bf16.vlgmr.msra.gmra.mxu0 %v4434_v43  ;;  %vm8288_vm8 = vmmov %vm8287_vm2 }
 0x50c   :  { %vm8289_vm9 = vmmov %vm8287_vm2 }
 0x50d   :  { %1545 = vmatmul.mubr.bf16.vlgmr.msra.gmra.mxu1 %v4434_v43  ;;  %vm8290_vm3 = vmmov %vm8287_vm2 }
 0x5cb   :  { %v1503_v6 = vpop.f32.mrf.mxu0 }
 0x5cc   :  { %v1504_v22 = vadd.f32 %v1503_v6, %v1449_v3 }
 0x5cd   :  { %v1505_v56 = vpop.f32.mrf.mxu0  ;;  %v1546_v40 = vpop.f32.mrf.mxu1 }
 0x5ce   :  { %v1506_v20 = vadd.f32 %v1505_v56, %v1449_v3  ;;  %v6356_v33 = vmul.f32 %v5443_v4, %v1504_v22  ;;  %v1547_v52 = vadd.f32 %v1546_v40, %v1449_v3 }
 0x5cf   :  { %v1507_v38 = vpop.f32.mrf.mxu0  ;;  %v1548_v31 = vpop.f32.mrf.mxu1 }
 0x5d0   :  { %v6359_v42 = vmul.f32 %v5457_v24, %v1506_v20  ;;  %v1549_v16 = vadd.f32 %v1548_v31, %v1449_v3  ;;  %v1508_v8 = vadd.f32 %v1507_v38, %v1454_v35  ;;  %v1563_v39 = vmul.f32 %v6356_v33, %v6356_v33 }
 0x5d1   :  { %v1509_v13 = vpop.f32.mrf.mxu0  ;;  %v1550_v28 = vpop.f32.mrf.mxu1  ;;  %v6368_v50 = vmul.f32 %v5471_v59, %v1547_v52 }
 0x5d2   :  { %v1510_v55 = vadd.f32 %v1509_v13, %v1454_v35  ;;  %v1567_v37 = vadd.f32 %v6359_v42, %v6356_v33  ;;  %v1564_v53 = vmul.f32 %v6359_v42, %v6359_v42  ;;  %v6371_v34 = vmul.f32 %v5466_v1, %v1549_v16 }
 0x5d3   :  { %v1551_v57 = vadd.f32 %v1550_v28, %v1454_v35  ;;  %v1552_v14 = vpop.f32.mrf.mxu1  ;;  %v6379_v15 = vmul.f32 %v5443_v4, %v1508_v8  ;;  %v1599_v60 = vmul.f32 %v6368_v50, %v6368_v50 }
 0x5d4   :  { %v6374_v51 = vmul.f32 %v5457_v24, %v1510_v55  ;;  %1568 = vadd.xlane.f32.xlu0 %v1567_v37  ;;  %v1573_v36 = vadd.f32 %v1564_v53, %v1563_v39  ;;  %v1553_v44 = vadd.f32 %v1552_v14, %v1454_v35  ;;  %v1603_v48 = vadd.f32 %v6371_v34, %v6368_v50 }
 0x5d5   :  { %v6382_v62 = vmul.f32 %v5471_v59, %v1551_v57  ;;  %v1600_v12 = vmul.f32 %v6371_v34, %v6371_v34  ;;  %v1565_v30 = vmul.f32 %v6379_v15, %v6379_v15 }
 0x5d6   :  { %1574 = vadd.xlane.f32.xlu1 %v1573_v36  ;;  %v6385_v23 = vmul.f32 %v5466_v1, %v1553_v44  ;;  %v1570_v58 = vadd.f32 %v6374_v51, %v6379_v15  ;;  %v1566_v29 = vmul.f32 %v6374_v51, %v6374_v51 }
 0x5d7   :  { %v1609_v61 = vadd.f32 %v1600_v12, %v1599_v60  ;;  %v1601_v17 = vmul.f32 %v6382_v62, %v6382_v62 }
 0x5d8   :  { %1604 = vadd.xlane.f32.xlu0 %v1603_v48  ;;  %v1606_v5 = vadd.f32 %v6385_v23, %v6382_v62  ;;  %v1576_v19 = vadd.f32 %v1566_v29, %v1565_v30  ;;  %v1602_v10 = vmul.f32 %v6385_v23, %v6385_v23 }
 0x5da   :  { %1571 = vadd.xlane.f32.xlu1 %v1570_v58  ;;  %v1612_v18 = vadd.f32 %v1602_v10, %v1601_v17 }
 0x5dc   :  { %1607 = vadd.xlane.f32.xlu0 %v1606_v5 }
 0x5de   :  { %1610 = vadd.xlane.f32.xlu1 %v1609_v61 }
 0x5e0   :  { %1577 = vadd.xlane.f32.xlu0 %v1576_v19 }
 0x5e4   :  { %1613 = vadd.xlane.f32.xlu0 %v1612_v18 }
 0x65d   :  { %v1569_v32 = vpop.xlane.xlu0 %1568 }
 0x65e   :  { %v1579_v49 = vmul.f32 0.015625, %v1569_v32 }
 0x65f   :  { %v1575_v43 = vpop.xlane.xlu1 %1574 }
 0x660   :  { %v1583_v2 = vmul.f32 %v1579_v49, %v1579_v49  ;;  %v1581_v54 = vmul.f32 0.015625, %v1575_v43  ;;  %v1587_v36 = vsub.f32 %v6356_v33, %v1579_v49  ;;  %v1588_v44 = vsub.f32 %v6359_v42, %v1579_v49 }
 0x661   :  { %v1605_v41 = vpop.xlane.xlu0 %1604 }
 0x662   :  { %v1585_v7 = vsub.f32 %v1581_v54, %v1583_v2  ;;  %v1615_v3 = vmul.f32 0.015625, %v1605_v41 }
 0x663   :  { %v1572_v45 = vpop.xlane.xlu1 %1571 }
 0x664   :  { %v1591_v25 = vadd.f32 1e-05, %v1585_v7  ;;  %v1580_v22 = vmul.f32 0.015625, %v1572_v45  ;;  %v1619_v20 = vmul.f32 %v1615_v3, %v1615_v3  ;;  %v1623_v12 = vsub.f32 %v6368_v50, %v1615_v3 }
 0x665   :  { %v1608_v6 = vpop.xlane.xlu0 %1607  ;;  %v1624_v33 = vsub.f32 %v6371_v34, %v1615_v3 }
 0x666   :  { %4452 = vrsqrt.f32 %v1591_v25  ;;  %v1616_v35 = vmul.f32 0.015625, %v1608_v6  ;;  %v1584_v31 = vmul.f32 %v1580_v22, %v1580_v22  ;;  %v1589_v29 = vsub.f32 %v6379_v15, %v1580_v22 }
 0x667   :  { %v1611_v56 = vpop.xlane.xlu1 %1610  ;;  %v1590_v61 = vsub.f32 %v6374_v51, %v1580_v22 }
 0x668   :  { %v1617_v38 = vmul.f32 0.015625, %v1611_v56  ;;  %v1620_v37 = vmul.f32 %v1616_v35, %v1616_v35  ;;  %v1625_v42 = vsub.f32 %v6382_v62, %v1616_v35  ;;  %v1626_v50 = vsub.f32 %v6385_v23, %v1616_v35 }
 0x669   :  { %v1578_v40 = vpop.xlane.xlu0 %1577 }
 0x66a   :  { %v1621_v52 = vsub.f32 %v1617_v38, %v1619_v20  ;;  %v1582_v13 = vmul.f32 0.015625, %v1578_v40 }
 0x66c   :  { %v1627_v55 = vadd.f32 1e-05, %v1621_v52  ;;  %v1586_v16 = vsub.f32 %v1582_v13, %v1584_v31 }
 0x66d   :  { %v1614_v8 = vpop.xlane.xlu0 %1613 }
 0x66e   :  { %4454 = vrsqrt.f32 %v1627_v55  ;;  %v1592_v28 = vadd.f32 1e-05, %v1586_v16  ;;  %v1618_v39 = vmul.f32 0.015625, %v1614_v8 }
 0x670   :  { %4456 = vrsqrt.f32 %v1592_v28  ;;  %v1622_v53 = vsub.f32 %v1618_v39, %v1620_v37  ;;  %v6484_v39 = vld [vmem:[%s7512_s1 + $0x28] sm:$0xff] }
 0x672   :  { %v1628_v57 = vadd.f32 1e-05, %v1622_v53  ;;  %v3432_v53 = vcombine.high %v6484_v39, %v6484_v39 }
 0x673   :  { %v4453_v14 = vpop.eup %4452 }
 0x674   :  { %4458 = vrsqrt.f32 %v1628_v57  ;;  %v1595_v48 = vmul.f32 %v4453_v14, %v1587_v36  ;;  %v1596_v58 = vmul.f32 %v4453_v14, %v1588_v44  ;;  %v1960_v57 = vld [vmem:[%s7513_s2 + $0x28] sm:$0xff]  ;;  %3481 = vmatprep.mubr.msk.bf16.mxu0 %vm8285_vm14, %v3432_v53  ;;  %3530 = vmatprep.mubr.msk.bf16.mxu1 %vm8286_vm12, %v3432_v53 }
 0x676   :  { %v1635_v60 = vmul.f32 %v5443_v4, %v1595_v48  ;;  %v1636_v10 = vmul.f32 %v5457_v24, %v1596_v58 }
 0x678   :  { %vm1643_vm7 = vcmp.ge.f32.partialorder %v1635_v60, 0.0  ;;  %vm1644_vm4 = vcmp.ge.f32.partialorder %v1636_v10, 0.0  ;;  %v1652_v15 = vmul.f32 0.25, %v1636_v10  ;;  %v1651_v2 = vmul.f32 0.25, %v1635_v60 }
 0x67a   :  { %v6419_v3 = vsel %vm1644_vm4, %v1636_v10, %v1652_v15  ;;  %v6427_v56 = vsel %vm1643_vm7, %v1635_v60, %v1651_v2 }
 0x67b   :  { %v4455_v5 = vpop.eup %4454 }
 0x67c   :  { %v1631_v30 = vmul.f32 %v4455_v5, %v1623_v12  ;;  %v1632_v54 = vmul.f32 %v4455_v5, %v1624_v33 }
 0x67d   :  { %v4457_v19 = vpop.eup %4456 }
 0x67e   :  { %v1597_v17 = vmul.f32 %v4457_v19, %v1589_v29  ;;  %v1598_v18 = vmul.f32 %v4457_v19, %v1590_v61  ;;  %v1637_v32 = vmul.f32 %v5471_v59, %v1631_v30  ;;  %v1638_v6 = vmul.f32 %v5466_v1, %v1632_v54 }
 0x680   :  { %v1639_v51 = vmul.f32 %v5443_v4, %v1597_v17  ;;  %v1640_v43 = vmul.f32 %v5457_v24, %v1598_v18  ;;  %v1653_v62 = vmul.f32 0.25, %v1637_v32  ;;  %vm1645_vm1 = vcmp.ge.f32.partialorder %v1637_v32, 0.0  ;;  %v8291_v18 = vld [vmem:[#allocation5_spill] sm:$0xff] }
 0x681   :  { %v4459_v49 = vpop.eup %4458  ;;  %v1654_v52 = vmul.f32 0.25, %v1638_v6  ;;  %vm1646_vm10 = vcmp.ge.f32.partialorder %v1638_v6, 0.0  ;;  %vm8292_vm13 = vnez %v8291_v18 }
 0x682   :  { %v1633_v41 = vmul.f32 %v4459_v49, %v1625_v42  ;;  %v1634_v7 = vmul.f32 %v4459_v49, %v1626_v50  ;;  %vm1647_vm0 = vcmp.ge.f32.partialorder %v1639_v51, 0.0  ;;  %vm1648_vm11 = vcmp.ge.f32.partialorder %v1640_v43, 0.0  ;;  %vm7724_vm6 = vmpackc.low %vm8292_vm13, %vm8292_vm13 }
 0x683   :  { %v1655_v34 = vmul.f32 0.25, %v1639_v51  ;;  %v1656_v45 = vmul.f32 0.25, %v1640_v43  ;;  %v6433_v40 = vsel %vm1645_vm1, %v1637_v32, %v1653_v62  ;;  %v6445_v31 = vsel %vm1646_vm10, %v1638_v6, %v1654_v52  ;;  %v8293_v32 = vld [vmem:[#allocation8_spill] sm:$0xff] }
 0x684   :  { %v1641_v23 = vmul.f32 %v5471_v59, %v1633_v41  ;;  %v1642_v25 = vmul.f32 %v5466_v1, %v1634_v7  ;;  %vm8294_vm7 = vnez %v8293_v32  ;;  %v8299_v7 = vld [vmem:[#allocation6_spill] sm:$0xff] }
 0x685   :  { %v6421_v4 = vsel %vm1648_vm11, %v1640_v43, %v1656_v45  ;;  %v6423_v24 = vsel %vm1647_vm0, %v1639_v51, %v1655_v34  ;;  %vm7720_vm4 = vmpackc.low %vm8294_vm7, %vm8294_vm7 }
 0x686   :  { %vm1649_vm5 = vcmp.ge.f32.partialorder %v1641_v23, 0.0  ;;  %v1657_v22 = vmul.f32 0.25, %v1641_v23  ;;  %v4036_v59 = vpack.i.bf16 %v6421_v4, %v6419_v3  ;;  %v4031_v20 = vpack.i.bf16 %v6423_v24, %v6427_v56  ;;  %vm8295_vm0 = vmmov %vm8287_vm2 }
 0x687   :  { %v1658_v38 = vmul.f32 0.25, %v1642_v25  ;;  %vm1650_vm15 = vcmp.ge.f32.partialorder %v1642_v25, 0.0  ;;  %v1940_v16 = vpack.c.bf16 %v6421_v4, %v6419_v3  ;;  %v1939_v8 = vpack.c.bf16 %v6423_v24, %v6427_v56  ;;  %vm8296_vm11 = vmmov %vm8295_vm0 }
 0x688   :  { %v6435_v35 = vsel %vm1649_vm5, %v1641_v23, %v1657_v22  ;;  %4037 = vrot.lane.b32.xlu0 %v4036_v59, %s4498_s22  ;;  %4032 = vrot.lane.b32.xlu1 %v4031_v20, %s4498_s22  ;;  %vm8297_vm1 = vmmov %vm8295_vm0  ;;  %v8301_v22 = vld [vmem:[#allocation7_spill] sm:$0xff] }
 0x689   :  { %v4041_v1 = vpack.i.bf16 %v6435_v35, %v6433_v40  ;;  %v6441_v13 = vsel %vm1650_vm15, %v1642_v25, %v1658_v38  ;;  %v1941_v37 = vpack.c.bf16 %v6435_v35, %v6433_v40  ;;  %vm8298_vm5 = vmmov %vm8295_vm0  ;;  %vm8300_vm15 = vnez %v8299_v7 }
 0x68a   :  { %v4046_v55 = vpack.i.bf16 %v6441_v13, %v6445_v31  ;;  %v1942_v28 = vpack.c.bf16 %v6441_v13, %v6445_v31  ;;  %vm7722_vm10 = vmpackc.low %vm8300_vm15, %vm8300_vm15  ;;  %vm8302_vm14 = vnez %v8301_v22 }
 0x68b   :  { %vm7718_vm12 = vmpackc.low %vm8302_vm14, %vm8302_vm14 }
 0x68c   :  { %4052 = vrot.lane.b32.xlu0 %v4031_v20, %s4496_s20  ;;  %4042 = vrot.lane.b32.xlu1 %v4041_v1, %s4498_s22 }
 0x690   :  { %4062 = vrot.lane.b32.xlu0 %v4041_v1, %s4496_s20  ;;  %4047 = vrot.lane.b32.xlu1 %v4046_v55, %s4498_s22 }
 0x694   :  { %4072 = vrot.lane.b32.xlu0 %v4031_v20, %s4499_s0  ;;  %4057 = vrot.lane.b32.xlu1 %v4036_v59, %s4496_s20 }
 0x698   :  { %4082 = vrot.lane.b32.xlu0 %v4041_v1, %s4499_s0  ;;  %4067 = vrot.lane.b32.xlu1 %v4046_v55, %s4496_s20 }
 0x69c   :  { %4092 = vrot.lane.b32.xlu0 %v4031_v20, %s4501_s24  ;;  %4077 = vrot.lane.b32.xlu1 %v4036_v59, %s4499_s0 }
 0x6a0   :  { %4102 = vrot.lane.b32.xlu0 %v4041_v1, %s4501_s24  ;;  %4087 = vrot.lane.b32.xlu1 %v4046_v55, %s4499_s0 }
 0x6a4   :  { %4112 = vrot.lane.b32.xlu0 %v4031_v20, %s4500_s23  ;;  %4097 = vrot.lane.b32.xlu1 %v4036_v59, %s4501_s24 }
 0x6a8   :  { %4122 = vrot.lane.b32.xlu0 %v4041_v1, %s4500_s23  ;;  %4107 = vrot.lane.b32.xlu1 %v4046_v55, %s4501_s24 }
 0x6ac   :  { %4132 = vrot.lane.b32.xlu0 %v4031_v20, %s4504_s26  ;;  %4117 = vrot.lane.b32.xlu1 %v4036_v59, %s4500_s23 }
 0x6b0   :  { %4142 = vrot.lane.b32.xlu0 %v4041_v1, %s4504_s26  ;;  %4127 = vrot.lane.b32.xlu1 %v4046_v55, %s4500_s23 }
 0x6b4   :  { %4152 = vrot.lane.b32.xlu0 %v4031_v20, %s4503_s25  ;;  %4137 = vrot.lane.b32.xlu1 %v4036_v59, %s4504_s26 }
 0x6b8   :  { %4162 = vrot.lane.b32.xlu0 %v4041_v1, %s4503_s25  ;;  %4147 = vrot.lane.b32.xlu1 %v4046_v55, %s4504_s26 }
 0x6bc   :  { %4172 = vrot.lane.b32.xlu0 %v4031_v20, %s4497_s21  ;;  %4157 = vrot.lane.b32.xlu1 %v4036_v59, %s4503_s25 }
 0x6c0   :  { %4182 = vrot.lane.b32.xlu0 %v4041_v1, %s4497_s21  ;;  %4167 = vrot.lane.b32.xlu1 %v4046_v55, %s4503_s25 }
 0x6c4   :  { %1963 = vperm.xlu0 %3789, %v1960_v57   ;;  %4177 = vrot.lane.b32.xlu1 %v4036_v59, %s4497_s21 }
 0x6c8   :  { %4187 = vrot.lane.b32.xlu1 %v4046_v55, %s4497_s21 }
 0x6fa   :  { %v4038_v14 = vpop.permute.xlu0 %4037  ;;  %v4033_v36 = vpop.permute.xlu1 %4032 }
 0x6fb   :  { %v4040_v44 = vunpack.i.h.bf16 %v4038_v14  ;;  %v4039_v48 = vunpack.i.l.bf16 %v4038_v14  ;;  %v4035_v58 = vunpack.i.h.bf16 %v4033_v36  ;;  %v4034_v12 = vunpack.i.l.bf16 %v4033_v36  ;;  %v8307_v14 = vld [vmem:[#allocation10_spill] sm:$0xff] }
 0x6fc   :  { %v8309_v36 = vld [vmem:[#allocation14_spill] sm:$0xff] }
 0x6fd   :  { %v1880_v30 = vsel %vm8287_vm2, %v4035_v58, %v4040_v44  ;;  %v1879_v19 = vsel %vm8288_vm8, %v4034_v12, %v4039_v48  ;;  %vm8303_vm2 = vcmp.lt.s32.totalorder %v4583_v9, 113 }
 0x6fe   :  { %v4053_v5 = vpop.permute.xlu0 %4052  ;;  %v4043_v60 = vpop.permute.xlu1 %4042  ;;  %v3437_v49 = vpack.c.bf16 %v1880_v30, %v1879_v19  ;;  %vm8304_vm8 = vmmov %vm8303_vm2 }
 0x6ff   :  { %v4045_v29 = vunpack.i.h.bf16 %v4043_v60  ;;  %v4044_v61 = vunpack.i.l.bf16 %v4043_v60  ;;  %v4055_v34 = vunpack.i.h.bf16 %v4053_v5  ;;  %v4054_v45 = vunpack.i.l.bf16 %v4053_v5 }
 0x701   :  { %v1878_v10 = vsel %vm8289_vm9, %v4040_v44, %v4045_v29  ;;  %v1877_v17 = vsel %vm8290_vm3, %v4039_v48, %v4044_v61  ;;  %vm8305_vm9 = vmmov %vm8303_vm2 }
 0x702   :  { %v4063_v33 = vpop.permute.xlu0 %4062  ;;  %v4048_v42 = vpop.permute.xlu1 %4047  ;;  %v3434_v50 = vpack.c.bf16 %v1878_v10, %v1877_v17  ;;  %vm8306_vm3 = vmmov %vm8303_vm2  ;;  %v8314_v10 = vld [vmem:[#allocation13_spill] sm:$0xff] }
 0x703   :  { %v4050_v15 = vunpack.i.h.bf16 %v4048_v42  ;;  %v4049_v51 = vunpack.i.l.bf16 %v4048_v42  ;;  %v4065_v59 = vunpack.i.h.bf16 %v4063_v33  ;;  %v4064_v20 = vunpack.i.l.bf16 %v4063_v33  ;;  %v8316_v17 = vld [vmem:[#allocation17_spill] sm:$0xff] }
 0x704   :  { %3435 = vmatprep.subr.msk.bf16.mxu0 %vm7724_vm6, %v3434_v50 }
 0x705   :  { %v1875_v43 = vsel %vm8295_vm0, %v4044_v61, %v4049_v51  ;;  %v1876_v2 = vsel %vm8296_vm11, %v4045_v29, %v4050_v15  ;;  %v1881_v54 = vsel %vm8297_vm1, %v4049_v51, %v4034_v12  ;;  %v1882_v41 = vsel %vm8298_vm5, %v4050_v15, %v4035_v58  ;;  %3438 = vmatpush1.bf16.msk.msra.mxu0 %vm7720_vm4, %v3437_v49 }
 0x706   :  { %v3486_v62 = vpack.c.bf16 %v1876_v2, %v1875_v43  ;;  %v4073_v23 = vpop.permute.xlu0 %4072  ;;  %v4058_v25 = vpop.permute.xlu1 %4057  ;;  %v3483_v6 = vpack.c.bf16 %v1882_v41, %v1881_v54  ;;  %vm8308_vm0 = vnez %v8307_v14  ;;  %vm8310_vm1 = vnez %v8309_v36 }
 0x707   :  { %v4060_v38 = vunpack.i.h.bf16 %v4058_v25  ;;  %v4059_v1 = vunpack.i.l.bf16 %v4058_v25  ;;  %vm7717_vm11 = vmpackc.low %vm8308_vm0, %vm8308_vm0  ;;  %v4075_v33 = vunpack.i.h.bf16 %v4073_v23  ;;  %v4074_v42 = vunpack.i.l.bf16 %v4073_v23  ;;  %v8322_v25 = vld [vmem:[#allocation15_spill] sm:$0xff] }
 0x708   :  { %3484 = vmatprep.subr.msk.bf16.mxu1 %vm7722_vm10, %v3483_v6  ;;  %vm7719_vm5 = vmpackc.low %vm8310_vm1, %vm8310_vm1  ;;  %v8324_v6 = vld [vmem:[#allocation22_spill] sm:$0xff] }
 0x709   :  { %v1846_v52 = vsel %vm8303_vm2, %v4060_v38, %v4065_v59  ;;  %v1848_v55 = vsel %vm8304_vm8, %v4055_v34, %v4060_v38  ;;  %v1845_v53 = vsel %vm8305_vm9, %v4059_v1, %v4064_v20  ;;  %v1847_v57 = vsel %vm8306_vm3, %v4054_v45, %v4059_v1  ;;  %3487 = vmatpush1.bf16.msk.msra.mxu1 %vm7718_vm12, %v3486_v62  ;;  %vm8311_vm8 = vmmov %vm8303_vm2 }
 0x70a   :  { %v3443_v44 = vpack.c.bf16 %v1848_v55, %v1847_v57  ;;  %v4083_v48 = vpop.permute.xlu0 %4082  ;;  %v4068_v58 = vpop.permute.xlu1 %4067  ;;  %v3440_v12 = vpack.c.bf16 %v1846_v52, %v1845_v53  ;;  %vm8312_vm9 = vmmov %vm8303_vm2 }
 0x70b   :  { %v4070_v5 = vunpack.i.h.bf16 %v4068_v58  ;;  %v4069_v60 = vunpack.i.l.bf16 %v4068_v58  ;;  %vm8313_vm3 = vmmov %vm8303_vm2  ;;  %v4085_v43 = vunpack.i.h.bf16 %v4083_v48  ;;  %v4084_v2 = vunpack.i.l.bf16 %v4083_v48  ;;  %v8329_v58 = vld [vmem:[#allocation18_spill] sm:$0xff] }
 0x70c   :  { %3441 = vmatprep.subr.msk.bf16.mxu0 %vm7717_vm11, %v3440_v12  ;;  %vm8315_vm11 = vnez %v8314_v10 }
 0x70d   :  { %v1844_v29 = vsel %vm8303_vm2, %v4065_v59, %v4070_v5  ;;  %v1850_v61 = vsel %vm8311_vm8, %v4070_v5, %v4055_v34  ;;  %v1843_v30 = vsel %vm8312_vm9, %v4064_v20, %v4069_v60  ;;  %v1849_v19 = vsel %vm8313_vm3, %v4069_v60, %v4054_v45  ;;  %3444 = vmatpush1.bf16.msk.msra.mxu0 %vm7719_vm5, %v3443_v44  ;;  %vm7721_vm12 = vmpackc.low %vm8315_vm11, %vm8315_vm11 }
 0x70e   :  { %vm8317_vm2 = vnez %v8316_v17  ;;  %v3492_v50 = vpack.c.bf16 %v1844_v29, %v1843_v30  ;;  %v4093_v49 = vpop.permute.xlu0 %4092  ;;  %v4078_v15 = vpop.permute.xlu1 %4077  ;;  %v3489_v51 = vpack.c.bf16 %v1850_v61, %v1849_v19  ;;  %vm8318_vm9 = vcmp.lt.s32.totalorder %v4583_v9, 127 }
 0x70f   :  { %vm7723_vm8 = vmpackc.low %vm8317_vm2, %vm8317_vm2  ;;  %v4080_v54 = vunpack.i.h.bf16 %v4078_v15  ;;  %v4079_v41 = vunpack.i.l.bf16 %v4078_v15  ;;  %v4095_v61 = vunpack.i.h.bf16 %v4093_v49  ;;  %v4094_v30 = vunpack.i.l.bf16 %v4093_v49 }
 0x710   :  { %3490 = vmatprep.subr.msk.bf16.mxu1 %vm7721_vm12, %v3489_v51  ;;  %vm8319_vm3 = vmmov %vm8318_vm9  ;;  %vm8323_vm12 = vnez %v8322_v25 }
 0x711   :  { %v1814_v34 = vsel %vm8318_vm9, %v4080_v54, %v4085_v43  ;;  %v1816_v45 = vsel %vm8319_vm3, %v4075_v33, %v4080_v54  ;;  %vm8320_vm5 = vmmov %vm8319_vm3  ;;  %3493 = vmatpush1.bf16.msk.msra.mxu1 %vm7723_vm8, %v3492_v50  ;;  %vm8325_vm9 = vnez %v8324_v6 }
 0x712   :  { %v1813_v62 = vsel %vm8320_vm5, %v4079_v41, %v4084_v2  ;;  %vm8321_vm4 = vmmov %vm8319_vm3  ;;  %v4103_v38 = vpop.permute.xlu0 %4102  ;;  %v4088_v1 = vpop.permute.xlu1 %4087 }
 0x713   :  { %v1815_v23 = vsel %vm8321_vm4, %v4074_v42, %v4079_v41  ;;  %vm7725_vm10 = vmpackc.low %vm8323_vm12, %vm8323_vm12  ;;  %v3446_v59 = vpack.c.bf16 %v1814_v34, %v1813_v62  ;;  %v4090_v52 = vunpack.i.h.bf16 %v4088_v1  ;;  %v4089_v55 = vunpack.i.l.bf16 %v4088_v1 }
 0x714   :  { %vm7727_vm3 = vmpackc.low %vm8325_vm9, %vm8325_vm9  ;;  %v3449_v20 = vpack.c.bf16 %v1816_v45, %v1815_v23  ;;  %v4105_v4 = vunpack.i.h.bf16 %v4103_v38 }
 0x715   :  { %3447 = vmatprep.subr.msk.bf16.mxu0 %vm7725_vm10, %v3446_v59  ;;  %v1812_v53 = vsel %vm8321_vm4, %v4085_v43, %v4090_v52  ;;  %vm8326_vm5 = vmmov %vm8321_vm4  ;;  %vm8330_vm10 = vnez %v8329_v58 }
 0x716   :  { %v1818_v57 = vsel %vm8326_vm5, %v4090_v52, %v4075_v33  ;;  %vm8327_vm8 = vmmov %vm8321_vm4  ;;  %3450 = vmatpush1.bf16.msk.msra.mxu0 %vm7727_vm3, %v3449_v20  ;;  %v6628_v60 = vpop.permute.xlu0 %4112  ;;  %v4098_v29 = vpop.permute.xlu1 %4097  ;;  %vm8334_vm3 = vnez %v7911_v21 }
 0x717   :  { %v1811_v44 = vsel %vm8327_vm8, %v4084_v2, %v4089_v55  ;;  %vm8328_vm6 = vmmov %vm8321_vm4  ;;  %1981 = vmatprep.subr.bf16.mxu0 %v1940_v16  ;;  %v4100_v19 = vunpack.i.h.bf16 %v4098_v29  ;;  %v4099_v33 = vunpack.i.l.bf16 %v4098_v29  ;;  %vm8332_vm4 = vcmp.lt.s32.totalorder %v4583_v9, 1 }
 0x718   :  { %v1817_v48 = vsel %vm8328_vm6, %v4089_v55, %v4074_v42  ;;  %vm7728_vm12 = vmpackc.low %vm8330_vm10, %vm8330_vm10  ;;  %v3498_v5 = vpack.c.bf16 %v1812_v53, %v1811_v44  ;;  %vm8331_vm6 = vnez %v7862_v11  ;;  %v4104_v16 = vunpack.i.l.bf16 %v4103_v38 }
 0x719   :  { %v3495_v12 = vpack.c.bf16 %v1818_v57, %v1817_v48  ;;  %v1784_v42 = vsel %vm8332_vm4, %v4095_v61, %v4100_v19  ;;  %vm8333_vm5 = vmmov %vm8332_vm4  ;;  %vm8336_vm4 = vnez %v7972_v46  ;;  %v4115_v45 = vunpack.i.h.bf16 %v6628_v60 }
 0x71a   :  { %v1783_v3 = vsel %vm8333_vm5, %v4094_v30, %v4099_v33  ;;  %1982 = vmatpush1.bf16.msra.mxu0 %v1939_v8  ;;  %v4123_v49 = vpop.permute.xlu0 %4122  ;;  %v4108_v15 = vpop.permute.xlu1 %4107  ;;  %vm8337_vm8 = vmmov %vm8333_vm5  ;;  %v4114_v62 = vunpack.i.l.bf16 %v6628_v60 }
 0x71b   :  { %3496 = vmatprep.subr.msk.bf16.mxu1 %vm7728_vm12, %v3495_v12  ;;  %v3452_v50 = vpack.c.bf16 %v1784_v42, %v1783_v3  ;;  %vm8335_vm12 = vmpackc.low %vm8331_vm6, %vm8331_vm6  ;;  %v4110_v51 = vunpack.i.h.bf16 %v4108_v15  ;;  %v4109_v43 = vunpack.i.l.bf16 %v4108_v15  ;;  %v1782_v24 = vsel %vm8337_vm8, %v4100_v19, %v4105_v4 }
 0x71c   :  { %3499 = vmatpush1.bf16.msk.msra.mxu1 %vm8335_vm12, %v3498_v5  ;;  %vm8338_vm9 = vmmov %vm8333_vm5  ;;  %v4124_v38 = vunpack.i.l.bf16 %v4123_v49 }
 0x71d   :  { %2022 = vmatprep.subr.bf16.mxu1 %v1942_v28  ;;  %v1781_v56 = vsel %vm8338_vm9, %v4099_v33, %v4104_v16  ;;  %vm8339_vm12 = vmpackc.low %vm8334_vm3, %vm8334_vm3  ;;  %v1779_v8 = vsel %vm8333_vm5, %v4104_v16, %v4109_v43  ;;  %vm8343_vm9 = vnez %v7928_v63 }
 0x71e   :  { %3453 = vmatprep.subr.msk.bf16.mxu0 %vm8339_vm12, %v3452_v50  ;;  %vm8340_vm6 = vmmov %vm8333_vm5  ;;  %v4133_v41 = vpop.permute.xlu0 %4132  ;;  %v4118_v34 = vpop.permute.xlu1 %4117  ;;  %v3504_v20 = vpack.c.bf16 %v1782_v24, %v1781_v56  ;;  %vm8346_vm12 = vcmp.lt.s32.totalorder %v4583_v9, 15 }
 0x71f   :  { %v1780_v13 = vsel %vm8340_vm6, %v4105_v4, %v4110_v51  ;;  %vm8341_vm10 = vmmov %vm8333_vm5  ;;  %v4120_v23 = vunpack.i.h.bf16 %v4118_v34  ;;  %v4119_v59 = vunpack.i.l.bf16 %v4118_v34  ;;  %vm8348_vm6 = vnez %v7875_v26  ;;  %v8366_v34 = vld [vmem:[#allocation31_spill] sm:$0xff] }
 0x720   :  { %v1786_v31 = vsel %vm8341_vm10, %v4110_v51, %v4095_v61  ;;  %vm8342_vm8 = vmmov %vm8333_vm5  ;;  %v3501_v54 = vpack.c.bf16 %v1780_v13, %v1779_v8  ;;  %2023 = vmatpush1.bf16.msra.mxu1 %v1941_v37  ;;  %vm8344_vm10 = vnez %v7990_v0  ;;  %v4125_v37 = vunpack.i.h.bf16 %v4123_v49  ;;  %v8358_v61 = vld [vmem:[#allocation36_spill] sm:$0xff] }
 0x721   :  { %v1785_v28 = vsel %vm8342_vm8, %v4109_v43, %v4094_v30  ;;  %vm7734_vm2 = vmpackc.low %vm8343_vm9, %vm8343_vm9  ;;  %v1752_v40 = vsel %vm8346_vm12, %v4115_v45, %v4120_v23  ;;  %vm8359_vm1 = vnez %v8358_v61  ;;  %v4135_v30 = vunpack.i.h.bf16 %v4133_v41  ;;  %v8363_v43 = vld [vmem:[#allocation19_spill] sm:$0xff] }
 0x722   :  { %v3455_v2 = vpack.c.bf16 %v1786_v31, %v1785_v28  ;;  %vm8345_vm5 = vmpackc.low %vm8336_vm4, %vm8336_vm4  ;;  %3502 = vmatprep.subr.msk.bf16.mxu1 %vm7734_vm2, %v3501_v54  ;;  %v4143_v52 = vpop.permute.xlu0 %4142  ;;  %v4128_v55 = vpop.permute.xlu1 %4127  ;;  %v4134_v4 = vunpack.i.l.bf16 %v4133_v41 }
 0x723   :  { %vm8347_vm8 = vmmov %vm8346_vm12  ;;  %v4130_v53 = vunpack.i.h.bf16 %v4128_v55  ;;  %v4129_v57 = vunpack.i.l.bf16 %v4128_v55  ;;  %vm8350_vm12 = vnez %v7952_v47  ;;  %v4145_v24 = vunpack.i.h.bf16 %v4143_v52 }
 0x724   :  { %3456 = vmatpush1.bf16.msk.msra.mxu0 %vm8345_vm5, %v3455_v2  ;;  %v1751_v35 = vsel %vm8347_vm8, %v4114_v62, %v4119_v59  ;;  %vm8349_vm5 = vmpackc.low %vm8344_vm10, %vm8344_vm10  ;;  %v4144_v56 = vunpack.i.l.bf16 %v4143_v52  ;;  %v8374_v52 = vld [vmem:[#allocation32_spill] sm:$0xff] }
 0x725   :  { %v3458_v1 = vpack.c.bf16 %v1752_v40, %v1751_v35  ;;  %3505 = vmatpush1.bf16.msk.msra.mxu1 %vm8349_vm5, %v3504_v20  ;;  %vm8351_vm2 = vmmov %vm8347_vm8  ;;  %v8372_v20 = vld [vmem:[#allocation24_spill] sm:$0xff] }
 0x726   :  { %v1750_v44 = vsel %vm8351_vm2, %v4120_v23, %v4125_v37  ;;  %vm8352_vm3 = vmmov %vm8351_vm2  ;;  %v1753_v29 = vsel %vm8351_vm2, %v4129_v57, %v4114_v62  ;;  %v4153_v42 = vpop.permute.xlu0 %4152  ;;  %v4138_v3 = vpop.permute.xlu1 %4137 }
 0x727   :  { %v1749_v48 = vsel %vm8352_vm3, %v4119_v59, %v4124_v38  ;;  %vm8353_vm10 = vmpackc.low %vm8348_vm6, %vm8348_vm6  ;;  %vm8357_vm3 = vnez %v7918_v27  ;;  %v4140_v50 = vunpack.i.h.bf16 %v4138_v3  ;;  %v4139_v49 = vunpack.i.l.bf16 %v4138_v3 }
 0x728   :  { %3459 = vmatprep.subr.msk.bf16.mxu0 %vm8353_vm10, %v3458_v1  ;;  %vm8354_vm5 = vmmov %vm8351_vm2  ;;  %v3510_v16 = vpack.c.bf16 %v1750_v44, %v1749_v48  ;;  %v4155_v40 = vunpack.i.h.bf16 %v4153_v42  ;;  %v4154_v55 = vunpack.i.l.bf16 %v4153_v42 }
 0x729   :  { %v1748_v12 = vsel %vm8354_vm5, %v4125_v37, %v4130_v53  ;;  %vm8355_vm4 = vmmov %vm8351_vm2 }
 0x72a   :  { %v1754_v5 = vsel %vm8355_vm4, %v4130_v53, %v4115_v45  ;;  %vm8356_vm8 = vmmov %vm8351_vm2  ;;  %vm8364_vm2 = vnez %v8363_v43  ;;  %v4163_v31 = vpop.permute.xlu0 %4162  ;;  %v4148_v8 = vpop.permute.xlu1 %4147 }
 0x72b   :  { %v1747_v60 = vsel %vm8356_vm8, %v4124_v38, %v4129_v57  ;;  %vm7740_vm9 = vmpackc.low %vm8357_vm3, %vm8357_vm3  ;;  %v3461_v19 = vpack.c.bf16 %v1754_v5, %v1753_v29  ;;  %vm8361_vm8 = vcmp.lt.s32.totalorder %v4583_v9, 16  ;;  %v4150_v28 = vunpack.i.h.bf16 %v4148_v8  ;;  %v8379_v29 = vld [vmem:[#allocation38_spill] sm:$0xff] }
 0x72c   :  { %vm7739_vm10 = vmpackc.low %vm8359_vm1, %vm8359_vm1  ;;  %v3507_v33 = vpack.c.bf16 %v1748_v12, %v1747_v60  ;;  %v1720_v15 = vsel %vm8361_vm8, %v4135_v30, %v4140_v50  ;;  %v4149_v2 = vunpack.i.l.bf16 %v4148_v8  ;;  %v4165_v48 = vunpack.i.h.bf16 %v4163_v31 }
 0x72d   :  { %vm8360_vm4 = vmpackc.low %vm8350_vm12, %vm8350_vm12  ;;  %vm8373_vm12 = vnez %v8372_v20  ;;  %v4164_v12 = vunpack.i.l.bf16 %v4163_v31  ;;  %v8390_v31 = vld [vmem:[#allocation43_spill] sm:$0xff] }
 0x72e   :  { %3462 = vmatpush1.bf16.msk.msra.mxu0 %vm8360_vm4, %v3461_v19  ;;  %3508 = vmatprep.subr.msk.bf16.mxu1 %vm7740_vm9, %v3507_v33  ;;  %vm8362_vm5 = vmmov %vm8361_vm8  ;;  %v4173_v38 = vpop.permute.xlu0 %4172  ;;  %v4158_v1 = vpop.permute.xlu1 %4157  ;;  %vm8391_vm6 = vnez %v8390_v31 }
 0x72f   :  { %v1719_v51 = vsel %vm8362_vm5, %v4134_v4, %v4139_v49  ;;  %3511 = vmatpush1.bf16.msk.msra.mxu1 %vm7739_vm10, %v3510_v16  ;;  %vm7744_vm4 = vmpackc.low %vm8364_vm2, %vm8364_vm2  ;;  %v1717_v41 = vsel %vm8362_vm5, %v4139_v49, %v4144_v56  ;;  %vm8367_vm10 = vnez %v8366_v34  ;;  %v4160_v57 = vunpack.i.h.bf16 %v4158_v1  ;;  %v8383_v16 = vld [vmem:[#allocation42_spill] sm:$0xff] }
 0x730   :  { %v3464_v13 = vpack.c.bf16 %v1720_v15, %v1719_v51  ;;  %vm8365_vm8 = vmmov %vm8362_vm5  ;;  %v4159_v44 = vunpack.i.l.bf16 %v4158_v1  ;;  %v4174_v8 = vunpack.i.l.bf16 %v4173_v38  ;;  %v8398_v1 = vld [vmem:[#allocation16_spill] sm:$0xff] }
 0x731   :  { %v1718_v54 = vsel %vm8365_vm8, %v4140_v50, %v4145_v24  ;;  %vm8368_vm1 = vmmov %vm8362_vm5  ;;  %v4175_v50 = vunpack.i.h.bf16 %v4173_v38 }
 0x732   :  { %3465 = vmatprep.subr.msk.bf16.mxu0 %vm7744_vm4, %v3464_v13  ;;  %v1716_v45 = vsel %vm8368_vm1, %v4145_v24, %v4150_v28  ;;  %vm8369_vm3 = vmmov %vm8368_vm1  ;;  %v3516_v53 = vpack.c.bf16 %v1718_v54, %v1717_v41  ;;  %v4168_v19 = vpop.permute.xlu1 %4167  ;;  %v4183_v49 = vpop.permute.xlu0 %4182  ;;  %v8388_v13 = vld [vmem:[#allocation41_spill] sm:$0xff] }
 0x733   :  { %v1722_v62 = vsel %vm8369_vm3, %v4150_v28, %v4135_v30  ;;  %vm8370_vm8 = vmmov %vm8368_vm1  ;;  %v4170_v3 = vunpack.i.h.bf16 %v4168_v19 }
 0x734   :  { %v1715_v23 = vsel %vm8370_vm8, %v4144_v56, %v4149_v2  ;;  %vm8371_vm5 = vmmov %vm8368_vm1  ;;  %vm8375_vm1 = vnez %v8374_v52  ;;  %vm8377_vm8 = vcmp.lt.s32.totalorder %v4583_v9, 17 }
 0x735   :  { %v1721_v59 = vsel %vm8371_vm5, %v4149_v2, %v4134_v4  ;;  %vm7746_vm4 = vmpackc.low %vm8373_vm12, %vm8373_vm12  ;;  %v3513_v37 = vpack.c.bf16 %v1716_v45, %v1715_v23  ;;  %v1688_v5 = vsel %vm8377_vm8, %v4155_v40, %v4160_v57  ;;  %v4169_v4 = vunpack.i.l.bf16 %v4168_v19 }
 0x736   :  { %v3467_v35 = vpack.c.bf16 %v1722_v62, %v1721_v59  ;;  %vm7748_vm9 = vmpackc.low %vm8375_vm1, %vm8375_vm1  ;;  %vm8389_vm12 = vnez %v8388_v13  ;;  %v4178_v41 = vpop.permute.xlu1 %4177  ;;  %v4185_v45 = vunpack.i.h.bf16 %v4183_v49  ;;  %v4184_v62 = vunpack.i.l.bf16 %v4183_v49 }
 0x737   :  { %vm8376_vm3 = vmpackc.low %vm8367_vm10, %vm8367_vm10  ;;  %3514 = vmatprep.subr.msk.bf16.mxu1 %vm7746_vm4, %v3513_v37  ;;  %v4180_v23 = vunpack.i.h.bf16 %v4178_v41  ;;  %v4179_v59 = vunpack.i.l.bf16 %v4178_v41 }
 0x738   :  { %3468 = vmatpush1.bf16.msk.msra.mxu0 %vm8376_vm3, %v3467_v35  ;;  %vm8378_vm5 = vmmov %vm8377_vm8  ;;  %3517 = vmatpush1.bf16.msk.msra.mxu1 %vm7748_vm9, %v3516_v53  ;;  %vm8380_vm3 = vnez %v8379_v29 }
 0x739   :  { %v1687_v60 = vsel %vm8378_vm5, %v4154_v55, %v4159_v44  ;;  %vm7752_vm10 = vmpackc.low %vm8380_vm3, %vm8380_vm3 }
 0x73a   :  { %v3470_v30 = vpack.c.bf16 %v1688_v5, %v1687_v60  ;;  %vm8381_vm4 = vmmov %vm8378_vm5  ;;  %vm8384_vm5 = vnez %v8383_v16  ;;  %v3431_v5 = vcombine.low %v6484_v39, %v6484_v39 }
 0x73b   :  { %v1686_v33 = vsel %vm8381_vm4, %v4160_v57, %v4165_v48  ;;  %vm8382_vm8 = vmmov %vm8381_vm4  ;;  %v1690_v51 = vsel %vm8381_vm4, %v4170_v3, %v4155_v40  ;;  %v4188_v57 = vpop.permute.xlu1 %4187 }
 0x73c   :  { %v1685_v42 = vsel %vm8382_vm8, %v4159_v44, %v4164_v12  ;;  %3471 = vmatprep.subr.msk.bf16.mxu0 %vm7752_vm10, %v3470_v30  ;;  %vm8385_vm9 = vmmov %vm8381_vm4  ;;  %v8400_v44 = vld [vmem:[#allocation12_spill] sm:$0xff] }
 0x73d   :  { %v1684_v15 = vsel %vm8385_vm9, %v4165_v48, %v4170_v3  ;;  %vm8386_vm8 = vmmov %vm8381_vm4  ;;  %v3522_v28 = vpack.c.bf16 %v1686_v33, %v1685_v42  ;;  %v4190_v48 = vunpack.i.h.bf16 %v4188_v57  ;;  %v8406_v42 = vld [vmem:[#allocation20_spill] sm:$0xff] }
 0x73e   :  { %v1683_v24 = vsel %vm8386_vm8, %v4164_v12, %v4169_v4  ;;  %vm8387_vm1 = vmmov %vm8381_vm4  ;;  %v4189_v12 = vunpack.i.l.bf16 %v4188_v57 }
 0x73f   :  { %v1689_v56 = vsel %vm8387_vm1, %v4169_v4, %v4154_v55  ;;  %vm7753_vm2 = vmpackc.low %vm8389_vm12, %vm8389_vm12  ;;  %v3519_v54 = vpack.c.bf16 %v1684_v15, %v1683_v24  ;;  %vm8393_vm1 = vcmp.lt.s32.totalorder %v4583_v9, 111  ;;  %v8408_v4 = vld [vmem:[#allocation21_spill] sm:$0xff]  ;;  %v1964_v15 = vpop.permute.xlu0 %1963 }
 0x740   :  { %v3473_v2 = vpack.c.bf16 %v1690_v51, %v1689_v56  ;;  %vm8392_vm9 = vmpackc.low %vm8384_vm5, %vm8384_vm5  ;;  %v1910_v40 = vsel %vm8393_vm1, %v4180_v23, %v4185_v45 }
 0x741   :  { %3520 = vmatprep.subr.msk.bf16.mxu1 %vm7753_vm2, %v3519_v54  ;;  %vm8394_vm4 = vmmov %vm8393_vm1  ;;  %vm8399_vm2 = vnez %v8398_v1 }
 0x742   :  { %3474 = vmatpush1.bf16.msk.msra.mxu0 %vm8392_vm9, %v3473_v2  ;;  %v1912_v35 = vsel %vm8394_vm4, %v4175_v50, %v4180_v23  ;;  %vm8395_vm8 = vmmov %vm8393_vm1  ;;  %v1913_v33 = vsel %vm8394_vm4, %v4189_v12, %v4174_v8 }
 0x743   :  { %v1909_v37 = vsel %vm8395_vm8, %v4179_v59, %v4184_v62  ;;  %vm8396_vm10 = vmmov %vm8393_vm1  ;;  %vm8401_vm1 = vnez %v8400_v44 }
 0x744   :  { %v1911_v38 = vsel %vm8396_vm10, %v4174_v8, %v4179_v59  ;;  %vm8397_vm9 = vmpackc.low %vm8391_vm6, %vm8391_vm6  ;;  %v3476_v55 = vpack.c.bf16 %v1910_v40, %v1909_v37 }
 0x745   :  { %3523 = vmatpush1.bf16.msk.msra.mxu1 %vm8397_vm9, %v3522_v28  ;;  %vm7755_vm12 = vmpackc.low %vm8399_vm2, %vm8399_vm2  ;;  %v3479_v53 = vpack.c.bf16 %v1912_v35, %v1911_v38  ;;  %vm8407_vm2 = vnez %v8406_v42 }
 0x746   :  { %3477 = vmatprep.subr.msk.bf16.mxu0 %vm7755_vm12, %v3476_v55  ;;  %vm8402_vm10 = vmmov %vm8394_vm4 }
 0x747   :  { %v1908_v60 = vsel %vm8402_vm10, %v4185_v45, %v4190_v48  ;;  %vm8403_vm8 = vmmov %vm8394_vm4  ;;  %vm8409_vm10 = vnez %v8408_v4 }
 0x748   :  { %v1914_v30 = vsel %vm8403_vm8, %v4190_v48, %v4175_v50  ;;  %vm8404_vm9 = vmmov %vm8394_vm4  ;;  %v8410_v50 = vmov 0   ;;  %v2112_v48 = vld [vmem:[%s7513_s2 + $0x48] sm:$0xff] }
 0x749   :  { %v1907_v19 = vsel %vm8404_vm9, %v4184_v62, %v4189_v12  ;;  %vm8405_vm12 = vmpackc.low %vm8401_vm1, %vm8401_vm1  ;;  %v3525_v39 = vpack.c.bf16 %v1914_v30, %v1913_v33  ;;  %v2111_v12 = vld [vmem:[%s7513_s2 + $0x40] sm:$0xff] }
 0x74a   :  { %3480 = vmatpush2.bf16.msk.msra.mxu0 %vm8405_vm12, %v3479_v53  ;;  %vm7769_vm6 = vmpackc.low %vm8407_vm2, %vm8407_vm2  ;;  %v3528_v3 = vpack.c.bf16 %v1908_v60, %v1907_v19 }
 0x74b   :  { %vm7758_vm8 = vmpackc.low %vm8409_vm10, %vm8409_vm10  ;;  %3526 = vmatprep.subr.msk.bf16.mxu1 %vm7769_vm6, %v3525_v39 }
 0x74c   :  { %3529 = vmatpush2.bf16.msk.msra.mxu1 %vm7758_vm8, %v3528_v3 }
 0x74d   :  { %2008 = vmatmul.mubr.bf16.vlgmr.msra.gmra.mxu0 %v3431_v5 }
 0x74e   :  { %2163 = vmatprep.mubr.bf16.mxu0 %v8410_v50 }
 0x74f   :  { %2049 = vmatmul.mubr.bf16.vlgmr.msra.gmra.mxu1 %v3431_v5 }
 0x750   :  { %2206 = vmatprep.mubr.bf16.mxu1 %v8410_v50 }
 0x80d   :  { %v2009_v49 = vpop.f32.mrf.mxu0 }
 0x80e   :  { %v2010_v24 = vadd.f32 %v2009_v49, %v1964_v15 }
 0x80f   :  { %v2011_v51 = vpop.f32.mrf.mxu0  ;;  %v2050_v28 = vpop.f32.mrf.mxu1 }
 0x810   :  { %v2012_v56 = vadd.f32 %v2011_v51, %v1964_v15  ;;  %v2051_v2 = vadd.f32 %v2050_v28, %v1964_v15  ;;  %v2057_v55 = vmul.f32 %v2010_v24, %v2010_v24 }
 0x811   :  { %v2013_v8 = vpop.f32.mrf.mxu0  ;;  %v2052_v45 = vpop.f32.mrf.mxu1 }
 0x812   :  { %v2059_v54 = vadd.f32 %v2012_v56, %v2010_v24  ;;  %v2053_v62 = vadd.f32 %v2052_v45, %v1964_v15  ;;  %v2058_v59 = vmul.f32 %v2012_v56, %v2012_v56  ;;  %v2075_v40 = vmul.f32 %v2051_v2, %v2051_v2 }
 0x813   :  { %v2014_v41 = vpop.f32.mrf.mxu0  ;;  %v2054_v23 = vpop.f32.mrf.mxu1 }
 0x814   :  { %2060 = vadd.xlane.f32.xlu1 %v2059_v54  ;;  %v2076_v35 = vmul.f32 %v2053_v62, %v2053_v62  ;;  %v2077_v37 = vadd.f32 %v2053_v62, %v2051_v2  ;;  %v2062_v57 = vadd.f32 %v2058_v59, %v2057_v55 }
 0x815   :  { %v2055_v38 = vpop.f32.mrf.mxu1 }
 0x816   :  { %2078 = vadd.xlane.f32.xlu0 %v2077_v37  ;;  %v2080_v53 = vadd.f32 %v2076_v35, %v2075_v40 }
 0x818   :  { %2081 = vadd.xlane.f32.xlu1 %v2080_v53 }
 0x81a   :  { %2063 = vadd.xlane.f32.xlu0 %v2062_v57 }
 0x829   :  { %2120 = vperm.xlu1 %3870, %v2112_v48  }
 0x830   :  { %2115 = vperm.xlu0 %3789, %v2111_v12  }
 0x89d   :  { %v2061_v5 = vpop.xlane.xlu1 %2060 }
 0x89e   :  { %v2065_v30 = vmul.f32 0.00390625, %v2061_v5 }
 0x89f   :  { %v2079_v60 = vpop.xlane.xlu0 %2078 }
 0x8a0   :  { %v2083_v19 = vmul.f32 0.00390625, %v2079_v60  ;;  %v2067_v51 = vmul.f32 %v2065_v30, %v2065_v30  ;;  %v2069_v38 = vsub.f32 %v2010_v24, %v2065_v30  ;;  %v2070_v55 = vsub.f32 %v2012_v56, %v2065_v30  ;;  %v8412_v24 = vld [vmem:[#allocation47_spill] sm:$0xff] }
 0x8a1   :  { %v2082_v33 = vpop.xlane.xlu1 %2081 }
 0x8a2   :  { %v2085_v39 = vmul.f32 %v2083_v19, %v2083_v19  ;;  %v2084_v3 = vmul.f32 0.00390625, %v2082_v33  ;;  %v2087_v45 = vsub.f32 %v2051_v2, %v2083_v19  ;;  %v2088_v23 = vsub.f32 %v2053_v62, %v2083_v19  ;;  %v8411_v19 = vld [vmem:[#allocation48_spill] sm:$0xff] }
 0x8a3   :  { %v2064_v49 = vpop.xlane.xlu0 %2063 }
 0x8a4   :  { %v2086_v15 = vsub.f32 %v2084_v3, %v2085_v39  ;;  %v2066_v8 = vmul.f32 0.00390625, %v2064_v49  ;;  %v8413_v3 = vld [vmem:[#allocation50_spill] sm:$0xff] }
 0x8a6   :  { %v2089_v28 = vadd.f32 1e-05, %v2086_v15  ;;  %v2068_v54 = vsub.f32 %v2066_v8, %v2067_v51  ;;  %v8414_v15 = vld [vmem:[#allocation49_spill] sm:$0xff]  ;;  %v4437_v8 = vld [vmem:[%s7512_s1 + $0x40] ss:$8 sps:$4 sm:$0xff]  }
 0x8a8   :  { %4460 = vrsqrt.f32 %v2089_v28  ;;  %v2071_v41 = vadd.f32 1e-05, %v2068_v54 }
 0x8aa   :  { %4462 = vrsqrt.f32 %v2071_v41 }
 0x8ab   :  { %v2116_v54 = vpop.permute.xlu0 %2115 }
 0x8b5   :  { %v4461_v59 = vpop.eup %4460 }
 0x8b6   :  { %v2091_v40 = vmul.f32 %v4461_v59, %v2087_v45  ;;  %v2092_v35 = vmul.f32 %v4461_v59, %v2088_v23 }
 0x8b7   :  { %v4463_v37 = vpop.eup %4462 }
 0x8b8   :  { %vm2095_vm12 = vcmp.ge.f32.partialorder %v2091_v40, 0.0  ;;  %vm2096_vm4 = vcmp.ge.f32.partialorder %v2092_v35, 0.0  ;;  %v2099_v53 = vmul.f32 0.25, %v2091_v40  ;;  %v2100_v57 = vmul.f32 0.25, %v2092_v35 }
 0x8b9   :  { %v2073_v48 = vmul.f32 %v4463_v37, %v2069_v38  ;;  %v2074_v12 = vmul.f32 %v4463_v37, %v2070_v55 }
 0x8ba   :  { %v6907_v5 = vsel %vm2095_vm12, %v2091_v40, %v2099_v53  ;;  %v6909_v60 = vsel %vm2096_vm4, %v2092_v35, %v2100_v57  ;;  %vm8415_vm12 = vcmask 130048   ;;  %vm8417_vm4 = vcmask 1043456  }
 0x8bb   :  { %vm2093_vm9 = vcmp.ge.f32.partialorder %v2073_v48, 0.0  ;;  %vm2094_vm8 = vcmp.ge.f32.partialorder %v2074_v12, 0.0  ;;  %v2097_v2 = vmul.f32 0.25, %v2073_v48  ;;  %v2098_v62 = vmul.f32 0.25, %v2074_v12  ;;  %vm8420_vm6 = vmmov %vm8417_vm4 }
 0x8bc   :  { %v2108_v33 = vpack.c.bf16 %v8411_v19, %v6909_v60  ;;  %v2107_v56 = vpack.c.bf16 %v8412_v24, %v6907_v5 }
 0x8bd   :  { %v6915_v30 = vsel %vm2093_vm9, %v2073_v48, %v2097_v2  ;;  %v6917_v39 = vsel %vm2094_vm8, %v2074_v12, %v2098_v62  ;;  %vm8416_vm8 = vmmov %vm8415_vm12  ;;  %v2121_v48 = vpop.permute.xlu1 %2120 }
 0x8be   :  { %2188 = vmatprep.subr.bf16.mxu1 %v2108_v33  ;;  %v2106_v49 = vpack.c.bf16 %v8413_v3, %v6917_v39  ;;  %v2105_v51 = vpack.c.bf16 %v8414_v15, %v6915_v30  ;;  %vm8418_vm9 = vmmov %vm8417_vm4 }
 0x8bf   :  { %2189 = vmatpush1.bf16.msra.mxu1 %v2107_v56 }
 0x8c0   :  { %2145 = vmatprep.subr.bf16.mxu0 %v2106_v49 }
 0x8c1   :  { %2146 = vmatpush1.bf16.msra.mxu0 %v2105_v51 }
 0x8c2   :  { %3533 = vmatmul.mubr.msk.bf16.vlgmr.msra.gmra.mxu1 %vm8415_vm12, %v4437_v8  ;;  %vm2308_vm12 = vcmask 64512  }
 0x8c3   :  { %2397 = vmatprep.mubr.bf16.mxu1 %v8410_v50 }
 0x8c4   :  { %3532 = vmatmul.mubr.msk.bf16.vlgmr.msra.gmra.mxu0 %vm8416_vm8, %v4437_v8  ;;  %vm8419_vm8 = vmmov %vm8417_vm4 }
 0x8c5   :  { %2356 = vmatprep.mubr.bf16.mxu0 %v8410_v50 }
 0x982   :  { %v2208_v28 = vpop.f32.mrf.mxu1 }
 0x983   :  { %v6934_v40 = vadd.f32 %v2208_v28, %v2116_v54 }
 0x984   :  { %v2165_v41 = vpop.f32.mrf.mxu0  ;;  %v2210_v45 = vpop.f32.mrf.mxu1 }
 0x985   :  { %v6930_v23 = vadd.f32 %v2165_v41, %v2116_v54  ;;  %v6932_v59 = vadd.f32 %v2210_v45, %v2116_v54 }
 0x986   :  { %v2167_v35 = vpop.f32.mrf.mxu0  ;;  %v2212_v37 = vpop.f32.mrf.mxu1 }
 0x987   :  { %v6936_v38 = vadd.f32 %v2167_v35, %v2116_v54  ;;  %v2257_v57 = vadd.f32 %v6932_v59, %v6934_v40  ;;  %v2217_v12 = vmul.f32 %v6930_v23, %v6930_v23  ;;  %v6950_v8 = vadd.f32 %v2212_v37, %v2121_v48 }
 0x988   :  { %v2169_v55 = vpop.f32.mrf.mxu0  ;;  %v2214_v53 = vpop.f32.mrf.mxu1  ;;  %v2254_v45 = vmul.f32 %v6932_v59, %v6932_v59 }
 0x989   :  { %v2218_v2 = vmul.f32 %v6936_v38, %v6936_v38  ;;  %v6944_v62 = vadd.f32 %v2214_v53, %v2121_v48  ;;  %2258 = vadd.xlane.f32.xlu0 %v2257_v57  ;;  %v2221_v56 = vadd.f32 %v6936_v38, %v6930_v23  ;;  %v6952_v28 = vadd.f32 %v2169_v55, %v2121_v48 }
 0x98a   :  { %v2171_v33 = vpop.f32.mrf.mxu0  ;;  %v2253_v55 = vmul.f32 %v6934_v40, %v6934_v40 }
 0x98b   :  { %v6948_v49 = vadd.f32 %v2171_v33, %v2121_v48  ;;  %v2227_v51 = vadd.f32 %v2218_v2, %v2217_v12  ;;  %2222 = vadd.xlane.f32.xlu1 %v2221_v56  ;;  %v2260_v41 = vadd.f32 %v6944_v62, %v6950_v8  ;;  %v2219_v35 = vmul.f32 %v6952_v28, %v6952_v28  ;;  %v2302_v33 = vld [vmem:[%s7513_s2 + $0x50] sm:$0x1] }
 0x98c   :  { %v2256_v53 = vmul.f32 %v6944_v62, %v6944_v62  ;;  %v2255_v48 = vmul.f32 %v6950_v8, %v6950_v8  ;;  %v2263_v12 = vadd.f32 %v2254_v45, %v2253_v55 }
 0x98d   :  { %v2220_v54 = vmul.f32 %v6948_v49, %v6948_v49  ;;  %2228 = vadd.xlane.f32.xlu0 %v2227_v51  ;;  %v2224_v37 = vadd.f32 %v6948_v49, %v6952_v28 }
 0x98e   :  { %v2266_v2 = vadd.f32 %v2256_v53, %v2255_v48 }
 0x98f   :  { %2261 = vadd.xlane.f32.xlu1 %v2260_v41  ;;  %v2230_v57 = vadd.f32 %v2220_v54, %v2219_v35 }
 0x991   :  { %2225 = vadd.xlane.f32.xlu0 %v2224_v37 }
 0x993   :  { %2231 = vadd.xlane.f32.xlu1 %v2230_v57 }
 0x995   :  { %2264 = vadd.xlane.f32.xlu0 %v2263_v12 }
 0x997   :  { %2267 = vadd.xlane.f32.xlu1 %v2266_v2 }
 0x9ab   :  { %2305 = vperm.xlu0 %3789, %v2302_v33  }
 0xa12   :  { %v2259_v56 = vpop.xlane.xlu0 %2258 }
 0xa13   :  { %v2269_v42 = vmul.f32 0.00390625, %v2259_v56 }
 0xa14   :  { %v2223_v51 = vpop.xlane.xlu1 %2222 }
 0xa15   :  { %v2233_v41 = vmul.f32 0.00390625, %v2223_v51  ;;  %v2273_v1 = vmul.f32 %v2269_v42, %v2269_v42 }
 0xa16   :  { %v2229_v50 = vpop.xlane.xlu0 %2228 }
 0xa17   :  { %v2237_v4 = vmul.f32 %v2233_v41, %v2233_v41  ;;  %v2235_v37 = vmul.f32 0.00390625, %v2229_v50 }
 0xa18   :  { %v2262_v54 = vpop.xlane.xlu1 %2261 }
 0xa19   :  { %v2239_v35 = vsub.f32 %v2235_v37, %v2237_v4  ;;  %v2270_v55 = vmul.f32 0.00390625, %v2262_v54  ;;  %v2241_v37 = vsub.f32 %v6930_v23, %v2233_v41  ;;  %v2242_v54 = vsub.f32 %v6936_v38, %v2233_v41 }
 0xa1a   :  { %v2226_v44 = vpop.xlane.xlu0 %2225 }
 0xa1b   :  { %v2234_v57 = vmul.f32 0.00390625, %v2226_v44  ;;  %v2245_v48 = vadd.f32 1e-05, %v2239_v35  ;;  %v2274_v51 = vmul.f32 %v2270_v55, %v2270_v55  ;;  %v2280_v23 = vsub.f32 %v6944_v62, %v2270_v55 }
 0xa1c   :  { %v2232_v45 = vpop.xlane.xlu1 %2231 }
 0xa1d   :  { %v2236_v53 = vmul.f32 0.00390625, %v2232_v45  ;;  %v2238_v12 = vmul.f32 %v2234_v57, %v2234_v57  ;;  %4464 = vrsqrt.f32 %v2245_v48  ;;  %v2243_v35 = vsub.f32 %v6952_v28, %v2234_v57 }
 0xa1e   :  { %v2265_v2 = vpop.xlane.xlu0 %2264  ;;  %v2244_v45 = vsub.f32 %v6948_v49, %v2234_v57 }
 0xa1f   :  { %v2271_v31 = vmul.f32 0.00390625, %v2265_v2  ;;  %v2240_v33 = vsub.f32 %v2236_v53, %v2238_v12  ;;  %v2279_v12 = vsub.f32 %v6950_v8, %v2270_v55 }
 0xa20   :  { %v2268_v13 = vpop.xlane.xlu1 %2267 }
 0xa21   :  { %v2275_v16 = vsub.f32 %v2271_v31, %v2273_v1  ;;  %v2272_v29 = vmul.f32 0.00390625, %v2268_v13  ;;  %v2246_v50 = vadd.f32 1e-05, %v2240_v33 }
 0xa23   :  { %v2281_v52 = vadd.f32 1e-05, %v2275_v16  ;;  %v2276_v4 = vsub.f32 %v2272_v29, %v2274_v51  ;;  %4466 = vrsqrt.f32 %v2246_v50  ;;  %v2277_v29 = vsub.f32 %v6934_v40, %v2269_v42 }
 0xa25   :  { %4468 = vrsqrt.f32 %v2281_v52  ;;  %v2282_v44 = vadd.f32 1e-05, %v2276_v4  ;;  %v2278_v52 = vsub.f32 %v6932_v59, %v2269_v42  ;;  %v2297_v59 = vld [vmem:[%s7512_s1 + $0x50] sm:$0x1] }
 0xa27   :  { %4470 = vrsqrt.f32 %v2282_v44 }
 0xa2a   :  { %v4465_v56 = vpop.eup %4464 }
 0xa2b   :  { %v2250_v13 = vmul.f32 %v4465_v56, %v2242_v54  ;;  %v2249_v48 = vmul.f32 %v4465_v56, %v2241_v37 }
 0xa30   :  { %v4467_v31 = vpop.eup %4466 }
 0xa31   :  { %v2252_v53 = vmul.f32 %v4467_v31, %v2244_v45  ;;  %v2251_v16 = vmul.f32 %v4467_v31, %v2243_v35  ;;  %v2306_v35 = vpop.permute.xlu0 %2305 }
 0xa32   :  { %v4469_v1 = vpop.eup %4468 }
 0xa33   :  { %v2290_v38 = vadd.f32 %v2252_v53, %v2250_v13  ;;  %v2289_v41 = vadd.f32 %v2251_v16, %v2249_v48  ;;  %v2286_v28 = vmul.f32 %v4469_v1, %v2278_v52  ;;  %v2285_v49 = vmul.f32 %v4469_v1, %v2277_v29 }
 0xa34   :  { %v4471_v2 = vpop.eup %4470 }
 0xa35   :  { %v2288_v33 = vmul.f32 %v4471_v2, %v2280_v23  ;;  %v2287_v57 = vmul.f32 %v4471_v2, %v2279_v12  ;;  %v2294_v51 = vmax.f32 %v2290_v38, 0.0  ;;  %v2293_v50 = vmax.f32 %v2289_v41, 0.0 }
 0xa37   :  { %v2292_v4 = vadd.f32 %v2288_v33, %v2286_v28  ;;  %v2291_v44 = vadd.f32 %v2287_v57, %v2285_v49  ;;  %v2299_v56 = vpack.c.bf16 %v2294_v51, %v2294_v51  ;;  %v2298_v37 = vpack.c.bf16 %v2293_v50, %v2293_v50 }
 0xa39   :  { %v2296_v40 = vmax.f32 %v2292_v4, 0.0  ;;  %v2295_v54 = vmax.f32 %v2291_v44, 0.0  ;;  %3534 = vmatprep.subr.msk.bf16.mxu0 %vm8417_vm4, %v2299_v56  ;;  %v2313_v42 = vsel %vm8418_vm9, %v2298_v37, 0  ;;  %vm2414_vm4 = vcmask 1040384  }
 0xa3a   :  { %2339 = vmatpush1.bf16.msra.mxu0 %v2313_v42  ;;  %vm8422_vm9 = vcmask 130048  }
 0xa3b   :  { %v2301_v62 = vpack.c.bf16 %v2296_v40, %v2296_v40  ;;  %v2300_v8 = vpack.c.bf16 %v2295_v54, %v2295_v54 }
 0xa3d   :  { %3536 = vmatprep.subr.msk.bf16.mxu1 %vm8419_vm8, %v2301_v62  ;;  %v2319_v55 = vsel %vm8420_vm6, %v2300_v8, 0  ;;  %3535 = vmatmul.mubr.msk.bf16.vlgmr.msra.gmra.mxu0 %vm2308_vm12, %v2297_v59  ;;  %vm2417_vm6 = vcmask 1041408   ;;  %vm8424_vm8 = vcmp.lt.s32.totalorder %v4583_v9, 112 }
 0xa3e   :  { %2380 = vmatpush1.bf16.msra.mxu1 %v2319_v55 }
 0xa41   :  { %3537 = vmatmul.mubr.msk.bf16.vlgmr.msra.gmra.mxu1 %vm2308_vm12, %v2297_v59  ;;  %vm8423_vm12 = vmmov %vm8422_vm9 }
 0xafd   :  { %v2358_v45 = vpop.f32.mrf.mxu0 }
 0xafe   :  { %v2359_v31 = vadd.f32 %v2358_v45, %v2306_v35 }
 0xaff   :  { %v2360_v1 = vpop.f32.mrf.mxu0 }
 0xb00   :  { %v2406_v13 = vmul.f32 %v2359_v31, %v2359_v31  ;;  %v2361_v53 = vadd.f32 %v2360_v1, %v2306_v35 }
 0xb01   :  { %v2399_v48 = vpop.f32.mrf.mxu1  ;;  %v2362_v16 = vpop.f32.mrf.mxu0 }
 0xb02   :  { %v2400_v29 = vadd.f32 %v2399_v48, %v2306_v35  ;;  %v2410_v52 = vrot.slane %v2406_v13, 7  ;;  %v2407_v12 = vmul.f32 %v2361_v53, %v2361_v53 }
 0xb03   :  { %v2401_v23 = vpop.f32.mrf.mxu1  ;;  %v2363_v38 = vpop.f32.mrf.mxu0 }
 0xb04   :  { %v2441_v2 = vmul.f32 %v2400_v29, %v2400_v29  ;;  %v2402_v41 = vadd.f32 %v2401_v23, %v2306_v35  ;;  %v2415_v28 = vsel %vm2414_vm4, %v2359_v31, %v2410_v52  ;;  %v2411_v33 = vrot.slane %v2407_v12, 7 }
 0xb05   :  { %v2403_v49 = vpop.f32.mrf.mxu1  ;;  %v2418_v37 = vsel %vm2417_vm6, %v2415_v28, 0.0 }
 0xb06   :  { %v2445_v57 = vrot.slane %v2441_v2, 7  ;;  %v2442_v51 = vmul.f32 %v2402_v41, %v2402_v41  ;;  %v2416_v50 = vsel %vm2414_vm4, %v2361_v53, %v2411_v33 }
 0xb07   :  { %v2404_v4 = vpop.f32.mrf.mxu1  ;;  %v2419_v40 = vsel %vm2417_vm6, %v2416_v50, 0.0 }
 0xb08   :  { %v2449_v44 = vsel %vm2414_vm4, %v2400_v29, %v2445_v57  ;;  %v2446_v56 = vrot.slane %v2442_v51, 7  ;;  %v2420_v54 = vadd.f32 %v2419_v40, %v2418_v37 }
 0xb09   :  { %v2451_v59 = vsel %vm2417_vm6, %v2449_v44, 0.0 }
 0xb0a   :  { %v2450_v42 = vsel %vm2414_vm4, %v2402_v41, %v2446_v56  ;;  %2421 = vadd.xlane.f32.xlu1 %v2420_v54  ;;  %vm8425_vm4 = vmmov %vm8424_vm8 }
 0xb0b   :  { %v2452_v62 = vsel %vm2417_vm6, %v2450_v42, 0.0  ;;  %vm8426_vm6 = vmmov %vm8425_vm4 }
 0xb0c   :  { %v2453_v8 = vadd.f32 %v2452_v62, %v2451_v59  ;;  %vm8429_vm10 = vmmov %vm8425_vm4 }
 0xb0d   :  { %vm8430_vm1 = vmmov %vm8425_vm4 }
 0xb0e   :  { %2454 = vadd.xlane.f32.xlu1 %v2453_v8 }
 0xb93   :  { %v2422_v55 = vpop.xlane.xlu1 %2421 }
 0xb94   :  { %v2423_v35 = vmul.f32 0.00390625, %v2422_v55 }
 0xb96   :  { %v2424_v45 = vmul.f32 %v2423_v35, %v2423_v35  ;;  %v2429_v57 = vsub.f32 %v2359_v31, %v2423_v35  ;;  %v2430_v51 = vsub.f32 %v2361_v53, %v2423_v35 }
 0xb97   :  { %v2455_v1 = vpop.xlane.xlu1 %2454 }
 0xb98   :  { %v2426_v13 = vrot.slane %v2424_v45, 7  ;;  %v2456_v48 = vmul.f32 0.00390625, %v2455_v1 }
 0xb9a   :  { %v2428_v16 = vsub.f32 %v2423_v35, %v2426_v13  ;;  %v2457_v52 = vmul.f32 %v2456_v48, %v2456_v48  ;;  %v2462_v56 = vsub.f32 %v2400_v29, %v2456_v48  ;;  %v2463_v42 = vsub.f32 %v2402_v41, %v2456_v48 }
 0xb9c   :  { %v2431_v12 = vadd.f32 1e-05, %v2428_v16  ;;  %v2459_v23 = vrot.slane %v2457_v52, 7 }
 0xb9e   :  { %4472 = vrsqrt.f32 %v2431_v12  ;;  %v2461_v2 = vsub.f32 %v2456_v48, %v2459_v23 }
 0xba0   :  { %v2464_v38 = vadd.f32 1e-05, %v2461_v2  ;;  %v8421_v2 = vlaneseq }
 0xba2   :  { %4474 = vrsqrt.f32 %v2464_v38  ;;  %v2499_v38 = vshrl.u32 %v8421_v2, 7 }
 0xbab   :  { %v4473_v28 = vpop.eup %4472 }
 0xbac   :  { %2435 = vperm.xlu1 %3870, %v4473_v28   ;;  %v2500_v28 = vsub.s32 0, %v2499_v38 }
 0xbaf   :  { %v4475_v33 = vpop.eup %4474 }
 0xbb0   :  { %2468 = vperm.xlu0 %3789, %v4475_v33  }
 0xc27   :  { %v2436_v49 = vpop.permute.xlu1 %2435 }
 0xc28   :  { %v2437_v50 = vrot.slane %v2436_v49, 1 }
 0xc2a   :  { %v2439_v4 = vmul.f32 %v2437_v50, %v2429_v57  ;;  %v2440_v44 = vmul.f32 %v2437_v50, %v2430_v51 }
 0xc2b   :  { %v2469_v37 = vpop.permute.xlu0 %2468 }
 0xc2c   :  { %v2474_v40 = vsub.f32 0.0, %v2439_v4  ;;  %v2475_v54 = vsub.f32 0.0, %v2440_v44  ;;  %v2470_v59 = vrot.slane %v2469_v37, 1 }
 0xc2e   :  { %v2478_v62 = vmul.f32 1.442695, %v2474_v40  ;;  %v2480_v8 = vmul.f32 1.442695, %v2475_v54  ;;  %v2472_v55 = vmul.f32 %v2470_v59, %v2462_v56  ;;  %v2473_v45 = vmul.f32 %v2470_v59, %v2463_v42 }
 0xc30   :  { %4476 = vpow2.f32 %v2478_v62  ;;  %v2476_v1 = vsub.f32 0.0, %v2472_v55  ;;  %v2477_v13 = vsub.f32 0.0, %v2473_v45 }
 0xc31   :  { %4478 = vpow2.f32 %v2480_v8  ;;  %v2811_v8 = vld [vmem:[%s7513_s2 + $0x30] sm:$0xff] }
 0xc32   :  { %v2482_v16 = vmul.f32 1.442695, %v2476_v1  ;;  %v2484_v31 = vmul.f32 1.442695, %v2477_v13 }
 0xc34   :  { %4480 = vpow2.f32 %v2482_v16 }
 0xc35   :  { %4482 = vpow2.f32 %v2484_v31 }
 0xc3d   :  { %v4477_v53 = vpop.eup %4476 }
 0xc3e   :  { %v4479_v35 = vpop.eup %4478  ;;  %v2486_v29 = vadd.f32 1.0, %v4477_v53 }
 0xc3f   :  { %v2487_v52 = vadd.f32 1.0, %v4479_v35 }
 0xc40   :  { %4484 = vrcp.f32 %v2486_v29 }
 0xc41   :  { %v4481_v12 = vpop.eup %4480  ;;  %4486 = vrcp.f32 %v2487_v52 }
 0xc42   :  { %v4483_v41 = vpop.eup %4482  ;;  %v2488_v48 = vadd.f32 1.0, %v4481_v12 }
 0xc43   :  { %v2489_v23 = vadd.f32 1.0, %v4483_v41 }
 0xc44   :  { %4488 = vrcp.f32 %v2488_v48 }
 0xc45   :  { %4490 = vrcp.f32 %v2489_v23 }
 0xc4d   :  { %v4485_v33 = vpop.eup %4484 }
 0xc4e   :  { %v4487_v49 = vpop.eup %4486  ;;  %v2501_v57 = vrot.slane %v4485_v33, %v2500_v28 }
 0xc4f   :  { %v2505_v51 = vrot.slane %v4487_v49, %v2500_v28 }
 0xc50   :  { %v6994_v50 = vmul.f32 %v2501_v57, %v8414_v15 }
 0xc51   :  { %v4489_v4 = vpop.eup %4488  ;;  %v6997_v44 = vmul.f32 %v2505_v51, %v8413_v3 }
 0xc52   :  { %v4491_v56 = vpop.eup %4490  ;;  %v2509_v37 = vrot.slane %v4489_v4, %v2500_v28  ;;  %v4191_v40 = vpack.i.bf16 %v6994_v50, %v6915_v30 }
 0xc53   :  { %v2513_v54 = vrot.slane %v4491_v56, %v2500_v28  ;;  %v4196_v42 = vpack.i.bf16 %v6997_v44, %v6917_v39 }
 0xc54   :  { %v7004_v59 = vmul.f32 %v2509_v37, %v8412_v24  ;;  %4192 = vrot.lane.b32.xlu0 %v4191_v40, %s4498_s22 }
 0xc55   :  { %v7008_v15 = vmul.f32 %v2513_v54, %v8411_v19  ;;  %4197 = vrot.lane.b32.xlu1 %v4196_v42, %s4498_s22  ;;  %v7044_v19 = vld [vmem:[%s7512_s1 + $0x30] sm:$0xff] }
 0xc56   :  { %v4201_v3 = vpack.i.bf16 %v7004_v59, %v6907_v5  ;;  %v3539_v24 = vcombine.high %v7044_v19, %v7044_v19 }
 0xc57   :  { %v4206_v62 = vpack.i.bf16 %v7008_v15, %v6909_v60 }
 0xc58   :  { %4202 = vrot.lane.b32.xlu0 %v4201_v3, %s4498_s22  ;;  %3588 = vmatprep.mubr.msk.bf16.mxu0 %vm8422_vm9, %v3539_v24  ;;  %vm8427_vm9 = vmmov %vm8425_vm4 }
 0xc59   :  { %4207 = vrot.lane.b32.xlu1 %v4206_v62, %s4498_s22  ;;  %3637 = vmatprep.mubr.msk.bf16.mxu1 %vm8423_vm12, %v3539_v24  ;;  %vm8428_vm12 = vmmov %vm8425_vm4 }
 0xc5c   :  { %4212 = vrot.lane.b32.xlu0 %v4191_v40, %s4496_s20 }
 0xc5d   :  { %4217 = vrot.lane.b32.xlu1 %v4196_v42, %s4496_s20 }
 0xc60   :  { %4222 = vrot.lane.b32.xlu0 %v4201_v3, %s4496_s20 }
 0xc61   :  { %4227 = vrot.lane.b32.xlu1 %v4206_v62, %s4496_s20 }
 0xc64   :  { %4232 = vrot.lane.b32.xlu0 %v4191_v40, %s4499_s0 }
 0xc65   :  { %4237 = vrot.lane.b32.xlu1 %v4196_v42, %s4499_s0 }
 0xc68   :  { %4242 = vrot.lane.b32.xlu0 %v4201_v3, %s4499_s0 }
 0xc69   :  { %4247 = vrot.lane.b32.xlu1 %v4206_v62, %s4499_s0 }
 0xc6c   :  { %4252 = vrot.lane.b32.xlu0 %v4191_v40, %s4501_s24 }
 0xc6d   :  { %4257 = vrot.lane.b32.xlu1 %v4196_v42, %s4501_s24 }
 0xc70   :  { %4262 = vrot.lane.b32.xlu0 %v4201_v3, %s4501_s24 }
 0xc71   :  { %4267 = vrot.lane.b32.xlu1 %v4206_v62, %s4501_s24 }
 0xc74   :  { %4272 = vrot.lane.b32.xlu0 %v4191_v40, %s4500_s23 }
 0xc75   :  { %4277 = vrot.lane.b32.xlu1 %v4196_v42, %s4500_s23 }
 0xc78   :  { %4282 = vrot.lane.b32.xlu0 %v4201_v3, %s4500_s23 }
 0xc79   :  { %4287 = vrot.lane.b32.xlu1 %v4206_v62, %s4500_s23 }
 0xc7c   :  { %4292 = vrot.lane.b32.xlu0 %v4191_v40, %s4504_s26 }
 0xc7d   :  { %4297 = vrot.lane.b32.xlu1 %v4196_v42, %s4504_s26 }
 0xc80   :  { %4302 = vrot.lane.b32.xlu0 %v4201_v3, %s4504_s26 }
 0xc81   :  { %4307 = vrot.lane.b32.xlu1 %v4206_v62, %s4504_s26 }
 0xc84   :  { %4312 = vrot.lane.b32.xlu0 %v4191_v40, %s4503_s25 }
 0xc85   :  { %4317 = vrot.lane.b32.xlu1 %v4196_v42, %s4503_s25 }
 0xc88   :  { %4322 = vrot.lane.b32.xlu0 %v4201_v3, %s4503_s25 }
 0xc89   :  { %4327 = vrot.lane.b32.xlu1 %v4206_v62, %s4503_s25 }
 0xc8c   :  { %4332 = vrot.lane.b32.xlu0 %v4191_v40, %s4497_s21 }
 0xc8d   :  { %4337 = vrot.lane.b32.xlu1 %v4196_v42, %s4497_s21 }
 0xc90   :  { %4342 = vrot.lane.b32.xlu0 %v4201_v3, %s4497_s21 }
 0xc91   :  { %4347 = vrot.lane.b32.xlu1 %v4206_v62, %s4497_s21 }
 0xc94   :  { %2814 = vperm.xlu0 %3789, %v2811_v8  }
 0xcc6   :  { %v4193_v55 = vpop.permute.xlu0 %4192 }
 0xcc7   :  { %v4198_v45 = vpop.permute.xlu1 %4197  ;;  %v4195_v16 = vunpack.i.h.bf16 %v4193_v55  ;;  %v4194_v31 = vunpack.i.l.bf16 %v4193_v55 }
 0xcc8   :  { %v4200_v1 = vunpack.i.h.bf16 %v4198_v45  ;;  %v4199_v13 = vunpack.i.l.bf16 %v4198_v45 }
 0xcca   :  { %v4203_v53 = vpop.permute.xlu0 %4202  ;;  %v2731_v48 = vsel %vm8424_vm8, %v4195_v16, %v4200_v1  ;;  %v2730_v23 = vsel %vm8425_vm4, %v4194_v31, %v4199_v13  ;;  %vm8431_vm8 = vmmov %vm8430_vm1 }
 0xccb   :  { %v4208_v35 = vpop.permute.xlu1 %4207  ;;  %v4205_v29 = vunpack.i.h.bf16 %v4203_v53  ;;  %v4204_v52 = vunpack.i.l.bf16 %v4203_v53  ;;  %v3544_v54 = vpack.c.bf16 %v2731_v48, %v2730_v23  ;;  %vm8434_vm4 = vmpackc.low %vm8294_vm7, %vm8294_vm7 }
 0xccc   :  { %v4210_v12 = vunpack.i.h.bf16 %v4208_v35  ;;  %v4209_v41 = vunpack.i.l.bf16 %v4208_v35 }
 0xccd   :  { %v2729_v2 = vsel %vm8426_vm6, %v4200_v1, %v4205_v29  ;;  %v2728_v38 = vsel %vm8427_vm9, %v4199_v13, %v4204_v52  ;;  %vm8435_vm6 = vmpackc.low %vm8302_vm14, %vm8302_vm14 }
 0xcce   :  { %v2732_v28 = vsel %vm8428_vm12, %v4209_v41, %v4194_v31  ;;  %v2733_v33 = vsel %vm8429_vm10, %v4210_v12, %v4195_v16  ;;  %v2727_v49 = vsel %vm8430_vm1, %v4205_v29, %v4210_v12  ;;  %v2726_v57 = vsel %vm8431_vm8, %v4204_v52, %v4209_v41  ;;  %v4213_v51 = vpop.permute.xlu0 %4212  ;;  %vm8432_vm10 = vmpackc.low %vm8292_vm13, %vm8292_vm13 }
 0xccf   :  { %v3590_v4 = vpack.c.bf16 %v2733_v33, %v2732_v28  ;;  %v3541_v56 = vpack.c.bf16 %v2729_v2, %v2728_v38  ;;  %v3593_v37 = vpack.c.bf16 %v2727_v49, %v2726_v57  ;;  %v4218_v40 = vpop.permute.xlu1 %4217  ;;  %v4215_v62 = vunpack.i.h.bf16 %v4213_v51  ;;  %vm8433_vm1 = vmpackc.low %vm8300_vm15, %vm8300_vm15 }
 0xcd0   :  { %v4220_v42 = vunpack.i.h.bf16 %v4218_v40  ;;  %v4219_v3 = vunpack.i.l.bf16 %v4218_v40  ;;  %v4214_v24 = vunpack.i.l.bf16 %v4213_v51  ;;  %vm8436_vm13 = vcmp.lt.s32.totalorder %v4583_v9, 113 }
 0xcd1   :  { %3542 = vmatprep.subr.msk.bf16.mxu0 %vm8432_vm10, %v3541_v56  ;;  %3591 = vmatprep.subr.msk.bf16.mxu1 %vm8433_vm1, %v3590_v4  ;;  %vm8437_vm15 = vmmov %vm8436_vm13 }
 0xcd2   :  { %3545 = vmatpush1.bf16.msk.msra.mxu0 %vm8434_vm4, %v3544_v54  ;;  %3594 = vmatpush1.bf16.msk.msra.mxu1 %vm8435_vm6, %v3593_v37  ;;  %v4223_v18 = vpop.permute.xlu0 %4222  ;;  %v2699_v13 = vsel %vm8436_vm13, %v4215_v62, %v4220_v42  ;;  %v2698_v32 = vsel %vm8437_vm15, %v4214_v24, %v4219_v3  ;;  %vm8438_vm7 = vmmov %vm8436_vm13  ;;  %vm8446_vm6 = vnez %v8309_v36  ;;  %vm8448_vm15 = vnez %v8316_v17 }
 0xcd3   :  { %v4228_v8 = vpop.permute.xlu1 %4227  ;;  %v4225_v55 = vunpack.i.h.bf16 %v4223_v18  ;;  %v4224_v45 = vunpack.i.l.bf16 %v4223_v18  ;;  %vm8439_vm9 = vmmov %vm8438_vm7  ;;  %v3550_v2 = vpack.c.bf16 %v2699_v13, %v2698_v32 }
 0xcd4   :  { %v4230_v1 = vunpack.i.h.bf16 %v4228_v8  ;;  %v4229_v7 = vunpack.i.l.bf16 %v4228_v8  ;;  %vm8440_vm14 = vmmov %vm8438_vm7 }
 0xcd5   :  { %v2697_v16 = vsel %vm8438_vm7, %v4220_v42, %v4225_v55  ;;  %v2696_v22 = vsel %vm8439_vm9, %v4219_v3, %v4224_v45  ;;  %vm8441_vm12 = vmmov %vm8438_vm7 }
 0xcd6   :  { %v2700_v31 = vsel %vm8440_vm14, %v4229_v7, %v4214_v24  ;;  %v2701_v53 = vsel %vm8441_vm12, %v4230_v1, %v4215_v62  ;;  %vm8442_vm8 = vmmov %vm8438_vm7  ;;  %v4233_v52 = vpop.permute.xlu0 %4232  ;;  %v3547_v41 = vpack.c.bf16 %v2697_v16, %v2696_v22  ;;  %v2791_v22 = vpack.c.bf16 %v6997_v44, %v6917_v39 }
 0xcd7   :  { %v2695_v35 = vsel %vm8442_vm8, %v4225_v55, %v4230_v1  ;;  %vm8443_vm10 = vmmov %vm8438_vm7  ;;  %v3596_v12 = vpack.c.bf16 %v2701_v53, %v2700_v31  ;;  %v4238_v23 = vpop.permute.xlu1 %4237  ;;  %v4235_v33 = vunpack.i.h.bf16 %v4233_v52  ;;  %v4234_v49 = vunpack.i.l.bf16 %v4233_v52 }
 0xcd8   :  { %v2694_v29 = vsel %vm8443_vm10, %v4224_v45, %v4229_v7  ;;  %v4240_v38 = vunpack.i.h.bf16 %v4238_v23  ;;  %v4239_v28 = vunpack.i.l.bf16 %v4238_v23  ;;  %vm8444_vm1 = vmpackc.low %vm8308_vm0, %vm8308_vm0  ;;  %vm8450_vm0 = vcmp.lt.s32.totalorder %v4583_v9, 127 }
 0xcd9   :  { %v3599_v48 = vpack.c.bf16 %v2695_v35, %v2694_v29  ;;  %3548 = vmatprep.subr.msk.bf16.mxu0 %vm8444_vm1, %v3547_v41  ;;  %vm8445_vm4 = vmpackc.low %vm8315_vm11, %vm8315_vm11  ;;  %v2793_v31 = vpack.c.bf16 %v7008_v15, %v6909_v60  ;;  %v2790_v29 = vpack.c.bf16 %v6994_v50, %v6915_v30 }
 0xcda   :  { %3597 = vmatprep.subr.msk.bf16.mxu1 %vm8445_vm4, %v3596_v12  ;;  %vm8447_vm13 = vmpackc.low %vm8446_vm6, %vm8446_vm6  ;;  %v4243_v14 = vpop.permute.xlu0 %4242  ;;  %v2667_v37 = vsel %vm8450_vm0, %v4235_v33, %v4240_v38  ;;  %vm8458_vm4 = vnez %v8322_v25  ;;  %v2792_v12 = vpack.c.bf16 %v7004_v59, %v6907_v5 }
 0xcdb   :  { %3551 = vmatpush1.bf16.msk.msra.mxu0 %vm8447_vm13, %v3550_v2  ;;  %vm8449_vm7 = vmpackc.low %vm8448_vm15, %vm8448_vm15  ;;  %v4248_v57 = vpop.permute.xlu1 %4247  ;;  %v4245_v51 = vunpack.i.h.bf16 %v4243_v14  ;;  %v4244_v4 = vunpack.i.l.bf16 %v4243_v14  ;;  %vm8460_vm13 = vnez %v8329_v58 }
 0xcdc   :  { %3600 = vmatpush1.bf16.msk.msra.mxu1 %vm8449_vm7, %v3599_v48  ;;  %v4250_v56 = vunpack.i.h.bf16 %v4248_v57  ;;  %v4249_v10 = vunpack.i.l.bf16 %v4248_v57  ;;  %vm8451_vm11 = vmmov %vm8450_vm0  ;;  %vm8462_vm7 = vcmp.lt.s32.totalorder %v4583_v9, 1 }
 0xcdd   :  { %v2666_v36 = vsel %vm8451_vm11, %v4234_v49, %v4239_v28  ;;  %vm8452_vm9 = vmmov %vm8450_vm0  ;;  %vm8464_vm11 = vnez %v8324_v6 }
 0xcde   :  { %v2665_v40 = vsel %vm8452_vm9, %v4240_v38, %v4245_v51  ;;  %vm8453_vm14 = vmmov %vm8450_vm0  ;;  %v4253_v24 = vpop.permute.xlu0 %4252  ;;  %v3556_v7 = vpack.c.bf16 %v2667_v37, %v2666_v36 }
 0xcdf   :  { %v2664_v17 = vsel %vm8453_vm14, %v4239_v28, %v4244_v4  ;;  %vm8454_vm12 = vmmov %vm8450_vm0  ;;  %v4258_v45 = vpop.permute.xlu1 %4257  ;;  %v4255_v1 = vunpack.i.h.bf16 %v4253_v24  ;;  %v4254_v16 = vunpack.i.l.bf16 %v4253_v24  ;;  %vm8466_vm14 = vnez %v7862_v11 }
 0xce0   :  { %v2668_v54 = vsel %vm8454_vm12, %v4249_v10, %v4234_v49  ;;  %vm8455_vm8 = vmmov %vm8450_vm0  ;;  %v3553_v8 = vpack.c.bf16 %v2665_v40, %v2664_v17  ;;  %v4260_v13 = vunpack.i.h.bf16 %v4258_v45  ;;  %v4259_v32 = vunpack.i.l.bf16 %v4258_v45 }
 0xce1   :  { %v2669_v42 = vsel %vm8455_vm8, %v4250_v56, %v4235_v33  ;;  %vm8456_vm10 = vmmov %vm8450_vm0 }
 0xce2   :  { %v2663_v3 = vsel %vm8456_vm10, %v4245_v51, %v4250_v56  ;;  %vm8457_vm1 = vmmov %vm8450_vm0  ;;  %v3602_v18 = vpack.c.bf16 %v2669_v42, %v2668_v54  ;;  %v2635_v53 = vsel %vm8462_vm7, %v4255_v1, %v4260_v13  ;;  %v4263_v58 = vpop.permute.xlu0 %4262 }
 0xce3   :  { %v2662_v62 = vsel %vm8457_vm1, %v4244_v4, %v4249_v10  ;;  %vm8459_vm6 = vmpackc.low %vm8458_vm4, %vm8458_vm4  ;;  %v4268_v60 = vpop.permute.xlu1 %4267  ;;  %v4265_v39 = vunpack.i.h.bf16 %v4263_v58  ;;  %v4264_v44 = vunpack.i.l.bf16 %v4263_v58 }
 0xce4   :  { %v3605_v55 = vpack.c.bf16 %v2663_v3, %v2662_v62  ;;  %3554 = vmatprep.subr.msk.bf16.mxu0 %vm8459_vm6, %v3553_v8  ;;  %vm8461_vm15 = vmpackc.low %vm8460_vm13, %vm8460_vm13  ;;  %v4270_v15 = vunpack.i.h.bf16 %v4268_v60  ;;  %v4269_v35 = vunpack.i.l.bf16 %v4268_v60 }
 0xce5   :  { %3603 = vmatprep.subr.msk.bf16.mxu1 %vm8461_vm15, %v3602_v18  ;;  %vm8463_vm0 = vmmov %vm8462_vm7  ;;  %vm8474_vm15 = vnez %v7911_v21 }
 0xce6   :  { %v2634_v25 = vsel %vm8463_vm0, %v4254_v16, %v4259_v32  ;;  %vm8465_vm9 = vmpackc.low %vm8464_vm11, %vm8464_vm11  ;;  %v4273_v50 = vpop.permute.xlu0 %4272 }
 0xce7   :  { %3557 = vmatpush1.bf16.msk.msra.mxu0 %vm8465_vm9, %v3556_v7  ;;  %vm8467_vm12 = vmpackc.low %vm8466_vm14, %vm8466_vm14  ;;  %v3559_v6 = vpack.c.bf16 %v2635_v53, %v2634_v25  ;;  %v4278_v33 = vpop.permute.xlu1 %4277  ;;  %v4275_v5 = vunpack.i.h.bf16 %v4273_v50  ;;  %v4274_v14 = vunpack.i.l.bf16 %v4273_v50  ;;  %vm8478_vm9 = vcmp.lt.s32.totalorder %v4583_v9, 15 }
 0xce8   :  { %3606 = vmatpush1.bf16.msk.msra.mxu1 %vm8467_vm12, %v3605_v55  ;;  %2832 = vmatprep.subr.bf16.mxu0 %v2791_v22  ;;  %vm8468_vm8 = vmmov %vm8463_vm0  ;;  %v4280_v59 = vunpack.i.h.bf16 %v4278_v33  ;;  %v4279_v49 = vunpack.i.l.bf16 %v4278_v33  ;;  %vm8480_vm12 = vnez %v7972_v46 }
 0xce9   :  { %2873 = vmatprep.subr.bf16.mxu1 %v2793_v31  ;;  %v2633_v52 = vsel %vm8468_vm8, %v4260_v13, %v4265_v39  ;;  %vm8469_vm10 = vmmov %vm8463_vm0 }
 0xcea   :  { %v2632_v11 = vsel %vm8469_vm10, %v4259_v32, %v4264_v44  ;;  %vm8470_vm1 = vmmov %vm8463_vm0  ;;  %v2603_v57 = vsel %vm8478_vm9, %v4275_v5, %v4280_v59  ;;  %v4283_v21 = vpop.permute.xlu0 %4282  ;;  %vm8482_vm10 = vnez %v7990_v0 }
 0xceb   :  { %v2636_v41 = vsel %vm8470_vm1, %v4269_v35, %v4254_v16  ;;  %vm8471_vm4 = vmmov %vm8463_vm0  ;;  %2833 = vmatpush1.bf16.msra.mxu0 %v2790_v29  ;;  %v3611_v28 = vpack.c.bf16 %v2633_v52, %v2632_v11  ;;  %v4285_v56 = vunpack.i.h.bf16 %v4283_v21  ;;  %v4284_v10 = vunpack.i.l.bf16 %v4283_v21 }
 0xcec   :  { %v2637_v48 = vsel %vm8471_vm4, %v4270_v15, %v4255_v1  ;;  %vm8472_vm6 = vmmov %vm8463_vm0  ;;  %2874 = vmatpush1.bf16.msra.mxu1 %v2792_v12 }
 0xced   :  { %v2631_v23 = vsel %vm8472_vm6, %v4265_v39, %v4270_v15  ;;  %vm8473_vm13 = vmmov %vm8463_vm0  ;;  %v3562_v2 = vpack.c.bf16 %v2637_v48, %v2636_v41  ;;  %vm8476_vm0 = vnez %v7928_v63  ;;  %v4288_v63 = vpop.permute.xlu1 %4287 }
 0xcee   :  { %v2630_v30 = vsel %vm8473_vm13, %v4264_v44, %v4269_v35  ;;  %vm8475_vm7 = vmpackc.low %vm8474_vm15, %vm8474_vm15  ;;  %v4290_v37 = vunpack.i.h.bf16 %v4288_v63  ;;  %v4289_v36 = vunpack.i.l.bf16 %v4288_v63  ;;  %vm8486_vm13 = vnez %v7875_v26  ;;  %v4293_v3 = vpop.permute.xlu0 %4292 }
 0xcef   :  { %v3608_v38 = vpack.c.bf16 %v2631_v23, %v2630_v30  ;;  %3560 = vmatprep.subr.msk.bf16.mxu0 %vm8475_vm7, %v3559_v6  ;;  %vm8477_vm11 = vmpackc.low %vm8476_vm0, %vm8476_vm0  ;;  %v4295_v26 = vunpack.i.h.bf16 %v4293_v3  ;;  %v4294_v1 = vunpack.i.l.bf16 %v4293_v3  ;;  %v8514_v30 = vld [vmem:[#allocation32_spill] sm:$0xff] }
 0xcf0   :  { %vm8479_vm14 = vmmov %vm8478_vm9 }
 0xcf1   :  { %3609 = vmatprep.subr.msk.bf16.mxu1 %vm8477_vm11, %v3608_v38  ;;  %v2602_v51 = vsel %vm8479_vm14, %v4274_v14, %v4279_v49  ;;  %vm8481_vm8 = vmpackc.low %vm8480_vm12, %vm8480_vm12  ;;  %v4298_v8 = vpop.permute.xlu1 %4297  ;;  %vm8492_vm14 = vnez %v7952_v47 }
 0xcf2   :  { %3563 = vmatpush1.bf16.msk.msra.mxu0 %vm8481_vm8, %v3562_v2  ;;  %v3565_v4 = vpack.c.bf16 %v2603_v57, %v2602_v51  ;;  %vm8483_vm1 = vmpackc.low %vm8482_vm10, %vm8482_vm10  ;;  %v4300_v55 = vunpack.i.h.bf16 %v4298_v8  ;;  %v4299_v45 = vunpack.i.l.bf16 %v4298_v8  ;;  %vm8494_vm8 = vnez %v7918_v27  ;;  %v4303_v47 = vpop.permute.xlu0 %4302 }
 0xcf3   :  { %3612 = vmatpush1.bf16.msk.msra.mxu1 %vm8483_vm1, %v3611_v28  ;;  %vm8484_vm4 = vmmov %vm8478_vm9  ;;  %vm8496_vm1 = vcmp.lt.s32.totalorder %v4583_v9, 16  ;;  %v4305_v22 = vunpack.i.h.bf16 %v4303_v47  ;;  %v4304_v31 = vunpack.i.l.bf16 %v4303_v47 }
 0xcf4   :  { %v2601_v40 = vsel %vm8484_vm4, %v4280_v59, %v4285_v56  ;;  %vm8485_vm6 = vmmov %vm8484_vm4  ;;  %v2571_v7 = vsel %vm8496_vm1, %v4295_v26, %v4300_v55 }
 0xcf5   :  { %v2600_v46 = vsel %vm8485_vm6, %v4279_v49, %v4284_v10  ;;  %vm8487_vm15 = vmpackc.low %vm8486_vm13, %vm8486_vm13  ;;  %vm8498_vm6 = vnez %v8358_v61  ;;  %v4308_v16 = vpop.permute.xlu1 %4307 }
 0xcf6   :  { %3566 = vmatprep.subr.msk.bf16.mxu0 %vm8487_vm15, %v3565_v4  ;;  %vm8488_vm7 = vmmov %vm8484_vm4  ;;  %v3617_v18 = vpack.c.bf16 %v2601_v40, %v2600_v46  ;;  %v4310_v27 = vunpack.i.h.bf16 %v4308_v16  ;;  %v4309_v53 = vunpack.i.l.bf16 %v4308_v16  ;;  %v4313_v15 = vpop.permute.xlu0 %4312 }
 0xcf7   :  { %v2604_v0 = vsel %vm8488_vm7, %v4289_v36, %v4274_v14  ;;  %vm8489_vm0 = vmmov %vm8484_vm4  ;;  %v4314_v41 = vunpack.i.l.bf16 %v4313_v15 }
 0xcf8   :  { %v2605_v17 = vsel %vm8489_vm0, %v4290_v37, %v4275_v5  ;;  %vm8490_vm11 = vmmov %vm8489_vm0 }
 0xcf9   :  { %v2599_v54 = vsel %vm8490_vm11, %v4285_v56, %v4290_v37  ;;  %vm8491_vm9 = vmmov %vm8489_vm0  ;;  %v3568_v62 = vpack.c.bf16 %v2605_v17, %v2604_v0  ;;  %vm8502_vm0 = vnez %v8363_v43  ;;  %v4318_v52 = vpop.permute.xlu1 %4317  ;;  %v4315_v43 = vunpack.i.h.bf16 %v4313_v15 }
 0xcfa   :  { %v2598_v42 = vsel %vm8491_vm9, %v4284_v10, %v4289_v36  ;;  %vm8493_vm12 = vmpackc.low %vm8492_vm14, %vm8492_vm14  ;;  %v4320_v11 = vunpack.i.h.bf16 %v4318_v52  ;;  %v4319_v12 = vunpack.i.l.bf16 %v4318_v52 }
 0xcfb   :  { %v3614_v24 = vpack.c.bf16 %v2599_v54, %v2598_v42  ;;  %3569 = vmatpush1.bf16.msk.msra.mxu0 %vm8493_vm12, %v3568_v62  ;;  %vm8495_vm10 = vmpackc.low %vm8494_vm8, %vm8494_vm8  ;;  %v8527_v54 = vld [vmem:[#allocation41_spill] sm:$0xff]  ;;  %v8530_v42 = vld [vmem:[#allocation43_spill] sm:$0xff] }
 0xcfc   :  { %vm8497_vm4 = vmmov %vm8496_vm1 }
 0xcfd   :  { %3615 = vmatprep.subr.msk.bf16.mxu1 %vm8495_vm10, %v3614_v24  ;;  %v2570_v13 = vsel %vm8497_vm4, %v4294_v1, %v4299_v45  ;;  %vm8499_vm13 = vmpackc.low %vm8498_vm6, %vm8498_vm6  ;;  %vm8508_vm10 = vnez %v8366_v34  ;;  %vm8510_vm4 = vnez %v8372_v20  ;;  %v4323_v34 = vpop.permute.xlu0 %4322  ;;  %v4328_v2 = vpop.permute.xlu1 %4327 }
 0xcfe   :  { %3618 = vmatpush1.bf16.msk.msra.mxu1 %vm8499_vm13, %v3617_v18  ;;  %v3571_v32 = vpack.c.bf16 %v2571_v7, %v2570_v13  ;;  %vm8500_vm15 = vmmov %vm8496_vm1  ;;  %vm8512_vm13 = vcmp.lt.s32.totalorder %v4583_v9, 17  ;;  %v4325_v38 = vunpack.i.h.bf16 %v4323_v34  ;;  %v4324_v28 = vunpack.i.l.bf16 %v4323_v34 }
 0xcff   :  { %v2569_v25 = vsel %vm8500_vm15, %v4300_v55, %v4305_v22  ;;  %vm8501_vm7 = vmmov %vm8496_vm1  ;;  %v2539_v48 = vsel %vm8512_vm13, %v4315_v43, %v4320_v11  ;;  %v4330_v20 = vunpack.i.h.bf16 %v4328_v2  ;;  %v4329_v33 = vunpack.i.l.bf16 %v4328_v2 }
 0xd00   :  { %v2568_v58 = vsel %vm8501_vm7, %v4299_v45, %v4304_v31  ;;  %vm8503_vm11 = vmpackc.low %vm8502_vm0, %vm8502_vm0  ;;  %vm8515_vm7 = vnez %v8514_v30 }
 0xd01   :  { %3572 = vmatprep.subr.msk.bf16.mxu0 %vm8503_vm11, %v3571_v32  ;;  %vm8504_vm9 = vmmov %vm8496_vm1  ;;  %v3623_v6 = vpack.c.bf16 %v2569_v25, %v2568_v58  ;;  %v4333_v4 = vpop.permute.xlu0 %4332  ;;  %v4338_v37 = vpop.permute.xlu1 %4337  ;;  %v8541_v25 = vld [vmem:[#allocation16_spill] sm:$0xff] }
 0xd02   :  { %v2572_v61 = vsel %vm8504_vm9, %v4309_v53, %v4294_v1  ;;  %vm8505_vm14 = vmmov %vm8496_vm1  ;;  %v4340_v36 = vunpack.i.h.bf16 %v4338_v37  ;;  %v4339_v40 = vunpack.i.l.bf16 %v4338_v37  ;;  %v4335_v46 = vunpack.i.h.bf16 %v4333_v4 }
 0xd03   :  { %v2573_v60 = vsel %vm8505_vm14, %v4310_v27, %v4295_v26  ;;  %vm8506_vm12 = vmmov %vm8496_vm1  ;;  %v4334_v0 = vunpack.i.l.bf16 %v4333_v4 }
 0xd04   :  { %v2567_v39 = vsel %vm8506_vm12, %v4305_v22, %v4310_v27  ;;  %vm8507_vm8 = vmmov %vm8496_vm1  ;;  %v3574_v35 = vpack.c.bf16 %v2573_v60, %v2572_v61  ;;  %v3538_v61 = vcombine.low %v7044_v19, %v7044_v19  ;;  %v8546_v60 = vld [vmem:[#allocation12_spill] sm:$0xff] }
 0xd05   :  { %v2566_v44 = vsel %vm8507_vm8, %v4304_v31, %v4309_v53  ;;  %vm8509_vm1 = vmpackc.low %vm8508_vm10, %vm8508_vm10  ;;  %v4343_v3 = vpop.permute.xlu0 %4342  ;;  %v4348_v62 = vpop.permute.xlu1 %4347 }
 0xd06   :  { %v3620_v29 = vpack.c.bf16 %v2567_v39, %v2566_v44  ;;  %3575 = vmatpush1.bf16.msk.msra.mxu0 %vm8509_vm1, %v3574_v35  ;;  %vm8511_vm6 = vmpackc.low %vm8510_vm4, %vm8510_vm4  ;;  %vm8528_vm4 = vnez %v8527_v54  ;;  %v4345_v24 = vunpack.i.h.bf16 %v4343_v3  ;;  %v4344_v18 = vunpack.i.l.bf16 %v4343_v3  ;;  %v8549_v39 = vld [vmem:[#allocation21_spill] sm:$0xff] }
 0xd07   :  { %vm8513_vm15 = vmmov %vm8512_vm13  ;;  %v4350_v8 = vunpack.i.h.bf16 %v4348_v62  ;;  %v4349_v26 = vunpack.i.l.bf16 %v4348_v62  ;;  %v8552_v44 = vmov 0  }
 0xd08   :  { %3621 = vmatprep.subr.msk.bf16.mxu1 %vm8511_vm6, %v3620_v29  ;;  %v2538_v23 = vsel %vm8513_vm15, %v4314_v41, %v4319_v12  ;;  %vm8516_vm0 = vmpackc.low %vm8515_vm7, %vm8515_vm7 }
 0xd09   :  { %3624 = vmatpush1.bf16.msk.msra.mxu1 %vm8516_vm0, %v3623_v6  ;;  %v3577_v50 = vpack.c.bf16 %v2539_v48, %v2538_v23  ;;  %vm8517_vm11 = vmmov %vm8512_vm13  ;;  %vm8531_vm13 = vnez %v8530_v42 }
 0xd0a   :  { %v2537_v5 = vsel %vm8517_vm11, %v4320_v11, %v4325_v38  ;;  %vm8518_vm9 = vmmov %vm8517_vm11 }
 0xd0b   :  { %v2536_v59 = vsel %vm8518_vm9, %v4319_v12, %v4324_v28  ;;  %vm8520_vm14 = vmpackc.low %vm8380_vm3, %vm8380_vm3 }
 0xd0c   :  { %3578 = vmatprep.subr.msk.bf16.mxu0 %vm8520_vm14, %v3577_v50  ;;  %vm8521_vm12 = vmmov %vm8518_vm9  ;;  %v3629_v10 = vpack.c.bf16 %v2537_v5, %v2536_v59 }
 0xd0d   :  { %v2540_v14 = vsel %vm8521_vm12, %v4329_v33, %v4314_v41  ;;  %vm8522_vm8 = vmmov %vm8518_vm9 }
 0xd0e   :  { %v2541_v57 = vsel %vm8522_vm8, %v4330_v20, %v4315_v43  ;;  %vm8523_vm10 = vmmov %vm8522_vm8 }
 0xd0f   :  { %v2535_v51 = vsel %vm8523_vm10, %v4325_v38, %v4330_v20  ;;  %vm8524_vm1 = vmmov %vm8522_vm8  ;;  %v3580_v63 = vpack.c.bf16 %v2541_v57, %v2540_v14  ;;  %vm8542_vm10 = vnez %v8541_v25  ;;  %v2815_v35 = vpop.permute.xlu0 %2814 }
 0xd10   :  { %v2534_v21 = vsel %vm8524_vm1, %v4324_v28, %v4329_v33  ;;  %vm8526_vm3 = vmpackc.low %vm8384_vm5, %vm8384_vm5  ;;  %vm8533_vm5 = vcmp.lt.s32.totalorder %v4583_v9, 111 }
 0xd11   :  { %v3626_v56 = vpack.c.bf16 %v2535_v51, %v2534_v21  ;;  %3581 = vmatpush1.bf16.msk.msra.mxu0 %vm8526_vm3, %v3580_v63  ;;  %vm8529_vm6 = vmpackc.low %vm8528_vm4, %vm8528_vm4  ;;  %v2763_v55 = vsel %vm8533_vm5, %v4335_v46, %v4340_v36  ;;  %vm8547_vm4 = vnez %v8546_v60 }
 0xd12   :  { %vm8532_vm15 = vmpackc.low %vm8531_vm13, %vm8531_vm13  ;;  %vm8550_vm13 = vnez %v8549_v39 }
 0xd13   :  { %3627 = vmatprep.subr.msk.bf16.mxu1 %vm8529_vm6, %v3626_v56  ;;  %vm8534_vm7 = vmmov %vm8533_vm5 }
 0xd14   :  { %3630 = vmatpush1.bf16.msk.msra.mxu1 %vm8532_vm15, %v3629_v10  ;;  %v2762_v45 = vsel %vm8534_vm7, %v4334_v0, %v4339_v40  ;;  %vm8535_vm0 = vmmov %vm8533_vm5 }
 0xd15   :  { %v2761_v1 = vsel %vm8535_vm0, %v4340_v36, %v4345_v24  ;;  %vm8536_vm11 = vmmov %vm8535_vm0  ;;  %v3586_v53 = vpack.c.bf16 %v2763_v55, %v2762_v45 }
 0xd16   :  { %v2760_v7 = vsel %vm8536_vm11, %v4339_v40, %v4344_v18  ;;  %vm8537_vm9 = vmmov %vm8535_vm0 }
 0xd17   :  { %v2764_v13 = vsel %vm8537_vm9, %v4349_v26, %v4334_v0  ;;  %vm8538_vm14 = vmmov %vm8535_vm0  ;;  %v3583_v31 = vpack.c.bf16 %v2761_v1, %v2760_v7 }
 0xd18   :  { %v2765_v47 = vsel %vm8538_vm14, %v4350_v8, %v4335_v46  ;;  %vm8539_vm12 = vmmov %vm8535_vm0 }
 0xd19   :  { %v2759_v32 = vsel %vm8539_vm12, %v4345_v24, %v4350_v8  ;;  %vm8540_vm8 = vmmov %vm8535_vm0  ;;  %v3632_v22 = vpack.c.bf16 %v2765_v47, %v2764_v13 }
 0xd1a   :  { %v2758_v16 = vsel %vm8540_vm8, %v4344_v18, %v4349_v26  ;;  %vm8543_vm1 = vmpackc.low %vm8542_vm10, %vm8542_vm10 }
 0xd1b   :  { %v3635_v27 = vpack.c.bf16 %v2759_v32, %v2758_v16  ;;  %3584 = vmatprep.subr.msk.bf16.mxu0 %vm8543_vm1, %v3583_v31  ;;  %vm8545_vm3 = vmpackc.low %vm8407_vm2, %vm8407_vm2  ;;  %vm8556_vm1 = vcmask 1043456  }
 0xd1c   :  { %3633 = vmatprep.subr.msk.bf16.mxu1 %vm8545_vm3, %v3632_v22  ;;  %vm8548_vm6 = vmpackc.low %vm8547_vm4, %vm8547_vm4 }
 0xd1d   :  { %3587 = vmatpush2.bf16.msk.msra.mxu0 %vm8548_vm6, %v3586_v53  ;;  %vm8551_vm15 = vmpackc.low %vm8550_vm13, %vm8550_vm13 }
 0xd1e   :  { %3636 = vmatpush2.bf16.msk.msra.mxu1 %vm8551_vm15, %v3635_v27  ;;  %v3105_v27 = vld [vmem:[%s7513_s2 + $0x38] sm:$0x7]  ;;  %vm8553_vm9 = vmmov %vm8540_vm8  ;;  %vm8563_vm15 = vcmp.lt.s32.totalorder %v4583_v9, 112 }
 0xd1f   :  { %vm8554_vm14 = vmmov %vm8540_vm8 }
 0xd20   :  { %2859 = vmatmul.mubr.bf16.vlgmr.msra.gmra.mxu0 %v3538_v61  ;;  %vm8555_vm12 = vmmov %vm8540_vm8 }
 0xd21   :  { %2900 = vmatmul.mubr.bf16.vlgmr.msra.gmra.mxu1 %v3538_v61  ;;  %3158 = vmatprep.mubr.bf16.mxu0 %v8552_v44  ;;  %vm8557_vm3 = vmmov %vm8556_vm1 }
 0xd22   :  { %3199 = vmatprep.mubr.bf16.mxu1 %v8552_v44 }
 0xde0   :  { %v2860_v15 = vpop.f32.mrf.mxu0 }
 0xde1   :  { %v2901_v19 = vpop.f32.mrf.mxu1  ;;  %v2861_v52 = vadd.f32 %v2860_v15, %v2815_v35 }
 0xde2   :  { %v2862_v29 = vpop.f32.mrf.mxu0  ;;  %v2902_v43 = vadd.f32 %v2901_v19, %v2815_v35 }
 0xde3   :  { %v2903_v6 = vpop.f32.mrf.mxu1  ;;  %v2863_v11 = vadd.f32 %v2862_v29, %v2815_v35  ;;  %v2908_v28 = vmul.f32 %v2861_v52, %v2861_v52 }
 0xde4   :  { %v2904_v12 = vadd.f32 %v2903_v6, %v2815_v35  ;;  %v2864_v41 = vpop.f32.mrf.mxu0  ;;  %v2926_v20 = vmul.f32 %v2902_v43, %v2902_v43 }
 0xde5   :  { %v2905_v48 = vpop.f32.mrf.mxu1  ;;  %v2909_v23 = vmul.f32 %v2863_v11, %v2863_v11  ;;  %v2910_v50 = vadd.f32 %v2863_v11, %v2861_v52 }
 0xde6   :  { %v2927_v30 = vmul.f32 %v2904_v12, %v2904_v12  ;;  %v2928_v34 = vadd.f32 %v2904_v12, %v2902_v43  ;;  %v2865_v2 = vpop.f32.mrf.mxu0 }
 0xde7   :  { %v2906_v38 = vpop.f32.mrf.mxu1  ;;  %2911 = vadd.xlane.f32.xlu1 %v2910_v50  ;;  %v2913_v5 = vadd.f32 %v2909_v23, %v2908_v28 }
 0xde8   :  { %2929 = vadd.xlane.f32.xlu0 %v2928_v34  ;;  %v2931_v33 = vadd.f32 %v2927_v30, %v2926_v20 }
 0xdeb   :  { %2932 = vadd.xlane.f32.xlu1 %v2931_v33 }
 0xdec   :  { %2914 = vadd.xlane.f32.xlu0 %v2913_v5 }
 0xe70   :  { %v2912_v49 = vpop.xlane.xlu1 %2911 }
 0xe71   :  { %v2930_v59 = vpop.xlane.xlu0 %2929  ;;  %v2916_v57 = vmul.f32 0.00390625, %v2912_v49 }
 0xe72   :  { %v2934_v14 = vmul.f32 0.00390625, %v2930_v59 }
 0xe73   :  { %v2918_v56 = vmul.f32 %v2916_v57, %v2916_v57  ;;  %v2920_v42 = vsub.f32 %v2861_v52, %v2916_v57  ;;  %v2921_v3 = vsub.f32 %v2863_v11, %v2916_v57 }
 0xe74   :  { %v2933_v51 = vpop.xlane.xlu1 %2932  ;;  %v2936_v4 = vmul.f32 %v2934_v14, %v2934_v14  ;;  %v2938_v0 = vsub.f32 %v2902_v43, %v2934_v14  ;;  %v2939_v17 = vsub.f32 %v2904_v12, %v2934_v14 }
 0xe75   :  { %v2915_v21 = vpop.xlane.xlu0 %2914  ;;  %v2935_v63 = vmul.f32 0.00390625, %v2933_v51 }
 0xe76   :  { %v2917_v10 = vmul.f32 0.00390625, %v2915_v21 }
 0xe77   :  { %v2937_v37 = vsub.f32 %v2935_v63, %v2936_v4 }
 0xe78   :  { %v2919_v36 = vsub.f32 %v2917_v10, %v2918_v56 }
 0xe79   :  { %v2940_v40 = vadd.f32 1e-05, %v2937_v37 }
 0xe7a   :  { %v2922_v46 = vadd.f32 1e-05, %v2919_v36 }
 0xe7b   :  { %4492 = vrsqrt.f32 %v2940_v40 }
 0xe7c   :  { %4494 = vrsqrt.f32 %v2922_v46 }
 0xe88   :  { %v4493_v54 = vpop.eup %4492 }
 0xe89   :  { %v4495_v62 = vpop.eup %4494  ;;  %v2942_v24 = vmul.f32 %v4493_v54, %v2938_v0  ;;  %v2943_v18 = vmul.f32 %v4493_v54, %v2939_v17 }
 0xe8a   :  { %v2924_v8 = vmul.f32 %v4495_v62, %v2920_v42  ;;  %v2925_v26 = vmul.f32 %v4495_v62, %v2921_v3 }
 0xe8b   :  { %vm2946_vm5 = vcmp.ge.f32.partialorder %v2942_v24, 0.0  ;;  %vm2947_vm7 = vcmp.ge.f32.partialorder %v2943_v18, 0.0  ;;  %v2950_v55 = vmul.f32 0.25, %v2942_v24  ;;  %v2951_v45 = vmul.f32 0.25, %v2943_v18 }
 0xe8c   :  { %vm2944_vm0 = vcmp.ge.f32.partialorder %v2924_v8, 0.0  ;;  %vm2945_vm11 = vcmp.ge.f32.partialorder %v2925_v26, 0.0  ;;  %v2948_v1 = vmul.f32 0.25, %v2924_v8  ;;  %v2949_v7 = vmul.f32 0.25, %v2925_v26 }
 0xe8d   :  { %v7357_v13 = vsel %vm2946_vm5, %v2942_v24, %v2950_v55  ;;  %v7359_v47 = vsel %vm2947_vm7, %v2943_v18, %v2951_v45  ;;  %vm8564_vm5 = vmmov %vm8556_vm1 }
 0xe8e   :  { %v7361_v32 = vsel %vm2944_vm0, %v2924_v8, %v2948_v1  ;;  %v7363_v16 = vsel %vm2945_vm11, %v2925_v26, %v2949_v7  ;;  %v4356_v22 = vpack.i.bf16 %v7359_v47, %v7357_v13  ;;  %vm8565_vm7 = vmmov %vm8563_vm15  ;;  %v8568_v8 = vld [vmem:[#allocation23_spill] sm:$0xff]  ;;  %v8570_v26 = vld [vmem:[#allocation25_spill] sm:$0xff] }
 0xe8f   :  { %v4351_v31 = vpack.i.bf16 %v7363_v16, %v7361_v32  ;;  %vm8566_vm0 = vmmov %vm8565_vm7 }
 0xe90   :  { %4357 = vrot.lane.b32.xlu1 %v4356_v22, %s4497_s21  ;;  %vm8567_vm11 = vmmov %vm8566_vm0 }
 0xe91   :  { %4352 = vrot.lane.b32.xlu0 %v4351_v31, %s4497_s21 }
 0xe94   :  { %4362 = vrot.lane.b32.xlu1 %v4351_v31, %s4496_s20 }
 0xe95   :  { %4367 = vrot.lane.b32.xlu0 %v4356_v22, %s4496_s20 }
 0xe98   :  { %4372 = vrot.lane.b32.xlu1 %v4351_v31, %s4498_s22 }
 0xe99   :  { %4377 = vrot.lane.b32.xlu0 %v4356_v22, %s4498_s22 }
 0xe9c   :  { %4382 = vrot.lane.b32.xlu1 %v4351_v31, %s4499_s0 }
 0xe9d   :  { %4387 = vrot.lane.b32.xlu0 %v4356_v22, %s4499_s0 }
 0xea0   :  { %4392 = vrot.lane.b32.xlu1 %v4351_v31, %s4500_s23 }
 0xea1   :  { %4397 = vrot.lane.b32.xlu0 %v4356_v22, %s4500_s23 }
 0xea4   :  { %4402 = vrot.lane.b32.xlu1 %v4351_v31, %s4501_s24 }
 0xea5   :  { %4407 = vrot.lane.b32.xlu0 %v4356_v22, %s4501_s24 }
 0xea8   :  { %4412 = vrot.lane.b32.xlu1 %v4351_v31, %s4503_s25 }
 0xea9   :  { %4417 = vrot.lane.b32.xlu0 %v4356_v22, %s4503_s25 }
 0xeac   :  { %4422 = vrot.lane.b32.xlu1 %v4351_v31, %s4504_s26 }
 0xead   :  { %4427 = vrot.lane.b32.xlu0 %v4356_v22, %s4504_s26  ;;  %v8576_v22 = vld [vmem:[#allocation26_spill] sm:$0xff] }
 0xeb0   :  { %3108 = vperm.xlu1 %3870, %v3105_v27  }
 0xf02   :  { %v4358_v53 = vpop.permute.xlu1 %4357 }
 0xf03   :  { %v4360_v61 = vunpack.i.h.bf16 %v4358_v53  ;;  %v4359_v44 = vunpack.i.l.bf16 %v4358_v53  ;;  %v4353_v15 = vpop.permute.xlu0 %4352 }
 0xf04   :  { %v4355_v19 = vunpack.i.h.bf16 %v4353_v15  ;;  %v4354_v35 = vunpack.i.l.bf16 %v4353_v15  ;;  %v8578_v15 = vld [vmem:[#allocation28_spill] sm:$0xff] }
 0xf05   :  { %v3076_v29 = vsel %vm8553_vm9, %v4359_v44, %v4360_v61  ;;  %vm8569_vm9 = vnez %v8568_v8 }
 0xf06   :  { %v3077_v6 = vsel %vm8554_vm14, %v4355_v19, %v4359_v44  ;;  %v3078_v52 = vsel %vm8555_vm12, %v4354_v35, %v4355_v19  ;;  %v3079_v43 = vsel %vm8540_vm8, %v4360_v61, %v4354_v35  ;;  %v4363_v11 = vpop.permute.xlu1 %4362  ;;  %v3082_v12 = vsel %vm8550_vm13, %v3076_v29, 0.0 }
 0xf07   :  { %v3081_v41 = vsel %vm8542_vm10, %v3077_v6, 0.0  ;;  %v3083_v48 = vsel %vm8407_vm2, %v3079_v43, 0.0  ;;  %v4365_v23 = vunpack.i.h.bf16 %v4363_v11  ;;  %v4368_v30 = vpop.permute.xlu0 %4367  ;;  %v4364_v34 = vunpack.i.l.bf16 %v4363_v11  ;;  %vm8558_vm2 = vmmov %vm8556_vm1  ;;  %v8580_v43 = vld [vmem:[#allocation27_spill] sm:$0xff]  ;;  %v8582_v11 = vld [vmem:[#allocation29_spill] sm:$0xff] }
 0xf08   :  { %v4370_v50 = vunpack.i.h.bf16 %v4368_v30  ;;  %v3101_v2 = vpack.c.bf16 %v3081_v41, %v3081_v41  ;;  %v3103_v38 = vpack.c.bf16 %v3083_v48, %v3083_v48  ;;  %v4369_v28 = vunpack.i.l.bf16 %v4368_v30 }
 0xf09   :  { %v3080_v20 = vsel %vm8547_vm4, %v3078_v52, 0.0  ;;  %v3102_v33 = vpack.c.bf16 %v3082_v12, %v3082_v12  ;;  %vm8559_vm10 = vcmp.lt.s32.totalorder %v4583_v9, 113  ;;  %vm8571_vm14 = vnez %v8570_v26 }
 0xf0a   :  { %3638 = vmatprep.subr.msk.bf16.mxu0 %vm8556_vm1, %v3101_v2  ;;  %3664 = vmatprep.subr.msk.bf16.mxu1 %vm8557_vm3, %v3103_v38  ;;  %v4373_v25 = vpop.permute.xlu1 %4372  ;;  %v3100_v59 = vpack.c.bf16 %v3080_v20, %v3080_v20  ;;  %v3046_v14 = vsel %vm8559_vm10, %v4364_v34, %v4365_v23  ;;  %vm8560_vm6 = vmmov %vm8559_vm10  ;;  %vm8572_vm12 = vcmp.lt.s32.totalorder %v4583_v9, 127  ;;  %vm8579_vm10 = vnez %v8578_v15 }
 0xf0b   :  { %v4375_v39 = vunpack.i.h.bf16 %v4373_v25  ;;  %v4374_v5 = vunpack.i.l.bf16 %v4373_v25  ;;  %v4378_v58 = vpop.permute.xlu0 %4377  ;;  %v3121_v49 = vsel %vm8558_vm2, %v3102_v33, 0  ;;  %v3047_v57 = vsel %vm8560_vm6, %v4370_v50, %v4364_v34  ;;  %vm8561_vm4 = vmmov %vm8560_vm6 }
 0xf0c   :  { %v4380_v60 = vunpack.i.h.bf16 %v4378_v58  ;;  %v4379_v51 = vunpack.i.l.bf16 %v4378_v58  ;;  %3174 = vmatpush1.bf16.msra.mxu1 %v3121_v49  ;;  %v3044_v21 = vsel %vm8561_vm4, %v4369_v28, %v4370_v50  ;;  %vm8562_vm13 = vmmov %vm8561_vm4  ;;  %v3115_v56 = vsel %vm8564_vm5, %v3100_v59, 0 }
 0xf0d   :  { %v3045_v4 = vsel %vm8562_vm13, %v4365_v23, %v4369_v28  ;;  %v3062_v63 = vsel %vm8563_vm15, %v4374_v5, %v4375_v39  ;;  %3133 = vmatpush1.bf16.msra.mxu0 %v3115_v56  ;;  %vm8573_vm8 = vmmov %vm8572_vm12  ;;  %vm8577_vm2 = vnez %v8576_v22  ;;  %vm8581_vm6 = vnez %v8580_v43  ;;  %v8602_v56 = vld [vmem:[#allocation39_spill] sm:$0xff]  ;;  %v8614_v22 = vld [vmem:[#allocation44_spill] sm:$0xff] }
 0xf0e   :  { %v3643_v10 = vpack.c.bf16 %v3062_v63, %v3046_v14  ;;  %v3063_v37 = vsel %vm8565_vm7, %v4380_v60, %v4374_v5  ;;  %v3060_v36 = vsel %vm8566_vm0, %v4379_v51, %v4380_v60  ;;  %v3061_v40 = vsel %vm8567_vm11, %v4375_v39, %v4379_v51  ;;  %v4383_v46 = vpop.permute.xlu1 %4382  ;;  %vm8574_vm1 = vmmov %vm8573_vm8  ;;  %v8596_v60 = vld [vmem:[#allocation34_spill] sm:$0xff]  ;;  %v8600_v63 = vld [vmem:[#allocation37_spill] sm:$0xff] }
 0xf0f   :  { %v3640_v0 = vpack.c.bf16 %v3061_v40, %v3045_v4  ;;  %v3666_v17 = vpack.c.bf16 %v3063_v37, %v3047_v57  ;;  %v3669_v54 = vpack.c.bf16 %v3060_v36, %v3044_v21  ;;  %v4385_v42 = vunpack.i.h.bf16 %v4383_v46  ;;  %v4388_v3 = vpop.permute.xlu0 %4387  ;;  %vm8575_vm3 = vmmov %vm8574_vm1  ;;  %v8598_v4 = vld [vmem:[#allocation35_spill] sm:$0xff] }
 0xf10   :  { %v4384_v62 = vunpack.i.l.bf16 %v4383_v46  ;;  %v4390_v24 = vunpack.i.h.bf16 %v4388_v3  ;;  %v4389_v18 = vunpack.i.l.bf16 %v4388_v3  ;;  %vm8583_vm4 = vnez %v8582_v11 }
 0xf11   :  { %3641 = vmatprep.subr.msk.bf16.mxu0 %vm8569_vm9, %v3640_v0  ;;  %3667 = vmatprep.subr.msk.bf16.mxu1 %vm8571_vm14, %v3666_v17  ;;  %vm8588_vm5 = vcmp.lt.s32.totalorder %v4583_v9, 15  ;;  %vm8592_vm9 = vcmp.lt.s32.totalorder %v4583_v9, 1 }
 0xf12   :  { %v3030_v55 = vsel %vm8572_vm12, %v4384_v62, %v4385_v42  ;;  %v3031_v45 = vsel %vm8573_vm8, %v4390_v24, %v4384_v62  ;;  %v3028_v1 = vsel %vm8574_vm1, %v4389_v18, %v4390_v24  ;;  %v3029_v7 = vsel %vm8575_vm3, %v4385_v42, %v4389_v18  ;;  %3644 = vmatpush1.bf16.msk.msra.mxu0 %vm8577_vm2, %v3643_v10  ;;  %v4393_v31 = vpop.permute.xlu1 %4392  ;;  %vm8589_vm7 = vmmov %vm8588_vm5 }
 0xf13   :  { %v3649_v27 = vpack.c.bf16 %v3030_v55, %v7361_v32  ;;  %v3672_v53 = vpack.c.bf16 %v3031_v45, %v7359_v47  ;;  %v3646_v61 = vpack.c.bf16 %v3029_v7, %v7363_v16  ;;  %v3675_v44 = vpack.c.bf16 %v3028_v1, %v7357_v13  ;;  %3670 = vmatpush1.bf16.msk.msra.mxu1 %vm8579_vm10, %v3669_v54  ;;  %v4398_v19 = vpop.permute.xlu0 %4397  ;;  %v8584_v32 = vld [vmem:[#allocation30_spill] sm:$0xff]  ;;  %v8586_v16 = vld [vmem:[#allocation33_spill] sm:$0xff]  ;;  %vm8590_vm0 = vmmov %vm8588_vm5 }
 0xf14   :  { %v4395_v35 = vunpack.i.h.bf16 %v4393_v31  ;;  %v4394_v29 = vunpack.i.l.bf16 %v4393_v31  ;;  %v4400_v6 = vunpack.i.h.bf16 %v4398_v19  ;;  %v4399_v52 = vunpack.i.l.bf16 %v4398_v19  ;;  %vm8591_vm11 = vmmov %vm8590_vm0  ;;  %v8612_v7 = vld [vmem:[#allocation40_spill] sm:$0xff]  ;;  %v8616_v31 = vld [vmem:[#allocation45_spill] sm:$0xff] }
 0xf15   :  { %3647 = vmatprep.subr.msk.bf16.mxu0 %vm8581_vm6, %v3646_v61  ;;  %3673 = vmatprep.subr.msk.bf16.mxu1 %vm8583_vm4, %v3672_v53  ;;  %vm8585_vm13 = vnez %v8584_v32  ;;  %vm8587_vm15 = vnez %v8586_v16  ;;  %vm8593_vm14 = vmmov %vm8592_vm9  ;;  %vm8597_vm1 = vnez %v8596_v60  ;;  %vm8599_vm3 = vnez %v8598_v4  ;;  %v8618_v53 = vld [vmem:[#allocation46_spill] sm:$0xff] }
 0xf16   :  { %3650 = vmatpush1.bf16.msk.msra.mxu0 %vm8585_vm13, %v3649_v27  ;;  %v4403_v47 = vpop.permute.xlu1 %4402  ;;  %v2998_v48 = vsel %vm8588_vm5, %v4394_v29, %v4395_v35  ;;  %v2999_v34 = vsel %vm8589_vm7, %v4400_v6, %v4394_v29  ;;  %v2996_v50 = vsel %vm8590_vm0, %v4399_v52, %v4400_v6  ;;  %v2997_v2 = vsel %vm8591_vm11, %v4395_v35, %v4399_v52  ;;  %vm8594_vm12 = vmmov %vm8592_vm9  ;;  %v3104_v27 = vld [vmem:[%s7512_s1 + $0x38] sm:$0x3] }
 0xf17   :  { %3676 = vmatpush1.bf16.msk.msra.mxu1 %vm8587_vm15, %v3675_v44  ;;  %v4405_v13 = vunpack.i.h.bf16 %v4403_v47  ;;  %v4404_v12 = vunpack.i.l.bf16 %v4403_v47  ;;  %v4408_v41 = vpop.permute.xlu0 %4407  ;;  %vm8595_vm8 = vmmov %vm8592_vm9  ;;  %vm8601_vm2 = vnez %v8600_v63  ;;  %vm8603_vm10 = vnez %v8602_v56 }
 0xf18   :  { %v4410_v23 = vunpack.i.h.bf16 %v4408_v41  ;;  %v4409_v30 = vunpack.i.l.bf16 %v4408_v41  ;;  %vm8604_vm6 = vcmp.lt.s32.totalorder %v4583_v9, 17  ;;  %vm8608_vm5 = vcmp.lt.s32.totalorder %v4583_v9, 16 }
 0xf19   :  { %v3014_v38 = vsel %vm8592_vm9, %v4404_v12, %v4405_v13  ;;  %vm8605_vm4 = vmmov %vm8604_vm6  ;;  %vm8613_vm9 = vnez %v8612_v7 }
 0xf1a   :  { %v3652_v28 = vpack.c.bf16 %v3014_v38, %v2998_v48  ;;  %v3015_v20 = vsel %vm8593_vm14, %v4410_v23, %v4404_v12  ;;  %v3012_v33 = vsel %vm8594_vm12, %v4409_v30, %v4410_v23  ;;  %v3013_v25 = vsel %vm8595_vm8, %v4405_v13, %v4409_v30  ;;  %v4413_v39 = vpop.permute.xlu1 %4412  ;;  %vm8606_vm13 = vmmov %vm8605_vm4 }
 0xf1b   :  { %v3655_v5 = vpack.c.bf16 %v3015_v20, %v2999_v34  ;;  %v3678_v58 = vpack.c.bf16 %v3012_v33, %v2996_v50  ;;  %v3681_v59 = vpack.c.bf16 %v3013_v25, %v2997_v2  ;;  %v4418_v49 = vpop.permute.xlu0 %4417  ;;  %v4415_v14 = vunpack.i.h.bf16 %v4413_v39  ;;  %vm8607_vm15 = vmmov %vm8605_vm4 }
 0xf1c   :  { %v4414_v57 = vunpack.i.l.bf16 %v4413_v39  ;;  %3653 = vmatprep.subr.msk.bf16.mxu0 %vm8597_vm1, %v3652_v28  ;;  %v4420_v51 = vunpack.i.h.bf16 %v4418_v49  ;;  %v4419_v21 = vunpack.i.l.bf16 %v4418_v49  ;;  %vm8609_vm7 = vmmov %vm8608_vm5  ;;  %vm8615_vm14 = vnez %v8614_v22 }
 0xf1d   :  { %3679 = vmatprep.subr.msk.bf16.mxu1 %vm8599_vm3, %v3678_v58  ;;  %3656 = vmatpush1.bf16.msk.msra.mxu0 %vm8601_vm2, %v3655_v5  ;;  %vm8610_vm0 = vmmov %vm8608_vm5  ;;  %vm8617_vm12 = vnez %v8616_v31  ;;  %vm8619_vm8 = vnez %v8618_v53  ;;  %vm8620_vm1 = vcmask 588800  }
 0xf1e   :  { %3682 = vmatpush1.bf16.msk.msra.mxu1 %vm8603_vm10, %v3681_v59  ;;  %v4423_v10 = vpop.permute.xlu1 %4422  ;;  %v2966_v46 = vsel %vm8604_vm6, %v4414_v57, %v4415_v14  ;;  %v2967_v54 = vsel %vm8605_vm4, %v4420_v51, %v4414_v57  ;;  %v2964_v42 = vsel %vm8606_vm13, %v4419_v21, %v4420_v51  ;;  %v2965_v3 = vsel %vm8607_vm15, %v4415_v14, %v4419_v21  ;;  %vm8611_vm11 = vmmov %vm8610_vm0 }
 0xf1f   :  { %v4425_v37 = vunpack.i.h.bf16 %v4423_v10  ;;  %v4424_v36 = vunpack.i.l.bf16 %v4423_v10  ;;  %v4428_v40 = vpop.permute.xlu0 %4427  ;;  %vm8621_vm3 = vmmov %vm8620_vm1 }
 0xf20   :  { %v4430_v0 = vunpack.i.h.bf16 %v4428_v40  ;;  %v4429_v17 = vunpack.i.l.bf16 %v4428_v40 }
 0xf21   :  { %v2982_v62 = vsel %vm8608_vm5, %v4424_v36, %v4425_v37 }
 0xf22   :  { %v3658_v24 = vpack.c.bf16 %v2982_v62, %v2966_v46  ;;  %v2983_v18 = vsel %vm8609_vm7, %v4430_v0, %v4424_v36  ;;  %v2980_v8 = vsel %vm8610_vm0, %v4429_v17, %v4430_v0  ;;  %v2981_v26 = vsel %vm8611_vm11, %v4425_v37, %v4429_v17 }
 0xf23   :  { %v3661_v55 = vpack.c.bf16 %v2983_v18, %v2967_v54  ;;  %v3684_v45 = vpack.c.bf16 %v2980_v8, %v2964_v42  ;;  %v3687_v1 = vpack.c.bf16 %v2981_v26, %v2965_v3 }
 0xf24   :  { %3659 = vmatprep.subr.msk.bf16.mxu0 %vm8613_vm9, %v3658_v24 }
 0xf25   :  { %3685 = vmatprep.subr.msk.bf16.mxu1 %vm8615_vm14, %v3684_v45  ;;  %3662 = vmatpush1.bf16.msk.msra.mxu0 %vm8617_vm12, %v3661_v55 }
 0xf26   :  { %3688 = vmatpush1.bf16.msk.msra.mxu1 %vm8619_vm8, %v3687_v1 }
 0xf28   :  { %3663 = vmatmul.mubr.msk.bf16.vlgmr.msra.gmra.mxu0 %vm8620_vm1, %v3104_v27 }
 0xf29   :  { %3689 = vmatmul.mubr.msk.bf16.vlgmr.msra.gmra.mxu1 %vm8621_vm3, %v3104_v27 }
 0xf2b   :  { %v3109_v44 = vpop.permute.xlu1 %3108 }
 0xfe8   :  { %v3160_v9 = vpop.f32.mrf.mxu0 }
 0xfe9   :  { %v3201_v61 = vpop.f32.mrf.mxu1  ;;  %v3161_v19 = vadd.f32 %v3160_v9, %v3109_v44 }
 0xfea   :  { %v3162_v15 = vpop.f32.mrf.mxu0  ;;  %v3202_v6 = vadd.f32 %v3201_v61, %v3109_v44 }
 0xfeb   :  { %v3163_v35 = vadd.f32 %v3162_v15, %v3109_v44  ;;  %v3203_v29 = vpop.f32.mrf.mxu1 }
 0xfec   :  { %v3204_v52 = vadd.f32 %v3203_v29, %v3109_v44  ;;  %v3164_v43 = vpop.f32.mrf.mxu0 }
 0xfed   :  { %v3212_v11 = vcombine.low %v3161_v19, %v3163_v35  ;;  %v3205_v32 = vpop.f32.mrf.mxu1 }
 0xfee   :  { %v3213_v47 = vcombine.low %v3202_v6, %v3204_v52  ;;  %v3165_v16 = vpop.f32.mrf.mxu0 }
 0xfef   :  { %3216 = vst [vmem:[%s7514_s3] sm:$0x77] %v3212_v11  ;;  %v3206_v13 = vpop.f32.mrf.mxu1 }
 0xff0   :  { %3217 = vst [vmem:[%s7514_s3 + $0x8] sm:$0x77] %v3213_v47 }

</bundles_post_ra>
